<compile_context>
chip_gen: v6e
topology: v6e:2x2x1
jax: 0.10.0
libtpu: 0.0.40
codegen_flags: <defaults>
</compile_context>

<pallas_src>
import functools
import math
from typing import NamedTuple

import jax
import jax.numpy as jnp
from jax.experimental import pallas as pl
from jax.experimental.pallas import tpu as pltpu

NEG_INF = -1e9
ACT_DTYPE = jnp.bfloat16          # activation / MXU-operand dtype
LANE = 128
VMEM_LIMIT = 48 * 1024 * 1024     # above 16/32MiB scoped defaults, < v7x 64MiB


def _round_up(x, m):
    return ((x + m - 1) // m) * m


def _pad_dim(d):
    """Pad a weight/activation width once at init (256/1024-friendly)."""
    if d >= 2048:
        return _round_up(d, 1024)
    if d >= 256:
        return _round_up(d, 256)
    return _round_up(d, LANE)


def _pick_tile(dim, preferred, step=LANE):
    """Largest multiple of `step` that divides `dim` and is <= preferred."""
    assert dim % step == 0, (dim, step)
    t = max(step, min(preferred, dim))
    t -= t % step
    while dim % t:
        t -= step
    return t


def _seq_tile(t, preferred):
    """(tile, padded_len) for a sequence axis; no padding when t <= tile."""
    if t <= preferred:
        return t, t
    return preferred, _round_up(t, preferred)


# ----------------------------- tiled linear (MXU) -----------------------------

def _matmul_kernel(x_ref, w_ref, b_ref, o_ref, acc_ref, *, activation):
    k = pl.program_id(2)

    @pl.when(k == 0)
    def _():
        acc_ref[...] = jnp.zeros_like(acc_ref)

    acc_ref[...] += jnp.dot(x_ref[...], w_ref[...],
                            preferred_element_type=jnp.float32)

    @pl.when(k == pl.num_programs(2) - 1)
    def _():
        y = acc_ref[...] + b_ref[...].astype(jnp.float32)
        if activation == "relu":
            y = jnp.maximum(y, 0.0)
        o_ref[...] = y.astype(o_ref.dtype)


def linear(x, w, b, activation=None, out_dtype=None, tm=512, tn=1024, tk=512):
    """x:(M,K) @ w:(K,N) + b:(1,N).  K, N are already lane-padded at init."""
    M, K = x.shape
    N = w.shape[1]
    out_dtype = x.dtype if out_dtype is None else out_dtype

    tn = _pick_tile(N, tn)
    tk = _pick_tile(K, tk)
    tm = min(tm, _round_up(M, 16))
    Mp = _round_up(M, tm)
    xp = x if Mp == M else jnp.pad(x, ((0, Mp - M), (0, 0)))

    out = pl.pallas_call(
        functools.partial(_matmul_kernel, activation=activation),
        out_shape=jax.ShapeDtypeStruct((Mp, N), out_dtype),
        grid=(Mp // tm, N // tn, K // tk),
        in_specs=[pl.BlockSpec((tm, tk), lambda i, j, k: (i, k)),
                  pl.BlockSpec((tk, tn), lambda i, j, k: (k, j)),
                  pl.BlockSpec((1, tn), lambda i, j, k: (0, j))],
        out_specs=pl.BlockSpec((tm, tn), lambda i, j, k: (i, j)),
        scratch_shapes=[pltpu.VMEM((tm, tn), jnp.float32)],
        compiler_params=pltpu.CompilerParams(
            dimension_semantics=("parallel", "parallel", "arbitrary"),
            vmem_limit_bytes=VMEM_LIMIT),
    )(xp, w, b)
    return out if Mp == M else out[:M]


# ------------------ matmul with fused residual-add + LayerNorm ------------------

def _matmul_add_ln_kernel(x_ref, w_ref, b_ref, r_ref, g_ref, be_ref, o_ref,
                          acc_ref, *, d_valid, eps):
    k = pl.program_id(1)

    @pl.when(k == 0)
    def _():
        acc_ref[...] = jnp.zeros_like(acc_ref)

    acc_ref[...] += jnp.dot(x_ref[...], w_ref[...],
                            preferred_element_type=jnp.float32)

    @pl.when(k == pl.num_programs(1) - 1)
    def _():
        y = (acc_ref[...] + b_ref[...].astype(jnp.float32)
             + r_ref[...].astype(jnp.float32))
        n = y.shape[-1]
        if d_valid < n:                      # exclude padded model-dim columns
            col = jax.lax.broadcasted_iota(jnp.int32, y.shape, 1)
            ym = jnp.where(col < d_valid, y, 0.0)
        else:
            ym = y
        inv_d = 1.0 / d_valid
        s1 = jnp.sum(ym, axis=-1, keepdims=True)
        s2 = jnp.sum(ym * ym, axis=-1, keepdims=True)
        mean = s1 * inv_d
        var = s2 * inv_d - mean * mean       # one-pass statistics
        xn = (y - mean) * jax.lax.rsqrt(var + eps)
        o_ref[...] = (xn * g_ref[...].astype(jnp.float32)
                      + be_ref[...].astype(jnp.float32)).astype(o_ref.dtype)


def linear_add_ln(x, w, b, res, gamma, beta, *, d_valid, eps=1e-5,
                  out_dtype=None, tm=256, tk=512):
    """LayerNorm(res + x @ w + b); LN fused into the matmul finalize.

    The output width N (padded model dim) is a single lane-dense tile so the
    row statistics are available in the finalize.
    """
    M, K = x.shape
    N = w.shape[1]
    out_dtype = x.dtype if out_dtype is None else out_dtype

    tk = _pick_tile(K, tk)
    tm = min(tm, _round_up(M, 16))
    Mp = _round_up(M, tm)
    if Mp != M:
        x = jnp.pad(x, ((0, Mp - M), (0, 0)))
        res = jnp.pad(res, ((0, Mp - M), (0, 0)))

    out = pl.pallas_call(
        functools.partial(_matmul_add_ln_kernel, d_valid=d_valid, eps=eps),
        out_shape=jax.ShapeDtypeStruct((Mp, N), out_dtype),
        grid=(Mp // tm, K // tk),
        in_specs=[pl.BlockSpec((tm, tk), lambda i, k: (i, k)),
                  pl.BlockSpec((tk, N), lambda i, k: (k, 0)),
                  pl.BlockSpec((1, N), lambda i, k: (0, 0)),
                  pl.BlockSpec((tm, N), lambda i, k: (i, 0)),
                  pl.BlockSpec((1, N), lambda i, k: (0, 0)),
                  pl.BlockSpec((1, N), lambda i, k: (0, 0))],
        out_specs=pl.BlockSpec((tm, N), lambda i, k: (i, 0)),
        scratch_shapes=[pltpu.VMEM((tm, N), jnp.float32)],
        compiler_params=pltpu.CompilerParams(
            dimension_semantics=("parallel", "arbitrary"),
            vmem_limit_bytes=VMEM_LIMIT),
    )(x, w, b, res, gamma, beta)
    return out if Mp == M else out[:M]


# ----------------------------- standalone LayerNorm -----------------------------

def _ln_kernel(x_ref, g_ref, b_ref, o_ref, *, d_valid, eps):
    y = x_ref[...].astype(jnp.float32)
    n = y.shape[-1]
    if d_valid < n:
        col = jax.lax.broadcasted_iota(jnp.int32, y.shape, 1)
        ym = jnp.where(col < d_valid, y, 0.0)
    else:
        ym = y
    inv_d = 1.0 / d_valid
    s1 = jnp.sum(ym, axis=-1, keepdims=True)
    s2 = jnp.sum(ym * ym, axis=-1, keepdims=True)
    mean = s1 * inv_d
    var = s2 * inv_d - mean * mean
    xn = (y - mean) * jax.lax.rsqrt(var + eps)
    o_ref[...] = (xn * g_ref[...].astype(jnp.float32)
                  + b_ref[...].astype(jnp.float32)).astype(o_ref.dtype)


def layernorm2d(x2d, gamma, beta, *, d_valid, eps=1e-5, tm=512):
    M, Dp = x2d.shape
    tm = min(tm, _round_up(M, 16))
    Mp = _round_up(M, tm)
    xp = x2d if Mp == M else jnp.pad(x2d, ((0, Mp - M), (0, 0)))
    out = pl.pallas_call(
        functools.partial(_ln_kernel, d_valid=d_valid, eps=eps),
        out_shape=jax.ShapeDtypeStruct((Mp, Dp), x2d.dtype),
        grid=(Mp // tm,),
        in_specs=[pl.BlockSpec((tm, Dp), lambda i: (i, 0)),
                  pl.BlockSpec((1, Dp), lambda i: (0, 0)),
                  pl.BlockSpec((1, Dp), lambda i: (0, 0))],
        out_specs=pl.BlockSpec((tm, Dp), lambda i: (i, 0)),
        compiler_params=pltpu.CompilerParams(
            dimension_semantics=("parallel",)),
    )(xp, gamma, beta)
    return out if Mp == M else out[:M]


# ----------------------------- flash attention -----------------------------

def _flash_attn_kernel(q_ref, k_ref, v_ref, o_ref, m_sc, l_sc, acc_sc, *,
                       causal, tq, tk, kv_len, kv_pad):
    qi = pl.program_id(2)
    ki = pl.program_id(3)

    @pl.when(ki == 0)
    def _():
        m_sc[...] = jnp.full(m_sc.shape, -jnp.inf, dtype=m_sc.dtype)
        l_sc[...] = jnp.zeros_like(l_sc)
        acc_sc[...] = jnp.zeros_like(acc_sc)

    def update():
        q = q_ref[0]                                     # (tq, dh_p) bf16
        k = k_ref[0]                                     # (tk, dh_p) bf16
        # contract on head_dim directly -> no K transpose through the XLU
        s = jax.lax.dot_general(q, k, (((1,), (1,)), ((), ())),
                                preferred_element_type=jnp.float32)
        mask = None
        if causal:
            row = qi * tq + jax.lax.broadcasted_iota(jnp.int32, (tq, tk), 0)
            col = ki * tk + jax.lax.broadcasted_iota(jnp.int32, (tq, tk), 1)
            mask = col > row
            if kv_len < kv_pad:
                mask = mask | (col >= kv_len)
        elif kv_len < kv_pad:
            col = ki * tk + jax.lax.broadcasted_iota(jnp.int32, (tq, tk), 1)
            mask = col >= kv_len
        if mask is not None:
            s = jnp.where(mask, NEG_INF, s)

        m_prev = m_sc[...]
        m_new = jnp.maximum(m_prev, jnp.max(s, axis=-1, keepdims=True))
        alpha = jnp.exp(m_prev - m_new)
        p = jnp.exp(s - m_new)
        l_sc[...] = alpha * l_sc[...] + jnp.sum(p, axis=-1, keepdims=True)
        acc_sc[...] = alpha * acc_sc[...] + jnp.dot(
            p.astype(v_ref.dtype), v_ref[0], preferred_element_type=jnp.float32)
        m_sc[...] = m_new

    if causal:
        # Skip K tiles entirely above the diagonal (~2x less score work).
        @pl.when(ki * tk <= qi * tq + (tq - 1))
        def _():
            update()
    else:
        update()

    @pl.when(ki == pl.num_programs(3) - 1)
    def _():
        inv_l = pl.reciprocal(l_sc[...], approx=True)
        o_ref[0] = (acc_sc[...] * inv_l).astype(o_ref.dtype)


def attention(q_arr, k_arr, v_arr, q_off, k_off, v_off, *, num_heads, dh_p,
              causal, tq=256, tkv=256):
    """Flash attention over head-major, 128-lane-padded q/k/v slabs.

    q_arr:(B,Tq,*), k_arr/v_arr:(B,Tk,*); head h of q/k/v is the last-axis
    block (q_off+h) / (k_off+h) / (v_off+h), each dh_p lanes wide -- the fused
    qkv / kv projection output is consumed directly, no XLA slicing.  The
    1/sqrt(dh) scale is folded into the Q projection weights at init.
    """
    B, Tq = q_arr.shape[:2]
    Tk = k_arr.shape[1]
    tq, Tqp = _seq_tile(Tq, tq)
    tkv, Tkp = _seq_tile(Tk, tkv)

    if Tqp != Tq:
        q_arr = jnp.pad(q_arr, ((0, 0), (0, Tqp - Tq), (0, 0)))
    if Tkp != Tk:
        same_kv = v_arr is k_arr
        k_arr = jnp.pad(k_arr, ((0, 0), (0, Tkp - Tk), (0, 0)))
        v_arr = k_arr if same_kv else jnp.pad(
            v_arr, ((0, 0), (0, Tkp - Tk), (0, 0)))

    out = pl.pallas_call(
        functools.partial(_flash_attn_kernel, causal=causal, tq=tq, tk=tkv,
                          kv_len=Tk, kv_pad=Tkp),
        out_shape=jax.ShapeDtypeStruct((B, Tqp, num_heads * dh_p), q_arr.dtype),
        grid=(B, num_heads, Tqp // tq, Tkp // tkv),
        in_specs=[
            pl.BlockSpec((1, tq, dh_p), lambda b, h, qi, ki: (b, qi, q_off + h)),
            pl.BlockSpec((1, tkv, dh_p), lambda b, h, qi, ki: (b, ki, k_off + h)),
            pl.BlockSpec((1, tkv, dh_p), lambda b, h, qi, ki: (b, ki, v_off + h)),
        ],
        out_specs=pl.BlockSpec((1, tq, dh_p), lambda b, h, qi, ki: (b, qi, h)),
        scratch_shapes=[pltpu.VMEM((tq, 1), jnp.float32),
                        pltpu.VMEM((tq, 1), jnp.float32),
                        pltpu.VMEM((tq, dh_p), jnp.float32)],
        compiler_params=pltpu.CompilerParams(
            dimension_semantics=("parallel", "parallel", "parallel",
                                 "arbitrary")),
    )(q_arr, k_arr, v_arr)
    return out if Tqp == Tq else out[:, :Tq]


# ----------------------------- model glue -----------------------------

class Config(NamedTuple):
    vocab_size: int
    block_size: int
    d_model: int
    num_heads: int
    n_layer: int
    d_pad: int
    dh: int
    dh_p: int
    f_pad: int
    v_pad: int


def make_config(vocab_size, block_size, d_model, num_heads, n_layer):
    assert d_model % num_heads == 0, "num_heads must divide d_model"
    dh = d_model // num_heads
    return Config(vocab_size, block_size, d_model, num_heads, n_layer,
                  _pad_dim(d_model), dh, _round_up(dh, LANE),
                  _pad_dim(4 * d_model), _pad_dim(vocab_size))


def _self_attn_block(p, ln_p, x2d, B, T, cfg, causal):
    H, dh_p = cfg.num_heads, cfg.dh_p
    qkv = linear(x2d, p["wqkv"]["w"], p["wqkv"]["b"]).reshape(B, T, 3 * H * dh_p)
    o = attention(qkv, qkv, qkv, 0, H, 2 * H,
                  num_heads=H, dh_p=dh_p, causal=causal)
    return linear_add_ln(o.reshape(B * T, H * dh_p), p["wo"]["w"], p["wo"]["b"],
                         x2d, ln_p["g"], ln_p["b"], d_valid=cfg.d_model)


def _cross_attn_block(p, ln_p, x2d, enc2d, B, T, cfg):
    H, dh_p = cfg.num_heads, cfg.dh_p
    q = linear(x2d, p["wq"]["w"], p["wq"]["b"]).reshape(B, T, H * dh_p)
    kv = linear(enc2d, p["wkv"]["w"], p["wkv"]["b"]).reshape(B, T, 2 * H * dh_p)
    o = attention(q, kv, kv, 0, 0, H, num_heads=H, dh_p=dh_p, causal=False)
    return linear_add_ln(o.reshape(B * T, H * dh_p), p["wo"]["w"], p["wo"]["b"],
                         x2d, ln_p["g"], ln_p["b"], d_valid=cfg.d_model)


def _ffn_block(p, ln_p, x2d, cfg):
    h = linear(x2d, p["fc1"]["w"], p["fc1"]["b"], activation="relu")
    return linear_add_ln(h, p["fc2"]["w"], p["fc2"]["b"],
                         x2d, ln_p["g"], ln_p["b"], d_valid=cfg.d_model)


def encoder_layer(p, x2d, B, T, cfg):
    x2d = _self_attn_block(p["sa"], p["ln1"], x2d, B, T, cfg, causal=False)
    x2d = _ffn_block(p["ffn"], p["ln2"], x2d, cfg)
    return x2d


def decoder_layer(p, x2d, enc2d, B, T, cfg):
    x2d = _self_attn_block(p["sa"], p["ln1"], x2d, B, T, cfg, causal=True)
    x2d = _cross_attn_block(p["ca"], p["ln2"], x2d, enc2d, B, T, cfg)
    x2d = _ffn_block(p["ffn"], p["ln3"], x2d, cfg)
    return x2d


def gpt_forward(params, idx, targets=None, *, cfg):
    B, T = idx.shape
    # TODO(synk): embedding lookup stays an XLA gather (jnp.take); a Pallas DMA
    # gather is not worthwhile at these sizes.
    tok = jnp.take(params["tok_emb"], idx, axis=0)            # (B, T, Dp) f32
    pos = params["pos_emb"][:T]                               # (T, Dp)    f32
    x2d = (tok + pos[None]).astype(ACT_DTYPE).reshape(B * T, cfg.d_pad)

    # Transformer(x, x): encoder stack on the src copy, decoder on the tgt copy.
    src = x2d
    for lp in params["enc_layers"]:
        src = encoder_layer(lp, src, B, T, cfg)
    dec = x2d
    for lp in params["dec_layers"]:
        dec = decoder_layer(lp, dec, src, B, T, cfg)

    h = layernorm2d(dec, params["final_ln"]["g"], params["final_ln"]["b"],
                    d_valid=cfg.d_model)
    # bf16 logits halve the largest HBM write; loss math runs in f32 below.
    logits = linear(h, params["head_lm"]["w"], params["head_lm"]["b"])
    V = cfg.vocab_size
    if logits.shape[1] != V:
        logits = logits[:, :V]

    loss = None
    if targets is not None:
        # TODO(synk): logits must be returned, so the LM-head+loss fusion that
        # avoids materializing logits does not apply; loss stays in XLA (f32).
        logp = jax.nn.log_softmax(logits.astype(jnp.float32), axis=-1)
        loss = -jnp.mean(jnp.take_along_axis(logp, targets.reshape(B * T, 1),
                                             axis=1))
    return logits.reshape(B, T, V), loss


# ----------------------------- deterministic init -----------------------------

def _keygen(key):
    while True:
        key, sub = jax.random.split(key)
        yield sub


def init_params(key, cfg):
    """All weights are padded / head-major-packed ONCE here (no per-call pads)."""
    kg = _keygen(key)
    D, Dp = cfg.d_model, cfg.d_pad
    H, dh, dh_p = cfg.num_heads, cfg.dh, cfg.dh_p
    F, Fp = 4 * cfg.d_model, cfg.f_pad
    V, Vp = cfg.vocab_size, cfg.v_pad

    def dense(din, dout):
        return 0.02 * jax.random.normal(next(kg), (din, dout), jnp.float32)

    def pad_w(w, rp, cp):
        out = jnp.zeros((rp, cp), jnp.float32)
        out = out.at[:w.shape[0], :w.shape[1]].set(w)
        return out.astype(ACT_DTYPE)

    def head_cols(w, rp):
        """(din, H*dh) -> (rp, H*dh_p): head h in lane slab [h*dh_p, h*dh_p+dh)."""
        out = jnp.zeros((rp, H * dh_p), jnp.float32)
        for h in range(H):
            out = out.at[:w.shape[0], h * dh_p:h * dh_p + dh].set(
                w[:, h * dh:(h + 1) * dh])
        return out.astype(ACT_DTYPE)

    def head_rows(w, cp):
        """(H*dh, dout) -> (H*dh_p, cp): rows at padded head lanes are zero."""
        out = jnp.zeros((H * dh_p, cp), jnp.float32)
        for h in range(H):
            out = out.at[h * dh_p:h * dh_p + dh, :w.shape[1]].set(
                w[h * dh:(h + 1) * dh, :])
        return out.astype(ACT_DTYPE)

    def bias(n):
        return jnp.zeros((1, n), jnp.float32)

    def ln():
        g = jnp.zeros((1, Dp), jnp.float32).at[:, :D].set(1.0)
        return {"g": g, "b": jnp.zeros((1, Dp), jnp.float32)}

    scale = 1.0 / math.sqrt(dh)     # folded into Wq: softmax((q*s)k^T)==softmax(s*qk^T)

    def self_mha():
        wq, wk, wv = dense(D, D) * scale, dense(D, D), dense(D, D)
        wqkv = jnp.concatenate([head_cols(wq, Dp), head_cols(wk, Dp),
                                head_cols(wv, Dp)], axis=1)
        return {"wqkv": {"w": wqkv, "b": bias(3 * H * dh_p)},
                "wo": {"w": head_rows(dense(D, D), Dp), "b": bias(Dp)}}

    def cross_mha():
        wq, wk, wv = dense(D, D) * scale, dense(D, D), dense(D, D)
        wkv = jnp.concatenate([head_cols(wk, Dp), head_cols(wv, Dp)], axis=1)
        return {"wq": {"w": head_cols(wq, Dp), "b": bias(H * dh_p)},
                "wkv": {"w": wkv, "b": bias(2 * H * dh_p)},
                "wo": {"w": head_rows(dense(D, D), Dp), "b": bias(Dp)}}

    def ffn():
        return {"fc1": {"w": pad_w(dense(D, F), Dp, Fp), "b": bias(Fp)},
                "fc2": {"w": pad_w(dense(F, D), Fp, Dp), "b": bias(Dp)}}

    enc = [{"sa": self_mha(), "ffn": ffn(), "ln1": ln(), "ln2": ln()}
           for _ in range(cfg.n_layer)]
    dec = [{"sa": self_mha(), "ca": cross_mha(), "ffn": ffn(),
            "ln1": ln(), "ln2": ln(), "ln3": ln()} for _ in range(cfg.n_layer)]

    tok = jnp.zeros((V, Dp), jnp.float32).at[:, :D].set(
        0.02 * jax.random.normal(next(kg), (V, D), jnp.float32))
    pos = jnp.zeros((cfg.block_size, Dp), jnp.float32).at[:, :D].set(
        0.02 * jax.random.normal(next(kg), (cfg.block_size, D), jnp.float32))

    return {"tok_emb": tok, "pos_emb": pos,
            "enc_layers": enc, "dec_layers": dec,
            "final_ln": ln(),
            "head_lm": {"w": pad_w(dense(D, V), Dp, Vp), "b": bias(Vp)}}


# ----------------------------- demo -----------------------------

if __name__ == "__main__":
    vocab_size = 65
    block_size = 8
    d_model = 32
    num_head = 4
    n_layer = 2
    B, T = 2, 8

    cfg = make_config(vocab_size, block_size, d_model, num_head, n_layer)
    params = init_params(jax.random.PRNGKey(0), cfg)

    kidx, ktgt = jax.random.split(jax.random.PRNGKey(1))
    idx = jax.random.randint(kidx, (B, T), 0, vocab_size, dtype=jnp.int32)
    targets = jax.random.randint(ktgt, (B, T), 0, vocab_size, dtype=jnp.int32)

    fwd = jax.jit(functools.partial(gpt_forward, cfg=cfg))
    logits, loss = fwd(params, idx, targets)
    jax.block_until_ready((logits, loss))

    assert logits.shape == (B, T, vocab_size)
    assert loss.shape == ()
    assert bool(jnp.isfinite(loss))
    assert bool(jnp.all(jnp.isfinite(logits.astype(jnp.float32))))
    print("KERNEL_OK")
</pallas_src>

<mosaic_0001>
module attributes {stable_mosaic.version = 11 : i64} {
  func.func @_matmul_kernel(%arg0: i32, %arg1: i32, %arg2: i32, %arg3: memref<16x128xbf16, #tpu.memory_space<vmem>>, %arg4: memref<128x768xbf16, #tpu.memory_space<vmem>>, %arg5: memref<1x768xf32, #tpu.memory_space<vmem>>, %arg6: memref<16x768xbf16, #tpu.memory_space<vmem>>, %arg7: memref<16x768xf32, #tpu.memory_space<vmem>>) attributes {dimension_semantics = [#tpu.dimension_semantics<parallel>, #tpu.dimension_semantics<parallel>, #tpu.dimension_semantics<arbitrary>], iteration_bounds = array<i64: 1, 2, 1>, scalar_prefetch = 0 : i64, scratch_operands = 1 : i64, tpu.core_type = #tpu.core_type<tc>, window_params = [{transform_indices = @transform_0, window_bounds = array<i64: 16, 128>}, {transform_indices = @transform_1, window_bounds = array<i64: 128, 768>}, {transform_indices = @transform_2, window_bounds = array<i64: 1, 768>}, {transform_indices = @transform_3, window_bounds = array<i64: 16, 768>}]} {
    %c0_i32 = arith.constant 0 : i32
    %0 = arith.cmpi eq, %arg2, %c0_i32 : i32
    %1 = arith.extui %0 : i1 to i32
    %c0_i32_0 = arith.constant 0 : i32
    %2 = arith.cmpi ne, %1, %c0_i32_0 : i32
    scf.if %2 {
      %cst_10 = arith.constant 0.000000e+00 : f32
      %12 = vector.broadcast %cst_10 : f32 to vector<16x768xf32>
      %c0_11 = arith.constant 0 : index
      %c0_12 = arith.constant 0 : index
      %13 = vector.load %arg7[%c0_11, %c0_12] : memref<16x768xf32, #tpu.memory_space<vmem>>, vector<16x768xf32>
      tpu.vector_store %arg7[%c0_11, %c0_12], %12 {strides = array<i32>} : memref<16x768xf32, #tpu.memory_space<vmem>>, vector<16x768xf32>,
    } else {
    }
    %c0 = arith.constant 0 : index
    %c0_1 = arith.constant 0 : index
    %3 = vector.load %arg7[%c0, %c0_1] : memref<16x768xf32, #tpu.memory_space<vmem>>, vector<16x768xf32>
    %c0_2 = arith.constant 0 : index
    %c0_3 = arith.constant 0 : index
    %4 = vector.load %arg3[%c0_2, %c0_3] : memref<16x128xbf16, #tpu.memory_space<vmem>>, vector<16x128xbf16>
    %c0_4 = arith.constant 0 : index
    %c0_5 = arith.constant 0 : index
    %5 = vector.load %arg4[%c0_4, %c0_5] : memref<128x768xbf16, #tpu.memory_space<vmem>>, vector<128x768xbf16>
    %cst = arith.constant dense<0.000000e+00> : vector<16x768xf32>
    %6 = tpu.matmul %4, %5, %cst {dimension_numbers = #tpu.dot_dimension_numbers<[1], [0], [0], [1], [0, 0, 1, 1], [], []>} : vector<16x128xbf16>, vector<128x768xbf16>, vector<16x768xf32> -> vector<16x768xf32>
    %7 = arith.addf %3, %6 : vector<16x768xf32>
    %c0_6 = arith.constant 0 : index
    %c0_7 = arith.constant 0 : index
    %8 = vector.load %arg7[%c0_6, %c0_7] : memref<16x768xf32, #tpu.memory_space<vmem>>, vector<16x768xf32>
    tpu.vector_store %arg7[%c0_6, %c0_7], %7 {strides = array<i32>} : memref<16x768xf32, #tpu.memory_space<vmem>>, vector<16x768xf32>,
    %c0_i32_8 = arith.constant 0 : i32
    %9 = arith.cmpi eq, %arg2, %c0_i32_8 : i32
    %10 = arith.extui %9 : i1 to i32
    %c0_i32_9 = arith.constant 0 : i32
    %11 = arith.cmpi ne, %10, %c0_i32_9 : i32
    scf.if %11 {
      %c0_10 = arith.constant 0 : index
      %c0_11 = arith.constant 0 : index
      %12 = vector.load %arg7[%c0_10, %c0_11] : memref<16x768xf32, #tpu.memory_space<vmem>>, vector<16x768xf32>
      %c0_12 = arith.constant 0 : index
      %c0_13 = arith.constant 0 : index
      %13 = vector.load %arg5[%c0_12, %c0_13] : memref<1x768xf32, #tpu.memory_space<vmem>>, vector<1x768xf32>
      %14 = vector.broadcast %13 : vector<1x768xf32> to vector<16x768xf32>
      %15 = arith.addf %12, %14 : vector<16x768xf32>
      %16 = arith.truncf %15 : vector<16x768xf32> to vector<16x768xbf16>
      %c0_14 = arith.constant 0 : index
      %c0_15 = arith.constant 0 : index
      %17 = vector.load %arg6[%c0_14, %c0_15] : memref<16x768xbf16, #tpu.memory_space<vmem>>, vector<16x768xbf16>
      tpu.vector_store %arg6[%c0_14, %c0_15], %16 {strides = array<i32>} : memref<16x768xbf16, #tpu.memory_space<vmem>>, vector<16x768xbf16>,
    } else {
    }
    return
  }
  func.func @transform_0(%arg0: i32, %arg1: i32, %arg2: i32) -> (i32, i32) {
    %c0_i32 = arith.constant 0 : i32
    return %arg0, %arg2 : i32, i32
  }
  func.func @transform_1(%arg0: i32, %arg1: i32, %arg2: i32) -> (i32, i32) {
    %c0_i32 = arith.constant 0 : i32
    return %arg2, %arg1 : i32, i32
  }
  func.func @transform_2(%arg0: i32, %arg1: i32, %arg2: i32) -> (i32, i32) {
    %c0_i32 = arith.constant 0 : i32
    %c0_i32_0 = arith.constant 0 : i32
    return %c0_i32, %arg1 : i32, i32
  }
  func.func @transform_3(%arg0: i32, %arg1: i32, %arg2: i32) -> (i32, i32) {
    %c0_i32 = arith.constant 0 : i32
    return %arg0, %arg1 : i32, i32
  }
}

module attributes {stable_mosaic.version = 11 : i64} {
  func.func @_matmul_kernel(%arg0: i32, %arg1: i32, %arg2: i32, %arg3: memref<16x128xbf16, #tpu.memory_space<vmem>>, %arg4: memref<128x512xbf16, #tpu.memory_space<vmem>>, %arg5: memref<1x512xf32, #tpu.memory_space<vmem>>, %arg6: memref<16x512xbf16, #tpu.memory_space<vmem>>, %arg7: memref<16x512xf32, #tpu.memory_space<vmem>>) attributes {dimension_semantics = [#tpu.dimension_semantics<parallel>, #tpu.dimension_semantics<parallel>, #tpu.dimension_semantics<arbitrary>], iteration_bounds = array<i64: 1, 1, 1>, scalar_prefetch = 0 : i64, scratch_operands = 1 : i64, tpu.core_type = #tpu.core_type<tc>, window_params = [{transform_indices = @transform_0, window_bounds = array<i64: 16, 128>}, {transform_indices = @transform_1, window_bounds = array<i64: 128, 512>}, {transform_indices = @transform_2, window_bounds = array<i64: 1, 512>}, {transform_indices = @transform_3, window_bounds = array<i64: 16, 512>}]} {
    %c0_i32 = arith.constant 0 : i32
    %0 = arith.cmpi eq, %arg2, %c0_i32 : i32
    %1 = arith.extui %0 : i1 to i32
    %c0_i32_0 = arith.constant 0 : i32
    %2 = arith.cmpi ne, %1, %c0_i32_0 : i32
    scf.if %2 {
      %cst_10 = arith.constant 0.000000e+00 : f32
      %12 = vector.broadcast %cst_10 : f32 to vector<16x512xf32>
      %c0_11 = arith.constant 0 : index
      %c0_12 = arith.constant 0 : index
      %13 = vector.load %arg7[%c0_11, %c0_12] : memref<16x512xf32, #tpu.memory_space<vmem>>, vector<16x512xf32>
      tpu.vector_store %arg7[%c0_11, %c0_12], %12 {strides = array<i32>} : memref<16x512xf32, #tpu.memory_space<vmem>>, vector<16x512xf32>,
    } else {
    }
    %c0 = arith.constant 0 : index
    %c0_1 = arith.constant 0 : index
    %3 = vector.load %arg7[%c0, %c0_1] : memref<16x512xf32, #tpu.memory_space<vmem>>, vector<16x512xf32>
    %c0_2 = arith.constant 0 : index
    %c0_3 = arith.constant 0 : index
    %4 = vector.load %arg3[%c0_2, %c0_3] : memref<16x128xbf16, #tpu.memory_space<vmem>>, vector<16x128xbf16>
    %c0_4 = arith.constant 0 : index
    %c0_5 = arith.constant 0 : index
    %5 = vector.load %arg4[%c0_4, %c0_5] : memref<128x512xbf16, #tpu.memory_space<vmem>>, vector<128x512xbf16>
    %cst = arith.constant dense<0.000000e+00> : vector<16x512xf32>
    %6 = tpu.matmul %4, %5, %cst {dimension_numbers = #tpu.dot_dimension_numbers<[1], [0], [0], [1], [0, 0, 1, 1], [], []>} : vector<16x128xbf16>, vector<128x512xbf16>, vector<16x512xf32> -> vector<16x512xf32>
    %7 = arith.addf %3, %6 : vector<16x512xf32>
    %c0_6 = arith.constant 0 : index
    %c0_7 = arith.constant 0 : index
    %8 = vector.load %arg7[%c0_6, %c0_7] : memref<16x512xf32, #tpu.memory_space<vmem>>, vector<16x512xf32>
    tpu.vector_store %arg7[%c0_6, %c0_7], %7 {strides = array<i32>} : memref<16x512xf32, #tpu.memory_space<vmem>>, vector<16x512xf32>,
    %c0_i32_8 = arith.constant 0 : i32
    %9 = arith.cmpi eq, %arg2, %c0_i32_8 : i32
    %10 = arith.extui %9 : i1 to i32
    %c0_i32_9 = arith.constant 0 : i32
    %11 = arith.cmpi ne, %10, %c0_i32_9 : i32
    scf.if %11 {
      %c0_10 = arith.constant 0 : index
      %c0_11 = arith.constant 0 : index
      %12 = vector.load %arg7[%c0_10, %c0_11] : memref<16x512xf32, #tpu.memory_space<vmem>>, vector<16x512xf32>
      %c0_12 = arith.constant 0 : index
      %c0_13 = arith.constant 0 : index
      %13 = vector.load %arg5[%c0_12, %c0_13] : memref<1x512xf32, #tpu.memory_space<vmem>>, vector<1x512xf32>
      %14 = vector.broadcast %13 : vector<1x512xf32> to vector<16x512xf32>
      %15 = arith.addf %12, %14 : vector<16x512xf32>
      %16 = arith.truncf %15 : vector<16x512xf32> to vector<16x512xbf16>
      %c0_14 = arith.constant 0 : index
      %c0_15 = arith.constant 0 : index
      %17 = vector.load %arg6[%c0_14, %c0_15] : memref<16x512xbf16, #tpu.memory_space<vmem>>, vector<16x512xbf16>
      tpu.vector_store %arg6[%c0_14, %c0_15], %16 {strides = array<i32>} : memref<16x512xbf16, #tpu.memory_space<vmem>>, vector<16x512xbf16>,
    } else {
    }
    return
  }
  func.func @transform_0(%arg0: i32, %arg1: i32, %arg2: i32) -> (i32, i32) {
    %c0_i32 = arith.constant 0 : i32
    return %arg0, %arg2 : i32, i32
  }
  func.func @transform_1(%arg0: i32, %arg1: i32, %arg2: i32) -> (i32, i32) {
    %c0_i32 = arith.constant 0 : i32
    return %arg2, %arg1 : i32, i32
  }
  func.func @transform_2(%arg0: i32, %arg1: i32, %arg2: i32) -> (i32, i32) {
    %c0_i32 = arith.constant 0 : i32
    %c0_i32_0 = arith.constant 0 : i32
    return %c0_i32, %arg1 : i32, i32
  }
  func.func @transform_3(%arg0: i32, %arg1: i32, %arg2: i32) -> (i32, i32) {
    %c0_i32 = arith.constant 0 : i32
    return %arg0, %arg1 : i32, i32
  }
}

module attributes {stable_mosaic.version = 11 : i64} {
  func.func @_matmul_add_ln_kernel(%arg0: i32, %arg1: i32, %arg2: memref<16x512xbf16, #tpu.memory_space<vmem>>, %arg3: memref<512x128xbf16, #tpu.memory_space<vmem>>, %arg4: memref<1x128xf32, #tpu.memory_space<vmem>>, %arg5: memref<16x128xbf16, #tpu.memory_space<vmem>>, %arg6: memref<1x128xf32, #tpu.memory_space<vmem>>, %arg7: memref<1x128xf32, #tpu.memory_space<vmem>>, %arg8: memref<16x128xbf16, #tpu.memory_space<vmem>>, %arg9: memref<16x128xf32, #tpu.memory_space<vmem>>) attributes {dimension_semantics = [#tpu.dimension_semantics<parallel>, #tpu.dimension_semantics<arbitrary>], iteration_bounds = array<i64: 1, 1>, scalar_prefetch = 0 : i64, scratch_operands = 1 : i64, tpu.core_type = #tpu.core_type<tc>, window_params = [{transform_indices = @transform_0, window_bounds = array<i64: 16, 512>}, {transform_indices = @transform_1, window_bounds = array<i64: 512, 128>}, {pipeline_mode = #tpu.pipeline_mode<synchronous>, transform_indices = @transform_2, window_bounds = array<i64: 1, 128>}, {transform_indices = @transform_3, window_bounds = array<i64: 16, 128>}, {pipeline_mode = #tpu.pipeline_mode<synchronous>, transform_indices = @transform_4, window_bounds = array<i64: 1, 128>}, {pipeline_mode = #tpu.pipeline_mode<synchronous>, transform_indices = @transform_5, window_bounds = array<i64: 1, 128>}, {transform_indices = @transform_6, window_bounds = array<i64: 16, 128>}]} {
    %c0_i32 = arith.constant 0 : i32
    %0 = arith.cmpi eq, %arg1, %c0_i32 : i32
    %1 = arith.extui %0 : i1 to i32
    %c0_i32_0 = arith.constant 0 : i32
    %2 = arith.cmpi ne, %1, %c0_i32_0 : i32
    scf.if %2 {
      %cst_10 = arith.constant 0.000000e+00 : f32
      %12 = vector.broadcast %cst_10 : f32 to vector<16x128xf32>
      %c0_11 = arith.constant 0 : index
      %c0_12 = arith.constant 0 : index
      %13 = vector.load %arg9[%c0_11, %c0_12] : memref<16x128xf32, #tpu.memory_space<vmem>>, vector<16x128xf32>
      tpu.vector_store %arg9[%c0_11, %c0_12], %12 {strides = array<i32>} : memref<16x128xf32, #tpu.memory_space<vmem>>, vector<16x128xf32>,
    } else {
    }
    %c0 = arith.constant 0 : index
    %c0_1 = arith.constant 0 : index
    %3 = vector.load %arg9[%c0, %c0_1] : memref<16x128xf32, #tpu.memory_space<vmem>>, vector<16x128xf32>
    %c0_2 = arith.constant 0 : index
    %c0_3 = arith.constant 0 : index
    %4 = vector.load %arg2[%c0_2, %c0_3] : memref<16x512xbf16, #tpu.memory_space<vmem>>, vector<16x512xbf16>
    %c0_4 = arith.constant 0 : index
    %c0_5 = arith.constant 0 : index
    %5 = vector.load %arg3[%c0_4, %c0_5] : memref<512x128xbf16, #tpu.memory_space<vmem>>, vector<512x128xbf16>
    %cst = arith.constant dense<0.000000e+00> : vector<16x128xf32>
    %6 = tpu.matmul %4, %5, %cst {dimension_numbers = #tpu.dot_dimension_numbers<[1], [0], [0], [1], [0, 0, 1, 1], [], []>} : vector<16x512xbf16>, vector<512x128xbf16>, vector<16x128xf32> -> vector<16x128xf32>
    %7 = arith.addf %3, %6 : vector<16x128xf32>
    %c0_6 = arith.constant 0 : index
    %c0_7 = arith.constant 0 : index
    %8 = vector.load %arg9[%c0_6, %c0_7] : memref<16x128xf32, #tpu.memory_space<vmem>>, vector<16x128xf32>
    tpu.vector_store %arg9[%c0_6, %c0_7], %7 {strides = array<i32>} : memref<16x128xf32, #tpu.memory_space<vmem>>, vector<16x128xf32>,
    %c0_i32_8 = arith.constant 0 : i32
    %9 = arith.cmpi eq, %arg1, %c0_i32_8 : i32
    %10 = arith.extui %9 : i1 to i32
    %c0_i32_9 = arith.constant 0 : i32
    %11 = arith.cmpi ne, %10, %c0_i32_9 : i32
    scf.if %11 {
      %c0_10 = arith.constant 0 : index
      %c0_11 = arith.constant 0 : index
      %12 = vector.load %arg9[%c0_10, %c0_11] : memref<16x128xf32, #tpu.memory_space<vmem>>, vector<16x128xf32>
      %c0_12 = arith.constant 0 : index
      %c0_13 = arith.constant 0 : index
      %13 = vector.load %arg4[%c0_12, %c0_13] : memref<1x128xf32, #tpu.memory_space<vmem>>, vector<1x128xf32>
      %14 = vector.broadcast %13 : vector<1x128xf32> to vector<16x128xf32>
      %15 = arith.addf %12, %14 : vector<16x128xf32>
      %c0_14 = arith.constant 0 : index
      %c0_15 = arith.constant 0 : index
      %16 = vector.load %arg5[%c0_14, %c0_15] : memref<16x128xbf16, #tpu.memory_space<vmem>>, vector<16x128xbf16>
      %17 = arith.extf %16 : vector<16x128xbf16> to vector<16x128xf32>
      %18 = arith.addf %15, %17 : vector<16x128xf32>
      %19 = tpu.iota {dimensions = array<i32: 1>} : vector<16x128xi32>
      %c32_i32 = arith.constant 32 : i32
      %20 = vector.broadcast %c32_i32 : i32 to vector<16x128xi32>
      %21 = arith.cmpi slt, %19, %20 : vector<16x128xi32>
      %cst_16 = arith.constant 0.000000e+00 : f32
      %22 = vector.broadcast %cst_16 : f32 to vector<16x128xf32>
      %23 = arith.select %21, %18, %22 : vector<16x128xi1>, vector<16x128xf32>
      %cst_17 = arith.constant dense<0.000000e+00> : vector<16xf32>
      %24 = vector.multi_reduction <add>, %23, %cst_17 [1] : vector<16x128xf32> to vector<16xf32>
      %25 = vector.shape_cast %24 : vector<16xf32> to vector<16x1xf32>
      %26 = arith.mulf %23, %23 : vector<16x128xf32>
      %cst_18 = arith.constant dense<0.000000e+00> : vector<16xf32>
      %27 = vector.multi_reduction <add>, %26, %cst_18 [1] : vector<16x128xf32> to vector<16xf32>
      %28 = vector.shape_cast %27 : vector<16xf32> to vector<16x1xf32>
      %cst_19 = arith.constant 3.125000e-02 : f32
      %29 = vector.broadcast %cst_19 : f32 to vector<16x1xf32>
      %30 = arith.mulf %25, %29 : vector<16x1xf32>
      %cst_20 = arith.constant 3.125000e-02 : f32
      %31 = vector.broadcast %cst_20 : f32 to vector<16x1xf32>
      %32 = arith.mulf %28, %31 : vector<16x1xf32>
      %33 = arith.mulf %30, %30 : vector<16x1xf32>
      %34 = arith.subf %32, %33 : vector<16x1xf32>
      %35 = vector.broadcast %30 : vector<16x1xf32> to vector<16x128xf32>
      %36 = arith.subf %18, %35 : vector<16x128xf32>
      %cst_21 = arith.constant 9.99999974E-6 : f32
      %37 = vector.broadcast %cst_21 : f32 to vector<16x1xf32>
      %38 = arith.addf %34, %37 : vector<16x1xf32>
      %39 = math.rsqrt %38 : vector<16x1xf32>
      %40 = vector.broadcast %39 : vector<16x1xf32> to vector<16x128xf32>
      %41 = arith.mulf %36, %40 : vector<16x128xf32>
      %c0_22 = arith.constant 0 : index
      %c0_23 = arith.constant 0 : index
      %42 = vector.load %arg6[%c0_22, %c0_23] : memref<1x128xf32, #tpu.memory_space<vmem>>, vector<1x128xf32>
      %43 = vector.broadcast %42 : vector<1x128xf32> to vector<16x128xf32>
      %44 = arith.mulf %41, %43 : vector<16x128xf32>
      %c0_24 = arith.constant 0 : index
      %c0_25 = arith.constant 0 : index
      %45 = vector.load %arg7[%c0_24, %c0_25] : memref<1x128xf32, #tpu.memory_space<vmem>>, vector<1x128xf32>
      %46 = vector.broadcast %45 : vector<1x128xf32> to vector<16x128xf32>
      %47 = arith.addf %44, %46 : vector<16x128xf32>
      %48 = arith.truncf %47 : vector<16x128xf32> to vector<16x128xbf16>
      %c0_26 = arith.constant 0 : index
      %c0_27 = arith.constant 0 : index
      %49 = vector.load %arg8[%c0_26, %c0_27] : memref<16x128xbf16, #tpu.memory_space<vmem>>, vector<16x128xbf16>
      tpu.vector_store %arg8[%c0_26, %c0_27], %48 {strides = array<i32>} : memref<16x128xbf16, #tpu.memory_space<vmem>>, vector<16x128xbf16>,
    } else {
    }
    return
  }
  func.func @transform_0(%arg0: i32, %arg1: i32) -> (i32, i32) {
    %c0_i32 = arith.constant 0 : i32
    return %arg0, %arg1 : i32, i32
  }
  func.func @transform_1(%arg0: i32, %arg1: i32) -> (i32, i32) {
    %c0_i32 = arith.constant 0 : i32
    %c0_i32_0 = arith.constant 0 : i32
    return %arg1, %c0_i32 : i32, i32
  }
  func.func @transform_2(%arg0: i32, %arg1: i32) -> (i32, i32) {
    %c0_i32 = arith.constant 0 : i32
    %c0_i32_0 = arith.constant 0 : i32
    %c0_i32_1 = arith.constant 0 : i32
    return %c0_i32, %c0_i32_0 : i32, i32
  }
  func.func @transform_3(%arg0: i32, %arg1: i32) -> (i32, i32) {
    %c0_i32 = arith.constant 0 : i32
    %c0_i32_0 = arith.constant 0 : i32
    return %arg0, %c0_i32 : i32, i32
  }
  func.func @transform_4(%arg0: i32, %arg1: i32) -> (i32, i32) {
    %c0_i32 = arith.constant 0 : i32
    %c0_i32_0 = arith.constant 0 : i32
    %c0_i32_1 = arith.constant 0 : i32
    return %c0_i32, %c0_i32_0 : i32, i32
  }
  func.func @transform_5(%arg0: i32, %arg1: i32) -> (i32, i32) {
    %c0_i32 = arith.constant 0 : i32
    %c0_i32_0 = arith.constant 0 : i32
    %c0_i32_1 = arith.constant 0 : i32
    return %c0_i32, %c0_i32_0 : i32, i32
  }
  func.func @transform_6(%arg0: i32, %arg1: i32) -> (i32, i32) {
    %c0_i32 = arith.constant 0 : i32
    %c0_i32_0 = arith.constant 0 : i32
    return %arg0, %c0_i32 : i32, i32
  }
}

module attributes {stable_mosaic.version = 11 : i64} {
  func.func @_flash_attn_kernel(%arg0: i32, %arg1: i32, %arg2: i32, %arg3: i32, %arg4: memref<1x8x128xbf16, #tpu.memory_space<vmem>>, %arg5: memref<1x8x128xbf16, #tpu.memory_space<vmem>>, %arg6: memref<1x8x128xbf16, #tpu.memory_space<vmem>>, %arg7: memref<1x8x128xbf16, #tpu.memory_space<vmem>>, %arg8: memref<8x1xf32, #tpu.memory_space<vmem>>, %arg9: memref<8x1xf32, #tpu.memory_space<vmem>>, %arg10: memref<8x128xf32, #tpu.memory_space<vmem>>) attributes {dimension_semantics = [#tpu.dimension_semantics<parallel>, #tpu.dimension_semantics<parallel>, #tpu.dimension_semantics<parallel>, #tpu.dimension_semantics<arbitrary>], iteration_bounds = array<i64: 2, 4, 1, 1>, scalar_prefetch = 0 : i64, scratch_operands = 3 : i64, tpu.core_type = #tpu.core_type<tc>, window_params = [{transform_indices = @transform_0, window_bounds = array<i64: 1, 8, 128>}, {transform_indices = @transform_1, window_bounds = array<i64: 1, 8, 128>}, {transform_indices = @transform_2, window_bounds = array<i64: 1, 8, 128>}, {transform_indices = @transform_3, window_bounds = array<i64: 1, 8, 128>}]} {
    %c0_i32 = arith.constant 0 : i32
    %0 = arith.cmpi eq, %arg3, %c0_i32 : i32
    %1 = arith.extui %0 : i1 to i32
    %c0_i32_0 = arith.constant 0 : i32
    %2 = arith.cmpi ne, %1, %c0_i32_0 : i32
    scf.if %2 {
      %cst = arith.constant 0xFF800000 : f32
      %12 = vector.broadcast %cst : f32 to vector<8x1xf32>
      %c0 = arith.constant 0 : index
      %c0_5 = arith.constant 0 : index
      %13 = vector.load %arg8[%c0, %c0_5] : memref<8x1xf32, #tpu.memory_space<vmem>>, vector<8x1xf32>
      tpu.vector_store %arg8[%c0, %c0_5], %12 {strides = array<i32>} : memref<8x1xf32, #tpu.memory_space<vmem>>, vector<8x1xf32>,
      %cst_6 = arith.constant 0.000000e+00 : f32
      %14 = vector.broadcast %cst_6 : f32 to vector<8x1xf32>
      %c0_7 = arith.constant 0 : index
      %c0_8 = arith.constant 0 : index
      %15 = vector.load %arg9[%c0_7, %c0_8] : memref<8x1xf32, #tpu.memory_space<vmem>>, vector<8x1xf32>
      tpu.vector_store %arg9[%c0_7, %c0_8], %14 {strides = array<i32>} : memref<8x1xf32, #tpu.memory_space<vmem>>, vector<8x1xf32>,
      %cst_9 = arith.constant 0.000000e+00 : f32
      %16 = vector.broadcast %cst_9 : f32 to vector<8x128xf32>
      %c0_10 = arith.constant 0 : index
      %c0_11 = arith.constant 0 : index
      %17 = vector.load %arg10[%c0_10, %c0_11] : memref<8x128xf32, #tpu.memory_space<vmem>>, vector<8x128xf32>
      tpu.vector_store %arg10[%c0_10, %c0_11], %16 {strides = array<i32>} : memref<8x128xf32, #tpu.memory_space<vmem>>, vector<8x128xf32>,
    } else {
    }
    %c8_i32 = arith.constant 8 : i32
    %3 = arith.muli %arg3, %c8_i32 : i32
    %c8_i32_1 = arith.constant 8 : i32
    %4 = arith.muli %arg2, %c8_i32_1 : i32
    %c7_i32 = arith.constant 7 : i32
    %5 = arith.addi %4, %c7_i32 : i32
    %6 = arith.cmpi sle, %3, %5 : i32
    %7 = arith.extui %6 : i1 to i32
    %c0_i32_2 = arith.constant 0 : i32
    %8 = arith.cmpi ne, %7, %c0_i32_2 : i32
    scf.if %8 {
      %c0 = arith.constant 0 : index
      %c0_5 = arith.constant 0 : index
      %c0_6 = arith.constant 0 : index
      %12 = vector.load %arg4[%c0, %c0_5, %c0_6] : memref<1x8x128xbf16, #tpu.memory_space<vmem>>, vector<1x8x128xbf16>
      %13 = vector.shape_cast %12 : vector<1x8x128xbf16> to vector<8x128xbf16>
      %c0_7 = arith.constant 0 : index
      %c0_8 = arith.constant 0 : index
      %c0_9 = arith.constant 0 : index
      %14 = vector.load %arg5[%c0_7, %c0_8, %c0_9] : memref<1x8x128xbf16, #tpu.memory_space<vmem>>, vector<1x8x128xbf16>
      %15 = vector.shape_cast %14 : vector<1x8x128xbf16> to vector<8x128xbf16>
      %cst = arith.constant dense<0.000000e+00> : vector<8x8xf32>
      %16 = tpu.matmul %13, %15, %cst {dimension_numbers = #tpu.dot_dimension_numbers<[1], [1], [0], [0], [0, 0, 1, 0], [], []>} : vector<8x128xbf16>, vector<8x128xbf16>, vector<8x8xf32> -> vector<8x8xf32>
      %c8_i32_10 = arith.constant 8 : i32
      %17 = arith.muli %arg2, %c8_i32_10 : i32
      %18 = tpu.iota {dimensions = array<i32: 0>} : vector<8x8xi32>
      %19 = vector.broadcast %17 : i32 to vector<8x8xi32>
      %20 = arith.addi %19, %18 : vector<8x8xi32>
      %c8_i32_11 = arith.constant 8 : i32
      %21 = arith.muli %arg3, %c8_i32_11 : i32
      %22 = tpu.iota {dimensions = array<i32: 1>} : vector<8x8xi32>
      %23 = vector.broadcast %21 : i32 to vector<8x8xi32>
      %24 = arith.addi %23, %22 : vector<8x8xi32>
      %25 = arith.cmpi sgt, %24, %20 : vector<8x8xi32>
      %cst_12 = arith.constant -1.000000e+09 : f32
      %26 = vector.broadcast %cst_12 : f32 to vector<8x8xf32>
      %27 = arith.select %25, %26, %16 : vector<8x8xi1>, vector<8x8xf32>
      %c0_13 = arith.constant 0 : index
      %c0_14 = arith.constant 0 : index
      %28 = vector.load %arg8[%c0_13, %c0_14] : memref<8x1xf32, #tpu.memory_space<vmem>>, vector<8x1xf32>
      %cst_15 = arith.constant dense<0xFF800000> : vector<8xf32>
      %29 = vector.multi_reduction <maximumf>, %27, %cst_15 [1] : vector<8x8xf32> to vector<8xf32>
      %30 = vector.shape_cast %29 : vector<8xf32> to vector<8x1xf32>
      %31 = arith.maximumf %28, %30 : vector<8x1xf32>
      %32 = arith.subf %28, %31 : vector<8x1xf32>
      %33 = math.exp %32 : vector<8x1xf32>
      %34 = vector.broadcast %31 : vector<8x1xf32> to vector<8x8xf32>
      %35 = arith.subf %27, %34 : vector<8x8xf32>
      %36 = math.exp %35 : vector<8x8xf32>
      %c0_16 = arith.constant 0 : index
      %c0_17 = arith.constant 0 : index
      %37 = vector.load %arg9[%c0_16, %c0_17] : memref<8x1xf32, #tpu.memory_space<vmem>>, vector<8x1xf32>
      %38 = arith.mulf %33, %37 : vector<8x1xf32>
      %cst_18 = arith.constant dense<0.000000e+00> : vector<8xf32>
      %39 = vector.multi_reduction <add>, %36, %cst_18 [1] : vector<8x8xf32> to vector<8xf32>
      %40 = vector.shape_cast %39 : vector<8xf32> to vector<8x1xf32>
      %41 = arith.addf %38, %40 : vector<8x1xf32>
      %c0_19 = arith.constant 0 : index
      %c0_20 = arith.constant 0 : index
      %42 = vector.load %arg9[%c0_19, %c0_20] : memref<8x1xf32, #tpu.memory_space<vmem>>, vector<8x1xf32>
      tpu.vector_store %arg9[%c0_19, %c0_20], %41 {strides = array<i32>} : memref<8x1xf32, #tpu.memory_space<vmem>>, vector<8x1xf32>,
      %c0_21 = arith.constant 0 : index
      %c0_22 = arith.constant 0 : index
      %43 = vector.load %arg10[%c0_21, %c0_22] : memref<8x128xf32, #tpu.memory_space<vmem>>, vector<8x128xf32>
      %44 = vector.broadcast %33 : vector<8x1xf32> to vector<8x128xf32>
      %45 = arith.mulf %44, %43 : vector<8x128xf32>
      %46 = arith.truncf %36 : vector<8x8xf32> to vector<8x8xbf16>
      %c0_23 = arith.constant 0 : index
      %c0_24 = arith.constant 0 : index
      %c0_25 = arith.constant 0 : index
      %47 = vector.load %arg6[%c0_23, %c0_24, %c0_25] : memref<1x8x128xbf16, #tpu.memory_space<vmem>>, vector<1x8x128xbf16>
      %48 = vector.shape_cast %47 : vector<1x8x128xbf16> to vector<8x128xbf16>
      %cst_26 = arith.constant dense<0.000000e+00> : vector<8x128xf32>
      %49 = tpu.matmul %46, %48, %cst_26 {dimension_numbers = #tpu.dot_dimension_numbers<[1], [0], [0], [1], [0, 0, 1, 1], [], []>} : vector<8x8xbf16>, vector<8x128xbf16>, vector<8x128xf32> -> vector<8x128xf32>
      %50 = arith.addf %45, %49 : vector<8x128xf32>
      %c0_27 = arith.constant 0 : index
      %c0_28 = arith.constant 0 : index
      %51 = vector.load %arg10[%c0_27, %c0_28] : memref<8x128xf32, #tpu.memory_space<vmem>>, vector<8x128xf32>
      tpu.vector_store %arg10[%c0_27, %c0_28], %50 {strides = array<i32>} : memref<8x128xf32, #tpu.memory_space<vmem>>, vector<8x128xf32>,
      %c0_29 = arith.constant 0 : index
      %c0_30 = arith.constant 0 : index
      %52 = vector.load %arg8[%c0_29, %c0_30] : memref<8x1xf32, #tpu.memory_space<vmem>>, vector<8x1xf32>
      tpu.vector_store %arg8[%c0_29, %c0_30], %31 {strides = array<i32>} : memref<8x1xf32, #tpu.memory_space<vmem>>, vector<8x1xf32>,
    } else {
    }
    %c0_i32_3 = arith.constant 0 : i32
    %9 = arith.cmpi eq, %arg3, %c0_i32_3 : i32
    %10 = arith.extui %9 : i1 to i32
    %c0_i32_4 = arith.constant 0 : i32
    %11 = arith.cmpi ne, %10, %c0_i32_4 : i32
    scf.if %11 {
      %c0 = arith.constant 0 : index
      %c0_5 = arith.constant 0 : index
      %12 = vector.load %arg9[%c0, %c0_5] : memref<8x1xf32, #tpu.memory_space<vmem>>, vector<8x1xf32>
      %13 = tpu.reciprocal %12 {approx = true} : vector<8x1xf32> -> vector<8x1xf32>
      %c0_6 = arith.constant 0 : index
      %c0_7 = arith.constant 0 : index
      %14 = vector.load %arg10[%c0_6, %c0_7] : memref<8x128xf32, #tpu.memory_space<vmem>>, vector<8x128xf32>
      %15 = vector.broadcast %13 : vector<8x1xf32> to vector<8x128xf32>
      %16 = arith.mulf %14, %15 : vector<8x128xf32>
      %17 = arith.truncf %16 : vector<8x128xf32> to vector<8x128xbf16>
      %c0_8 = arith.constant 0 : index
      %c0_9 = arith.constant 0 : index
      %c0_10 = arith.constant 0 : index
      %18 = vector.load %arg7[%c0_8, %c0_9, %c0_10] : memref<1x8x128xbf16, #tpu.memory_space<vmem>>, vector<1x8x128xbf16>
      %19 = vector.shape_cast %18 : vector<1x8x128xbf16> to vector<8x128xbf16>
      %20 = vector.shape_cast %17 : vector<8x128xbf16> to vector<1x8x128xbf16>
      tpu.vector_store %arg7[%c0_8, %c0_9, %c0_10], %20 {strides = array<i32>} : memref<1x8x128xbf16, #tpu.memory_space<vmem>>, vector<1x8x128xbf16>,
    } else {
    }
    return
  }
  func.func @transform_0(%arg0: i32, %arg1: i32, %arg2: i32, %arg3: i32) -> (i32, i32, i32) {
    %c0_i32 = arith.constant 0 : i32
    %0 = arith.addi %c0_i32, %arg1 : i32
    %c0_i32_0 = arith.constant 0 : i32
    return %arg0, %arg2, %0 : i32, i32, i32
  }
  func.func @transform_1(%arg0: i32, %arg1: i32, %arg2: i32, %arg3: i32) -> (i32, i32, i32) {
    %c4_i32 = arith.constant 4 : i32
    %0 = arith.addi %c4_i32, %arg1 : i32
    %c0_i32 = arith.constant 0 : i32
    return %arg0, %arg3, %0 : i32, i32, i32
  }
  func.func @transform_2(%arg0: i32, %arg1: i32, %arg2: i32, %arg3: i32) -> (i32, i32, i32) {
    %c8_i32 = arith.constant 8 : i32
    %0 = arith.addi %c8_i32, %arg1 : i32
    %c0_i32 = arith.constant 0 : i32
    return %arg0, %arg3, %0 : i32, i32, i32
  }
  func.func @transform_3(%arg0: i32, %arg1: i32, %arg2: i32, %arg3: i32) -> (i32, i32, i32) {
    %c0_i32 = arith.constant 0 : i32
    return %arg0, %arg2, %arg1 : i32, i32, i32
  }
}

module attributes {stable_mosaic.version = 11 : i64} {
  func.func @_matmul_kernel(%arg0: i32, %arg1: i32, %arg2: i32, %arg3: memref<16x128xbf16, #tpu.memory_space<vmem>>, %arg4: memref<128x768xbf16, #tpu.memory_space<vmem>>, %arg5: memref<1x768xf32, #tpu.memory_space<vmem>>, %arg6: memref<16x768xbf16, #tpu.memory_space<vmem>>, %arg7: memref<16x768xf32, #tpu.memory_space<vmem>>) attributes {dimension_semantics = [#tpu.dimension_semantics<parallel>, #tpu.dimension_semantics<parallel>, #tpu.dimension_semantics<arbitrary>], iteration_bounds = array<i64: 1, 2, 1>, scalar_prefetch = 0 : i64, scratch_operands = 1 : i64, tpu.core_type = #tpu.core_type<tc>, window_params = [{transform_indices = @transform_0, window_bounds = array<i64: 16, 128>}, {transform_indices = @transform_1, window_bounds = array<i64: 128, 768>}, {transform_indices = @transform_2, window_bounds = array<i64: 1, 768>}, {transform_indices = @transform_3, window_bounds = array<i64: 16, 768>}]} {
    %c0_i32 = arith.constant 0 : i32
    %0 = arith.cmpi eq, %arg2, %c0_i32 : i32
    %1 = arith.extui %0 : i1 to i32
    %c0_i32_0 = arith.constant 0 : i32
    %2 = arith.cmpi ne, %1, %c0_i32_0 : i32
    scf.if %2 {
      %cst_10 = arith.constant 0.000000e+00 : f32
      %12 = vector.broadcast %cst_10 : f32 to vector<16x768xf32>
      %c0_11 = arith.constant 0 : index
      %c0_12 = arith.constant 0 : index
      %13 = vector.load %arg7[%c0_11, %c0_12] : memref<16x768xf32, #tpu.memory_space<vmem>>, vector<16x768xf32>
      tpu.vector_store %arg7[%c0_11, %c0_12], %12 {strides = array<i32>} : memref<16x768xf32, #tpu.memory_space<vmem>>, vector<16x768xf32>,
    } else {
    }
    %c0 = arith.constant 0 : index
    %c0_1 = arith.constant 0 : index
    %3 = vector.load %arg7[%c0, %c0_1] : memref<16x768xf32, #tpu.memory_space<vmem>>, vector<16x768xf32>
    %c0_2 = arith.constant 0 : index
    %c0_3 = arith.constant 0 : index
    %4 = vector.load %arg3[%c0_2, %c0_3] : memref<16x128xbf16, #tpu.memory_space<vmem>>, vector<16x128xbf16>
    %c0_4 = arith.constant 0 : index
    %c0_5 = arith.constant 0 : index
    %5 = vector.load %arg4[%c0_4, %c0_5] : memref<128x768xbf16, #tpu.memory_space<vmem>>, vector<128x768xbf16>
    %cst = arith.constant dense<0.000000e+00> : vector<16x768xf32>
    %6 = tpu.matmul %4, %5, %cst {dimension_numbers = #tpu.dot_dimension_numbers<[1], [0], [0], [1], [0, 0, 1, 1], [], []>} : vector<16x128xbf16>, vector<128x768xbf16>, vector<16x768xf32> -> vector<16x768xf32>
    %7 = arith.addf %3, %6 : vector<16x768xf32>
    %c0_6 = arith.constant 0 : index
    %c0_7 = arith.constant 0 : index
    %8 = vector.load %arg7[%c0_6, %c0_7] : memref<16x768xf32, #tpu.memory_space<vmem>>, vector<16x768xf32>
    tpu.vector_store %arg7[%c0_6, %c0_7], %7 {strides = array<i32>} : memref<16x768xf32, #tpu.memory_space<vmem>>, vector<16x768xf32>,
    %c0_i32_8 = arith.constant 0 : i32
    %9 = arith.cmpi eq, %arg2, %c0_i32_8 : i32
    %10 = arith.extui %9 : i1 to i32
    %c0_i32_9 = arith.constant 0 : i32
    %11 = arith.cmpi ne, %10, %c0_i32_9 : i32
    scf.if %11 {
      %c0_10 = arith.constant 0 : index
      %c0_11 = arith.constant 0 : index
      %12 = vector.load %arg7[%c0_10, %c0_11] : memref<16x768xf32, #tpu.memory_space<vmem>>, vector<16x768xf32>
      %c0_12 = arith.constant 0 : index
      %c0_13 = arith.constant 0 : index
      %13 = vector.load %arg5[%c0_12, %c0_13] : memref<1x768xf32, #tpu.memory_space<vmem>>, vector<1x768xf32>
      %14 = vector.broadcast %13 : vector<1x768xf32> to vector<16x768xf32>
      %15 = arith.addf %12, %14 : vector<16x768xf32>
      %16 = arith.truncf %15 : vector<16x768xf32> to vector<16x768xbf16>
      %c0_14 = arith.constant 0 : index
      %c0_15 = arith.constant 0 : index
      %17 = vector.load %arg6[%c0_14, %c0_15] : memref<16x768xbf16, #tpu.memory_space<vmem>>, vector<16x768xbf16>
      tpu.vector_store %arg6[%c0_14, %c0_15], %16 {strides = array<i32>} : memref<16x768xbf16, #tpu.memory_space<vmem>>, vector<16x768xbf16>,
    } else {
    }
    return
  }
  func.func @transform_0(%arg0: i32, %arg1: i32, %arg2: i32) -> (i32, i32) {
    %c0_i32 = arith.constant 0 : i32
    return %arg0, %arg2 : i32, i32
  }
  func.func @transform_1(%arg0: i32, %arg1: i32, %arg2: i32) -> (i32, i32) {
    %c0_i32 = arith.constant 0 : i32
    return %arg2, %arg1 : i32, i32
  }
  func.func @transform_2(%arg0: i32, %arg1: i32, %arg2: i32) -> (i32, i32) {
    %c0_i32 = arith.constant 0 : i32
    %c0_i32_0 = arith.constant 0 : i32
    return %c0_i32, %arg1 : i32, i32
  }
  func.func @transform_3(%arg0: i32, %arg1: i32, %arg2: i32) -> (i32, i32) {
    %c0_i32 = arith.constant 0 : i32
    return %arg0, %arg1 : i32, i32
  }
}

module attributes {stable_mosaic.version = 11 : i64} {
  func.func @_flash_attn_kernel(%arg0: i32, %arg1: i32, %arg2: i32, %arg3: i32, %arg4: memref<1x8x128xbf16, #tpu.memory_space<vmem>>, %arg5: memref<1x8x128xbf16, #tpu.memory_space<vmem>>, %arg6: memref<1x8x128xbf16, #tpu.memory_space<vmem>>, %arg7: memref<1x8x128xbf16, #tpu.memory_space<vmem>>, %arg8: memref<8x1xf32, #tpu.memory_space<vmem>>, %arg9: memref<8x1xf32, #tpu.memory_space<vmem>>, %arg10: memref<8x128xf32, #tpu.memory_space<vmem>>) attributes {dimension_semantics = [#tpu.dimension_semantics<parallel>, #tpu.dimension_semantics<parallel>, #tpu.dimension_semantics<parallel>, #tpu.dimension_semantics<arbitrary>], iteration_bounds = array<i64: 2, 4, 1, 1>, scalar_prefetch = 0 : i64, scratch_operands = 3 : i64, tpu.core_type = #tpu.core_type<tc>, window_params = [{transform_indices = @transform_0, window_bounds = array<i64: 1, 8, 128>}, {transform_indices = @transform_1, window_bounds = array<i64: 1, 8, 128>}, {transform_indices = @transform_2, window_bounds = array<i64: 1, 8, 128>}, {transform_indices = @transform_3, window_bounds = array<i64: 1, 8, 128>}]} {
    %c0_i32 = arith.constant 0 : i32
    %0 = arith.cmpi eq, %arg3, %c0_i32 : i32
    %1 = arith.extui %0 : i1 to i32
    %c0_i32_0 = arith.constant 0 : i32
    %2 = arith.cmpi ne, %1, %c0_i32_0 : i32
    scf.if %2 {
      %cst_26 = arith.constant 0xFF800000 : f32
      %36 = vector.broadcast %cst_26 : f32 to vector<8x1xf32>
      %c0_27 = arith.constant 0 : index
      %c0_28 = arith.constant 0 : index
      %37 = vector.load %arg8[%c0_27, %c0_28] : memref<8x1xf32, #tpu.memory_space<vmem>>, vector<8x1xf32>
      tpu.vector_store %arg8[%c0_27, %c0_28], %36 {strides = array<i32>} : memref<8x1xf32, #tpu.memory_space<vmem>>, vector<8x1xf32>,
      %cst_29 = arith.constant 0.000000e+00 : f32
      %38 = vector.broadcast %cst_29 : f32 to vector<8x1xf32>
      %c0_30 = arith.constant 0 : index
      %c0_31 = arith.constant 0 : index
      %39 = vector.load %arg9[%c0_30, %c0_31] : memref<8x1xf32, #tpu.memory_space<vmem>>, vector<8x1xf32>
      tpu.vector_store %arg9[%c0_30, %c0_31], %38 {strides = array<i32>} : memref<8x1xf32, #tpu.memory_space<vmem>>, vector<8x1xf32>,
      %cst_32 = arith.constant 0.000000e+00 : f32
      %40 = vector.broadcast %cst_32 : f32 to vector<8x128xf32>
      %c0_33 = arith.constant 0 : index
      %c0_34 = arith.constant 0 : index
      %41 = vector.load %arg10[%c0_33, %c0_34] : memref<8x128xf32, #tpu.memory_space<vmem>>, vector<8x128xf32>
      tpu.vector_store %arg10[%c0_33, %c0_34], %40 {strides = array<i32>} : memref<8x128xf32, #tpu.memory_space<vmem>>, vector<8x128xf32>,
    } else {
    }
    %c0 = arith.constant 0 : index
    %c0_1 = arith.constant 0 : index
    %c0_2 = arith.constant 0 : index
    %3 = vector.load %arg4[%c0, %c0_1, %c0_2] : memref<1x8x128xbf16, #tpu.memory_space<vmem>>, vector<1x8x128xbf16>
    %4 = vector.shape_cast %3 : vector<1x8x128xbf16> to vector<8x128xbf16>
    %c0_3 = arith.constant 0 : index
    %c0_4 = arith.constant 0 : index
    %c0_5 = arith.constant 0 : index
    %5 = vector.load %arg5[%c0_3, %c0_4, %c0_5] : memref<1x8x128xbf16, #tpu.memory_space<vmem>>, vector<1x8x128xbf16>
    %6 = vector.shape_cast %5 : vector<1x8x128xbf16> to vector<8x128xbf16>
    %cst = arith.constant dense<0.000000e+00> : vector<8x8xf32>
    %7 = tpu.matmul %4, %6, %cst {dimension_numbers = #tpu.dot_dimension_numbers<[1], [1], [0], [0], [0, 0, 1, 0], [], []>} : vector<8x128xbf16>, vector<8x128xbf16>, vector<8x8xf32> -> vector<8x8xf32>
    %c0_6 = arith.constant 0 : index
    %c0_7 = arith.constant 0 : index
    %8 = vector.load %arg8[%c0_6, %c0_7] : memref<8x1xf32, #tpu.memory_space<vmem>>, vector<8x1xf32>
    %cst_8 = arith.constant dense<0xFF800000> : vector<8xf32>
    %9 = vector.multi_reduction <maximumf>, %7, %cst_8 [1] : vector<8x8xf32> to vector<8xf32>
    %10 = vector.shape_cast %9 : vector<8xf32> to vector<8x1xf32>
    %11 = arith.maximumf %8, %10 : vector<8x1xf32>
    %12 = arith.subf %8, %11 : vector<8x1xf32>
    %13 = math.exp %12 : vector<8x1xf32>
    %14 = vector.broadcast %11 : vector<8x1xf32> to vector<8x8xf32>
    %15 = arith.subf %7, %14 : vector<8x8xf32>
    %16 = math.exp %15 : vector<8x8xf32>
    %c0_9 = arith.constant 0 : index
    %c0_10 = arith.constant 0 : index
    %17 = vector.load %arg9[%c0_9, %c0_10] : memref<8x1xf32, #tpu.memory_space<vmem>>, vector<8x1xf32>
    %18 = arith.mulf %13, %17 : vector<8x1xf32>
    %cst_11 = arith.constant dense<0.000000e+00> : vector<8xf32>
    %19 = vector.multi_reduction <add>, %16, %cst_11 [1] : vector<8x8xf32> to vector<8xf32>
    %20 = vector.shape_cast %19 : vector<8xf32> to vector<8x1xf32>
    %21 = arith.addf %18, %20 : vector<8x1xf32>
    %c0_12 = arith.constant 0 : index
    %c0_13 = arith.constant 0 : index
    %22 = vector.load %arg9[%c0_12, %c0_13] : memref<8x1xf32, #tpu.memory_space<vmem>>, vector<8x1xf32>
    tpu.vector_store %arg9[%c0_12, %c0_13], %21 {strides = array<i32>} : memref<8x1xf32, #tpu.memory_space<vmem>>, vector<8x1xf32>,
    %c0_14 = arith.constant 0 : index
    %c0_15 = arith.constant 0 : index
    %23 = vector.load %arg10[%c0_14, %c0_15] : memref<8x128xf32, #tpu.memory_space<vmem>>, vector<8x128xf32>
    %24 = vector.broadcast %13 : vector<8x1xf32> to vector<8x128xf32>
    %25 = arith.mulf %24, %23 : vector<8x128xf32>
    %26 = arith.truncf %16 : vector<8x8xf32> to vector<8x8xbf16>
    %c0_16 = arith.constant 0 : index
    %c0_17 = arith.constant 0 : index
    %c0_18 = arith.constant 0 : index
    %27 = vector.load %arg6[%c0_16, %c0_17, %c0_18] : memref<1x8x128xbf16, #tpu.memory_space<vmem>>, vector<1x8x128xbf16>
    %28 = vector.shape_cast %27 : vector<1x8x128xbf16> to vector<8x128xbf16>
    %cst_19 = arith.constant dense<0.000000e+00> : vector<8x128xf32>
    %29 = tpu.matmul %26, %28, %cst_19 {dimension_numbers = #tpu.dot_dimension_numbers<[1], [0], [0], [1], [0, 0, 1, 1], [], []>} : vector<8x8xbf16>, vector<8x128xbf16>, vector<8x128xf32> -> vector<8x128xf32>
    %30 = arith.addf %25, %29 : vector<8x128xf32>
    %c0_20 = arith.constant 0 : index
    %c0_21 = arith.constant 0 : index
    %31 = vector.load %arg10[%c0_20, %c0_21] : memref<8x128xf32, #tpu.memory_space<vmem>>, vector<8x128xf32>
    tpu.vector_store %arg10[%c0_20, %c0_21], %30 {strides = array<i32>} : memref<8x128xf32, #tpu.memory_space<vmem>>, vector<8x128xf32>,
    %c0_22 = arith.constant 0 : index
    %c0_23 = arith.constant 0 : index
    %32 = vector.load %arg8[%c0_22, %c0_23] : memref<8x1xf32, #tpu.memory_space<vmem>>, vector<8x1xf32>
    tpu.vector_store %arg8[%c0_22, %c0_23], %11 {strides = array<i32>} : memref<8x1xf32, #tpu.memory_space<vmem>>, vector<8x1xf32>,
    %c0_i32_24 = arith.constant 0 : i32
    %33 = arith.cmpi eq, %arg3, %c0_i32_24 : i32
    %34 = arith.extui %33 : i1 to i32
    %c0_i32_25 = arith.constant 0 : i32
    %35 = arith.cmpi ne, %34, %c0_i32_25 : i32
    scf.if %35 {
      %c0_26 = arith.constant 0 : index
      %c0_27 = arith.constant 0 : index
      %36 = vector.load %arg9[%c0_26, %c0_27] : memref<8x1xf32, #tpu.memory_space<vmem>>, vector<8x1xf32>
      %37 = tpu.reciprocal %36 {approx = true} : vector<8x1xf32> -> vector<8x1xf32>
      %c0_28 = arith.constant 0 : index
      %c0_29 = arith.constant 0 : index
      %38 = vector.load %arg10[%c0_28, %c0_29] : memref<8x128xf32, #tpu.memory_space<vmem>>, vector<8x128xf32>
      %39 = vector.broadcast %37 : vector<8x1xf32> to vector<8x128xf32>
      %40 = arith.mulf %38, %39 : vector<8x128xf32>
      %41 = arith.truncf %40 : vector<8x128xf32> to vector<8x128xbf16>
      %c0_30 = arith.constant 0 : index
      %c0_31 = arith.constant 0 : index
      %c0_32 = arith.constant 0 : index
      %42 = vector.load %arg7[%c0_30, %c0_31, %c0_32] : memref<1x8x128xbf16, #tpu.memory_space<vmem>>, vector<1x8x128xbf16>
      %43 = vector.shape_cast %42 : vector<1x8x128xbf16> to vector<8x128xbf16>
      %44 = vector.shape_cast %41 : vector<8x128xbf16> to vector<1x8x128xbf16>
      tpu.vector_store %arg7[%c0_30, %c0_31, %c0_32], %44 {strides = array<i32>} : memref<1x8x128xbf16, #tpu.memory_space<vmem>>, vector<1x8x128xbf16>,
    } else {
    }
    return
  }
  func.func @transform_0(%arg0: i32, %arg1: i32, %arg2: i32, %arg3: i32) -> (i32, i32, i32) {
    %c0_i32 = arith.constant 0 : i32
    %0 = arith.addi %c0_i32, %arg1 : i32
    %c0_i32_0 = arith.constant 0 : i32
    return %arg0, %arg2, %0 : i32, i32, i32
  }
  func.func @transform_1(%arg0: i32, %arg1: i32, %arg2: i32, %arg3: i32) -> (i32, i32, i32) {
    %c4_i32 = arith.constant 4 : i32
    %0 = arith.addi %c4_i32, %arg1 : i32
    %c0_i32 = arith.constant 0 : i32
    return %arg0, %arg3, %0 : i32, i32, i32
  }
  func.func @transform_2(%arg0: i32, %arg1: i32, %arg2: i32, %arg3: i32) -> (i32, i32, i32) {
    %c8_i32 = arith.constant 8 : i32
    %0 = arith.addi %c8_i32, %arg1 : i32
    %c0_i32 = arith.constant 0 : i32
    return %arg0, %arg3, %0 : i32, i32, i32
  }
  func.func @transform_3(%arg0: i32, %arg1: i32, %arg2: i32, %arg3: i32) -> (i32, i32, i32) {
    %c0_i32 = arith.constant 0 : i32
    return %arg0, %arg2, %arg1 : i32, i32, i32
  }
}

module attributes {stable_mosaic.version = 11 : i64} {
  func.func @_matmul_kernel(%arg0: i32, %arg1: i32, %arg2: i32, %arg3: memref<16x128xbf16, #tpu.memory_space<vmem>>, %arg4: memref<128x128xbf16, #tpu.memory_space<vmem>>, %arg5: memref<1x128xf32, #tpu.memory_space<vmem>>, %arg6: memref<16x128xbf16, #tpu.memory_space<vmem>>, %arg7: memref<16x128xf32, #tpu.memory_space<vmem>>) attributes {dimension_semantics = [#tpu.dimension_semantics<parallel>, #tpu.dimension_semantics<parallel>, #tpu.dimension_semantics<arbitrary>], iteration_bounds = array<i64: 1, 1, 1>, scalar_prefetch = 0 : i64, scratch_operands = 1 : i64, tpu.core_type = #tpu.core_type<tc>, window_params = [{transform_indices = @transform_0, window_bounds = array<i64: 16, 128>}, {transform_indices = @transform_1, window_bounds = array<i64: 128, 128>}, {transform_indices = @transform_2, window_bounds = array<i64: 1, 128>}, {transform_indices = @transform_3, window_bounds = array<i64: 16, 128>}]} {
    %c0_i32 = arith.constant 0 : i32
    %0 = arith.cmpi eq, %arg2, %c0_i32 : i32
    %1 = arith.extui %0 : i1 to i32
    %c0_i32_0 = arith.constant 0 : i32
    %2 = arith.cmpi ne, %1, %c0_i32_0 : i32
    scf.if %2 {
      %cst_10 = arith.constant 0.000000e+00 : f32
      %12 = vector.broadcast %cst_10 : f32 to vector<16x128xf32>
      %c0_11 = arith.constant 0 : index
      %c0_12 = arith.constant 0 : index
      %13 = vector.load %arg7[%c0_11, %c0_12] : memref<16x128xf32, #tpu.memory_space<vmem>>, vector<16x128xf32>
      tpu.vector_store %arg7[%c0_11, %c0_12], %12 {strides = array<i32>} : memref<16x128xf32, #tpu.memory_space<vmem>>, vector<16x128xf32>,
    } else {
    }
    %c0 = arith.constant 0 : index
    %c0_1 = arith.constant 0 : index
    %3 = vector.load %arg7[%c0, %c0_1] : memref<16x128xf32, #tpu.memory_space<vmem>>, vector<16x128xf32>
    %c0_2 = arith.constant 0 : index
    %c0_3 = arith.constant 0 : index
    %4 = vector.load %arg3[%c0_2, %c0_3] : memref<16x128xbf16, #tpu.memory_space<vmem>>, vector<16x128xbf16>
    %c0_4 = arith.constant 0 : index
    %c0_5 = arith.constant 0 : index
    %5 = vector.load %arg4[%c0_4, %c0_5] : memref<128x128xbf16, #tpu.memory_space<vmem>>, vector<128x128xbf16>
    %cst = arith.constant dense<0.000000e+00> : vector<16x128xf32>
    %6 = tpu.matmul %4, %5, %cst {dimension_numbers = #tpu.dot_dimension_numbers<[1], [0], [0], [1], [0, 0, 1, 1], [], []>} : vector<16x128xbf16>, vector<128x128xbf16>, vector<16x128xf32> -> vector<16x128xf32>
    %7 = arith.addf %3, %6 : vector<16x128xf32>
    %c0_6 = arith.constant 0 : index
    %c0_7 = arith.constant 0 : index
    %8 = vector.load %arg7[%c0_6, %c0_7] : memref<16x128xf32, #tpu.memory_space<vmem>>, vector<16x128xf32>
    tpu.vector_store %arg7[%c0_6, %c0_7], %7 {strides = array<i32>} : memref<16x128xf32, #tpu.memory_space<vmem>>, vector<16x128xf32>,
    %c0_i32_8 = arith.constant 0 : i32
    %9 = arith.cmpi eq, %arg2, %c0_i32_8 : i32
    %10 = arith.extui %9 : i1 to i32
    %c0_i32_9 = arith.constant 0 : i32
    %11 = arith.cmpi ne, %10, %c0_i32_9 : i32
    scf.if %11 {
      %c0_10 = arith.constant 0 : index
      %c0_11 = arith.constant 0 : index
      %12 = vector.load %arg7[%c0_10, %c0_11] : memref<16x128xf32, #tpu.memory_space<vmem>>, vector<16x128xf32>
      %c0_12 = arith.constant 0 : index
      %c0_13 = arith.constant 0 : index
      %13 = vector.load %arg5[%c0_12, %c0_13] : memref<1x128xf32, #tpu.memory_space<vmem>>, vector<1x128xf32>
      %14 = vector.broadcast %13 : vector<1x128xf32> to vector<16x128xf32>
      %15 = arith.addf %12, %14 : vector<16x128xf32>
      %cst_14 = arith.constant 0.000000e+00 : f32
      %16 = vector.broadcast %cst_14 : f32 to vector<16x128xf32>
      %17 = arith.maximumf %15, %16 : vector<16x128xf32>
      %18 = arith.truncf %17 : vector<16x128xf32> to vector<16x128xbf16>
      %c0_15 = arith.constant 0 : index
      %c0_16 = arith.constant 0 : index
      %19 = vector.load %arg6[%c0_15, %c0_16] : memref<16x128xbf16, #tpu.memory_space<vmem>>, vector<16x128xbf16>
      tpu.vector_store %arg6[%c0_15, %c0_16], %18 {strides = array<i32>} : memref<16x128xbf16, #tpu.memory_space<vmem>>, vector<16x128xbf16>,
    } else {
    }
    return
  }
  func.func @transform_0(%arg0: i32, %arg1: i32, %arg2: i32) -> (i32, i32) {
    %c0_i32 = arith.constant 0 : i32
    return %arg0, %arg2 : i32, i32
  }
  func.func @transform_1(%arg0: i32, %arg1: i32, %arg2: i32) -> (i32, i32) {
    %c0_i32 = arith.constant 0 : i32
    return %arg2, %arg1 : i32, i32
  }
  func.func @transform_2(%arg0: i32, %arg1: i32, %arg2: i32) -> (i32, i32) {
    %c0_i32 = arith.constant 0 : i32
    %c0_i32_0 = arith.constant 0 : i32
    return %c0_i32, %arg1 : i32, i32
  }
  func.func @transform_3(%arg0: i32, %arg1: i32, %arg2: i32) -> (i32, i32) {
    %c0_i32 = arith.constant 0 : i32
    return %arg0, %arg1 : i32, i32
  }
}

module attributes {stable_mosaic.version = 11 : i64} {
  func.func @_matmul_add_ln_kernel(%arg0: i32, %arg1: i32, %arg2: memref<16x128xbf16, #tpu.memory_space<vmem>>, %arg3: memref<128x128xbf16, #tpu.memory_space<vmem>>, %arg4: memref<1x128xf32, #tpu.memory_space<vmem>>, %arg5: memref<16x128xbf16, #tpu.memory_space<vmem>>, %arg6: memref<1x128xf32, #tpu.memory_space<vmem>>, %arg7: memref<1x128xf32, #tpu.memory_space<vmem>>, %arg8: memref<16x128xbf16, #tpu.memory_space<vmem>>, %arg9: memref<16x128xf32, #tpu.memory_space<vmem>>) attributes {dimension_semantics = [#tpu.dimension_semantics<parallel>, #tpu.dimension_semantics<arbitrary>], iteration_bounds = array<i64: 1, 1>, scalar_prefetch = 0 : i64, scratch_operands = 1 : i64, tpu.core_type = #tpu.core_type<tc>, window_params = [{transform_indices = @transform_0, window_bounds = array<i64: 16, 128>}, {transform_indices = @transform_1, window_bounds = array<i64: 128, 128>}, {pipeline_mode = #tpu.pipeline_mode<synchronous>, transform_indices = @transform_2, window_bounds = array<i64: 1, 128>}, {transform_indices = @transform_3, window_bounds = array<i64: 16, 128>}, {pipeline_mode = #tpu.pipeline_mode<synchronous>, transform_indices = @transform_4, window_bounds = array<i64: 1, 128>}, {pipeline_mode = #tpu.pipeline_mode<synchronous>, transform_indices = @transform_5, window_bounds = array<i64: 1, 128>}, {transform_indices = @transform_6, window_bounds = array<i64: 16, 128>}]} {
    %c0_i32 = arith.constant 0 : i32
    %0 = arith.cmpi eq, %arg1, %c0_i32 : i32
    %1 = arith.extui %0 : i1 to i32
    %c0_i32_0 = arith.constant 0 : i32
    %2 = arith.cmpi ne, %1, %c0_i32_0 : i32
    scf.if %2 {
      %cst_10 = arith.constant 0.000000e+00 : f32
      %12 = vector.broadcast %cst_10 : f32 to vector<16x128xf32>
      %c0_11 = arith.constant 0 : index
      %c0_12 = arith.constant 0 : index
      %13 = vector.load %arg9[%c0_11, %c0_12] : memref<16x128xf32, #tpu.memory_space<vmem>>, vector<16x128xf32>
      tpu.vector_store %arg9[%c0_11, %c0_12], %12 {strides = array<i32>} : memref<16x128xf32, #tpu.memory_space<vmem>>, vector<16x128xf32>,
    } else {
    }
    %c0 = arith.constant 0 : index
    %c0_1 = arith.constant 0 : index
    %3 = vector.load %arg9[%c0, %c0_1] : memref<16x128xf32, #tpu.memory_space<vmem>>, vector<16x128xf32>
    %c0_2 = arith.constant 0 : index
    %c0_3 = arith.constant 0 : index
    %4 = vector.load %arg2[%c0_2, %c0_3] : memref<16x128xbf16, #tpu.memory_space<vmem>>, vector<16x128xbf16>
    %c0_4 = arith.constant 0 : index
    %c0_5 = arith.constant 0 : index
    %5 = vector.load %arg3[%c0_4, %c0_5] : memref<128x128xbf16, #tpu.memory_space<vmem>>, vector<128x128xbf16>
    %cst = arith.constant dense<0.000000e+00> : vector<16x128xf32>
    %6 = tpu.matmul %4, %5, %cst {dimension_numbers = #tpu.dot_dimension_numbers<[1], [0], [0], [1], [0, 0, 1, 1], [], []>} : vector<16x128xbf16>, vector<128x128xbf16>, vector<16x128xf32> -> vector<16x128xf32>
    %7 = arith.addf %3, %6 : vector<16x128xf32>
    %c0_6 = arith.constant 0 : index
    %c0_7 = arith.constant 0 : index
    %8 = vector.load %arg9[%c0_6, %c0_7] : memref<16x128xf32, #tpu.memory_space<vmem>>, vector<16x128xf32>
    tpu.vector_store %arg9[%c0_6, %c0_7], %7 {strides = array<i32>} : memref<16x128xf32, #tpu.memory_space<vmem>>, vector<16x128xf32>,
    %c0_i32_8 = arith.constant 0 : i32
    %9 = arith.cmpi eq, %arg1, %c0_i32_8 : i32
    %10 = arith.extui %9 : i1 to i32
    %c0_i32_9 = arith.constant 0 : i32
    %11 = arith.cmpi ne, %10, %c0_i32_9 : i32
    scf.if %11 {
      %c0_10 = arith.constant 0 : index
      %c0_11 = arith.constant 0 : index
      %12 = vector.load %arg9[%c0_10, %c0_11] : memref<16x128xf32, #tpu.memory_space<vmem>>, vector<16x128xf32>
      %c0_12 = arith.constant 0 : index
      %c0_13 = arith.constant 0 : index
      %13 = vector.load %arg4[%c0_12, %c0_13] : memref<1x128xf32, #tpu.memory_space<vmem>>, vector<1x128xf32>
      %14 = vector.broadcast %13 : vector<1x128xf32> to vector<16x128xf32>
      %15 = arith.addf %12, %14 : vector<16x128xf32>
      %c0_14 = arith.constant 0 : index
      %c0_15 = arith.constant 0 : index
      %16 = vector.load %arg5[%c0_14, %c0_15] : memref<16x128xbf16, #tpu.memory_space<vmem>>, vector<16x128xbf16>
      %17 = arith.extf %16 : vector<16x128xbf16> to vector<16x128xf32>
      %18 = arith.addf %15, %17 : vector<16x128xf32>
      %19 = tpu.iota {dimensions = array<i32: 1>} : vector<16x128xi32>
      %c32_i32 = arith.constant 32 : i32
      %20 = vector.broadcast %c32_i32 : i32 to vector<16x128xi32>
      %21 = arith.cmpi slt, %19, %20 : vector<16x128xi32>
      %cst_16 = arith.constant 0.000000e+00 : f32
      %22 = vector.broadcast %cst_16 : f32 to vector<16x128xf32>
      %23 = arith.select %21, %18, %22 : vector<16x128xi1>, vector<16x128xf32>
      %cst_17 = arith.constant dense<0.000000e+00> : vector<16xf32>
      %24 = vector.multi_reduction <add>, %23, %cst_17 [1] : vector<16x128xf32> to vector<16xf32>
      %25 = vector.shape_cast %24 : vector<16xf32> to vector<16x1xf32>
      %26 = arith.mulf %23, %23 : vector<16x128xf32>
      %cst_18 = arith.constant dense<0.000000e+00> : vector<16xf32>
      %27 = vector.multi_reduction <add>, %26, %cst_18 [1] : vector<16x128xf32> to vector<16xf32>
      %28 = vector.shape_cast %27 : vector<16xf32> to vector<16x1xf32>
      %cst_19 = arith.constant 3.125000e-02 : f32
      %29 = vector.broadcast %cst_19 : f32 to vector<16x1xf32>
      %30 = arith.mulf %25, %29 : vector<16x1xf32>
      %cst_20 = arith.constant 3.125000e-02 : f32
      %31 = vector.broadcast %cst_20 : f32 to vector<16x1xf32>
      %32 = arith.mulf %28, %31 : vector<16x1xf32>
      %33 = arith.mulf %30, %30 : vector<16x1xf32>
      %34 = arith.subf %32, %33 : vector<16x1xf32>
      %35 = vector.broadcast %30 : vector<16x1xf32> to vector<16x128xf32>
      %36 = arith.subf %18, %35 : vector<16x128xf32>
      %cst_21 = arith.constant 9.99999974E-6 : f32
      %37 = vector.broadcast %cst_21 : f32 to vector<16x1xf32>
      %38 = arith.addf %34, %37 : vector<16x1xf32>
      %39 = math.rsqrt %38 : vector<16x1xf32>
      %40 = vector.broadcast %39 : vector<16x1xf32> to vector<16x128xf32>
      %41 = arith.mulf %36, %40 : vector<16x128xf32>
      %c0_22 = arith.constant 0 : index
      %c0_23 = arith.constant 0 : index
      %42 = vector.load %arg6[%c0_22, %c0_23] : memref<1x128xf32, #tpu.memory_space<vmem>>, vector<1x128xf32>
      %43 = vector.broadcast %42 : vector<1x128xf32> to vector<16x128xf32>
      %44 = arith.mulf %41, %43 : vector<16x128xf32>
      %c0_24 = arith.constant 0 : index
      %c0_25 = arith.constant 0 : index
      %45 = vector.load %arg7[%c0_24, %c0_25] : memref<1x128xf32, #tpu.memory_space<vmem>>, vector<1x128xf32>
      %46 = vector.broadcast %45 : vector<1x128xf32> to vector<16x128xf32>
      %47 = arith.addf %44, %46 : vector<16x128xf32>
      %48 = arith.truncf %47 : vector<16x128xf32> to vector<16x128xbf16>
      %c0_26 = arith.constant 0 : index
      %c0_27 = arith.constant 0 : index
      %49 = vector.load %arg8[%c0_26, %c0_27] : memref<16x128xbf16, #tpu.memory_space<vmem>>, vector<16x128xbf16>
      tpu.vector_store %arg8[%c0_26, %c0_27], %48 {strides = array<i32>} : memref<16x128xbf16, #tpu.memory_space<vmem>>, vector<16x128xbf16>,
    } else {
    }
    return
  }
  func.func @transform_0(%arg0: i32, %arg1: i32) -> (i32, i32) {
    %c0_i32 = arith.constant 0 : i32
    return %arg0, %arg1 : i32, i32
  }
  func.func @transform_1(%arg0: i32, %arg1: i32) -> (i32, i32) {
    %c0_i32 = arith.constant 0 : i32
    %c0_i32_0 = arith.constant 0 : i32
    return %arg1, %c0_i32 : i32, i32
  }
  func.func @transform_2(%arg0: i32, %arg1: i32) -> (i32, i32) {
    %c0_i32 = arith.constant 0 : i32
    %c0_i32_0 = arith.constant 0 : i32
    %c0_i32_1 = arith.constant 0 : i32
    return %c0_i32, %c0_i32_0 : i32, i32
  }
  func.func @transform_3(%arg0: i32, %arg1: i32) -> (i32, i32) {
    %c0_i32 = arith.constant 0 : i32
    %c0_i32_0 = arith.constant 0 : i32
    return %arg0, %c0_i32 : i32, i32
  }
  func.func @transform_4(%arg0: i32, %arg1: i32) -> (i32, i32) {
    %c0_i32 = arith.constant 0 : i32
    %c0_i32_0 = arith.constant 0 : i32
    %c0_i32_1 = arith.constant 0 : i32
    return %c0_i32, %c0_i32_0 : i32, i32
  }
  func.func @transform_5(%arg0: i32, %arg1: i32) -> (i32, i32) {
    %c0_i32 = arith.constant 0 : i32
    %c0_i32_0 = arith.constant 0 : i32
    %c0_i32_1 = arith.constant 0 : i32
    return %c0_i32, %c0_i32_0 : i32, i32
  }
  func.func @transform_6(%arg0: i32, %arg1: i32) -> (i32, i32) {
    %c0_i32 = arith.constant 0 : i32
    %c0_i32_0 = arith.constant 0 : i32
    return %arg0, %c0_i32 : i32, i32
  }
}

module attributes {stable_mosaic.version = 11 : i64} {
  func.func @_flash_attn_kernel(%arg0: i32, %arg1: i32, %arg2: i32, %arg3: i32, %arg4: memref<1x8x128xbf16, #tpu.memory_space<vmem>>, %arg5: memref<1x8x128xbf16, #tpu.memory_space<vmem>>, %arg6: memref<1x8x128xbf16, #tpu.memory_space<vmem>>, %arg7: memref<1x8x128xbf16, #tpu.memory_space<vmem>>, %arg8: memref<8x1xf32, #tpu.memory_space<vmem>>, %arg9: memref<8x1xf32, #tpu.memory_space<vmem>>, %arg10: memref<8x128xf32, #tpu.memory_space<vmem>>) attributes {dimension_semantics = [#tpu.dimension_semantics<parallel>, #tpu.dimension_semantics<parallel>, #tpu.dimension_semantics<parallel>, #tpu.dimension_semantics<arbitrary>], iteration_bounds = array<i64: 2, 4, 1, 1>, scalar_prefetch = 0 : i64, scratch_operands = 3 : i64, tpu.core_type = #tpu.core_type<tc>, window_params = [{transform_indices = @transform_0, window_bounds = array<i64: 1, 8, 128>}, {transform_indices = @transform_1, window_bounds = array<i64: 1, 8, 128>}, {transform_indices = @transform_2, window_bounds = array<i64: 1, 8, 128>}, {transform_indices = @transform_3, window_bounds = array<i64: 1, 8, 128>}]} {
    %c0_i32 = arith.constant 0 : i32
    %0 = arith.cmpi eq, %arg3, %c0_i32 : i32
    %1 = arith.extui %0 : i1 to i32
    %c0_i32_0 = arith.constant 0 : i32
    %2 = arith.cmpi ne, %1, %c0_i32_0 : i32
    scf.if %2 {
      %cst_26 = arith.constant 0xFF800000 : f32
      %36 = vector.broadcast %cst_26 : f32 to vector<8x1xf32>
      %c0_27 = arith.constant 0 : index
      %c0_28 = arith.constant 0 : index
      %37 = vector.load %arg8[%c0_27, %c0_28] : memref<8x1xf32, #tpu.memory_space<vmem>>, vector<8x1xf32>
      tpu.vector_store %arg8[%c0_27, %c0_28], %36 {strides = array<i32>} : memref<8x1xf32, #tpu.memory_space<vmem>>, vector<8x1xf32>,
      %cst_29 = arith.constant 0.000000e+00 : f32
      %38 = vector.broadcast %cst_29 : f32 to vector<8x1xf32>
      %c0_30 = arith.constant 0 : index
      %c0_31 = arith.constant 0 : index
      %39 = vector.load %arg9[%c0_30, %c0_31] : memref<8x1xf32, #tpu.memory_space<vmem>>, vector<8x1xf32>
      tpu.vector_store %arg9[%c0_30, %c0_31], %38 {strides = array<i32>} : memref<8x1xf32, #tpu.memory_space<vmem>>, vector<8x1xf32>,
      %cst_32 = arith.constant 0.000000e+00 : f32
      %40 = vector.broadcast %cst_32 : f32 to vector<8x128xf32>
      %c0_33 = arith.constant 0 : index
      %c0_34 = arith.constant 0 : index
      %41 = vector.load %arg10[%c0_33, %c0_34] : memref<8x128xf32, #tpu.memory_space<vmem>>, vector<8x128xf32>
      tpu.vector_store %arg10[%c0_33, %c0_34], %40 {strides = array<i32>} : memref<8x128xf32, #tpu.memory_space<vmem>>, vector<8x128xf32>,
    } else {
    }
    %c0 = arith.constant 0 : index
    %c0_1 = arith.constant 0 : index
    %c0_2 = arith.constant 0 : index
    %3 = vector.load %arg4[%c0, %c0_1, %c0_2] : memref<1x8x128xbf16, #tpu.memory_space<vmem>>, vector<1x8x128xbf16>
    %4 = vector.shape_cast %3 : vector<1x8x128xbf16> to vector<8x128xbf16>
    %c0_3 = arith.constant 0 : index
    %c0_4 = arith.constant 0 : index
    %c0_5 = arith.constant 0 : index
    %5 = vector.load %arg5[%c0_3, %c0_4, %c0_5] : memref<1x8x128xbf16, #tpu.memory_space<vmem>>, vector<1x8x128xbf16>
    %6 = vector.shape_cast %5 : vector<1x8x128xbf16> to vector<8x128xbf16>
    %cst = arith.constant dense<0.000000e+00> : vector<8x8xf32>
    %7 = tpu.matmul %4, %6, %cst {dimension_numbers = #tpu.dot_dimension_numbers<[1], [1], [0], [0], [0, 0, 1, 0], [], []>} : vector<8x128xbf16>, vector<8x128xbf16>, vector<8x8xf32> -> vector<8x8xf32>
    %c0_6 = arith.constant 0 : index
    %c0_7 = arith.constant 0 : index
    %8 = vector.load %arg8[%c0_6, %c0_7] : memref<8x1xf32, #tpu.memory_space<vmem>>, vector<8x1xf32>
    %cst_8 = arith.constant dense<0xFF800000> : vector<8xf32>
    %9 = vector.multi_reduction <maximumf>, %7, %cst_8 [1] : vector<8x8xf32> to vector<8xf32>
    %10 = vector.shape_cast %9 : vector<8xf32> to vector<8x1xf32>
    %11 = arith.maximumf %8, %10 : vector<8x1xf32>
    %12 = arith.subf %8, %11 : vector<8x1xf32>
    %13 = math.exp %12 : vector<8x1xf32>
    %14 = vector.broadcast %11 : vector<8x1xf32> to vector<8x8xf32>
    %15 = arith.subf %7, %14 : vector<8x8xf32>
    %16 = math.exp %15 : vector<8x8xf32>
    %c0_9 = arith.constant 0 : index
    %c0_10 = arith.constant 0 : index
    %17 = vector.load %arg9[%c0_9, %c0_10] : memref<8x1xf32, #tpu.memory_space<vmem>>, vector<8x1xf32>
    %18 = arith.mulf %13, %17 : vector<8x1xf32>
    %cst_11 = arith.constant dense<0.000000e+00> : vector<8xf32>
    %19 = vector.multi_reduction <add>, %16, %cst_11 [1] : vector<8x8xf32> to vector<8xf32>
    %20 = vector.shape_cast %19 : vector<8xf32> to vector<8x1xf32>
    %21 = arith.addf %18, %20 : vector<8x1xf32>
    %c0_12 = arith.constant 0 : index
    %c0_13 = arith.constant 0 : index
    %22 = vector.load %arg9[%c0_12, %c0_13] : memref<8x1xf32, #tpu.memory_space<vmem>>, vector<8x1xf32>
    tpu.vector_store %arg9[%c0_12, %c0_13], %21 {strides = array<i32>} : memref<8x1xf32, #tpu.memory_space<vmem>>, vector<8x1xf32>,
    %c0_14 = arith.constant 0 : index
    %c0_15 = arith.constant 0 : index
    %23 = vector.load %arg10[%c0_14, %c0_15] : memref<8x128xf32, #tpu.memory_space<vmem>>, vector<8x128xf32>
    %24 = vector.broadcast %13 : vector<8x1xf32> to vector<8x128xf32>
    %25 = arith.mulf %24, %23 : vector<8x128xf32>
    %26 = arith.truncf %16 : vector<8x8xf32> to vector<8x8xbf16>
    %c0_16 = arith.constant 0 : index
    %c0_17 = arith.constant 0 : index
    %c0_18 = arith.constant 0 : index
    %27 = vector.load %arg6[%c0_16, %c0_17, %c0_18] : memref<1x8x128xbf16, #tpu.memory_space<vmem>>, vector<1x8x128xbf16>
    %28 = vector.shape_cast %27 : vector<1x8x128xbf16> to vector<8x128xbf16>
    %cst_19 = arith.constant dense<0.000000e+00> : vector<8x128xf32>
    %29 = tpu.matmul %26, %28, %cst_19 {dimension_numbers = #tpu.dot_dimension_numbers<[1], [0], [0], [1], [0, 0, 1, 1], [], []>} : vector<8x8xbf16>, vector<8x128xbf16>, vector<8x128xf32> -> vector<8x128xf32>
    %30 = arith.addf %25, %29 : vector<8x128xf32>
    %c0_20 = arith.constant 0 : index
    %c0_21 = arith.constant 0 : index
    %31 = vector.load %arg10[%c0_20, %c0_21] : memref<8x128xf32, #tpu.memory_space<vmem>>, vector<8x128xf32>
    tpu.vector_store %arg10[%c0_20, %c0_21], %30 {strides = array<i32>} : memref<8x128xf32, #tpu.memory_space<vmem>>, vector<8x128xf32>,
    %c0_22 = arith.constant 0 : index
    %c0_23 = arith.constant 0 : index
    %32 = vector.load %arg8[%c0_22, %c0_23] : memref<8x1xf32, #tpu.memory_space<vmem>>, vector<8x1xf32>
    tpu.vector_store %arg8[%c0_22, %c0_23], %11 {strides = array<i32>} : memref<8x1xf32, #tpu.memory_space<vmem>>, vector<8x1xf32>,
    %c0_i32_24 = arith.constant 0 : i32
    %33 = arith.cmpi eq, %arg3, %c0_i32_24 : i32
    %34 = arith.extui %33 : i1 to i32
    %c0_i32_25 = arith.constant 0 : i32
    %35 = arith.cmpi ne, %34, %c0_i32_25 : i32
    scf.if %35 {
      %c0_26 = arith.constant 0 : index
      %c0_27 = arith.constant 0 : index
      %36 = vector.load %arg9[%c0_26, %c0_27] : memref<8x1xf32, #tpu.memory_space<vmem>>, vector<8x1xf32>
      %37 = tpu.reciprocal %36 {approx = true} : vector<8x1xf32> -> vector<8x1xf32>
      %c0_28 = arith.constant 0 : index
      %c0_29 = arith.constant 0 : index
      %38 = vector.load %arg10[%c0_28, %c0_29] : memref<8x128xf32, #tpu.memory_space<vmem>>, vector<8x128xf32>
      %39 = vector.broadcast %37 : vector<8x1xf32> to vector<8x128xf32>
      %40 = arith.mulf %38, %39 : vector<8x128xf32>
      %41 = arith.truncf %40 : vector<8x128xf32> to vector<8x128xbf16>
      %c0_30 = arith.constant 0 : index
      %c0_31 = arith.constant 0 : index
      %c0_32 = arith.constant 0 : index
      %42 = vector.load %arg7[%c0_30, %c0_31, %c0_32] : memref<1x8x128xbf16, #tpu.memory_space<vmem>>, vector<1x8x128xbf16>
      %43 = vector.shape_cast %42 : vector<1x8x128xbf16> to vector<8x128xbf16>
      %44 = vector.shape_cast %41 : vector<8x128xbf16> to vector<1x8x128xbf16>
      tpu.vector_store %arg7[%c0_30, %c0_31, %c0_32], %44 {strides = array<i32>} : memref<1x8x128xbf16, #tpu.memory_space<vmem>>, vector<1x8x128xbf16>,
    } else {
    }
    return
  }
  func.func @transform_0(%arg0: i32, %arg1: i32, %arg2: i32, %arg3: i32) -> (i32, i32, i32) {
    %c0_i32 = arith.constant 0 : i32
    %0 = arith.addi %c0_i32, %arg1 : i32
    %c0_i32_0 = arith.constant 0 : i32
    return %arg0, %arg2, %0 : i32, i32, i32
  }
  func.func @transform_1(%arg0: i32, %arg1: i32, %arg2: i32, %arg3: i32) -> (i32, i32, i32) {
    %c0_i32 = arith.constant 0 : i32
    %0 = arith.addi %c0_i32, %arg1 : i32
    %c0_i32_0 = arith.constant 0 : i32
    return %arg0, %arg3, %0 : i32, i32, i32
  }
  func.func @transform_2(%arg0: i32, %arg1: i32, %arg2: i32, %arg3: i32) -> (i32, i32, i32) {
    %c4_i32 = arith.constant 4 : i32
    %0 = arith.addi %c4_i32, %arg1 : i32
    %c0_i32 = arith.constant 0 : i32
    return %arg0, %arg3, %0 : i32, i32, i32
  }
  func.func @transform_3(%arg0: i32, %arg1: i32, %arg2: i32, %arg3: i32) -> (i32, i32, i32) {
    %c0_i32 = arith.constant 0 : i32
    return %arg0, %arg2, %arg1 : i32, i32, i32
  }
}

module attributes {stable_mosaic.version = 11 : i64} {
  func.func @_matmul_kernel(%arg0: i32, %arg1: i32, %arg2: i32, %arg3: memref<16x128xbf16, #tpu.memory_space<vmem>>, %arg4: memref<128x1024xbf16, #tpu.memory_space<vmem>>, %arg5: memref<1x1024xf32, #tpu.memory_space<vmem>>, %arg6: memref<16x1024xbf16, #tpu.memory_space<vmem>>, %arg7: memref<16x1024xf32, #tpu.memory_space<vmem>>) attributes {dimension_semantics = [#tpu.dimension_semantics<parallel>, #tpu.dimension_semantics<parallel>, #tpu.dimension_semantics<arbitrary>], iteration_bounds = array<i64: 1, 1, 1>, scalar_prefetch = 0 : i64, scratch_operands = 1 : i64, tpu.core_type = #tpu.core_type<tc>, window_params = [{transform_indices = @transform_0, window_bounds = array<i64: 16, 128>}, {transform_indices = @transform_1, window_bounds = array<i64: 128, 1024>}, {transform_indices = @transform_2, window_bounds = array<i64: 1, 1024>}, {transform_indices = @transform_3, window_bounds = array<i64: 16, 1024>}]} {
    %c0_i32 = arith.constant 0 : i32
    %0 = arith.cmpi eq, %arg2, %c0_i32 : i32
    %1 = arith.extui %0 : i1 to i32
    %c0_i32_0 = arith.constant 0 : i32
    %2 = arith.cmpi ne, %1, %c0_i32_0 : i32
    scf.if %2 {
      %cst_10 = arith.constant 0.000000e+00 : f32
      %12 = vector.broadcast %cst_10 : f32 to vector<16x1024xf32>
      %c0_11 = arith.constant 0 : index
      %c0_12 = arith.constant 0 : index
      %13 = vector.load %arg7[%c0_11, %c0_12] : memref<16x1024xf32, #tpu.memory_space<vmem>>, vector<16x1024xf32>
      tpu.vector_store %arg7[%c0_11, %c0_12], %12 {strides = array<i32>} : memref<16x1024xf32, #tpu.memory_space<vmem>>, vector<16x1024xf32>,
    } else {
    }
    %c0 = arith.constant 0 : index
    %c0_1 = arith.constant 0 : index
    %3 = vector.load %arg7[%c0, %c0_1] : memref<16x1024xf32, #tpu.memory_space<vmem>>, vector<16x1024xf32>
    %c0_2 = arith.constant 0 : index
    %c0_3 = arith.constant 0 : index
    %4 = vector.load %arg3[%c0_2, %c0_3] : memref<16x128xbf16, #tpu.memory_space<vmem>>, vector<16x128xbf16>
    %c0_4 = arith.constant 0 : index
    %c0_5 = arith.constant 0 : index
    %5 = vector.load %arg4[%c0_4, %c0_5] : memref<128x1024xbf16, #tpu.memory_space<vmem>>, vector<128x1024xbf16>
    %cst = arith.constant dense<0.000000e+00> : vector<16x1024xf32>
    %6 = tpu.matmul %4, %5, %cst {dimension_numbers = #tpu.dot_dimension_numbers<[1], [0], [0], [1], [0, 0, 1, 1], [], []>} : vector<16x128xbf16>, vector<128x1024xbf16>, vector<16x1024xf32> -> vector<16x1024xf32>
    %7 = arith.addf %3, %6 : vector<16x1024xf32>
    %c0_6 = arith.constant 0 : index
    %c0_7 = arith.constant 0 : index
    %8 = vector.load %arg7[%c0_6, %c0_7] : memref<16x1024xf32, #tpu.memory_space<vmem>>, vector<16x1024xf32>
    tpu.vector_store %arg7[%c0_6, %c0_7], %7 {strides = array<i32>} : memref<16x1024xf32, #tpu.memory_space<vmem>>, vector<16x1024xf32>,
    %c0_i32_8 = arith.constant 0 : i32
    %9 = arith.cmpi eq, %arg2, %c0_i32_8 : i32
    %10 = arith.extui %9 : i1 to i32
    %c0_i32_9 = arith.constant 0 : i32
    %11 = arith.cmpi ne, %10, %c0_i32_9 : i32
    scf.if %11 {
      %c0_10 = arith.constant 0 : index
      %c0_11 = arith.constant 0 : index
      %12 = vector.load %arg7[%c0_10, %c0_11] : memref<16x1024xf32, #tpu.memory_space<vmem>>, vector<16x1024xf32>
      %c0_12 = arith.constant 0 : index
      %c0_13 = arith.constant 0 : index
      %13 = vector.load %arg5[%c0_12, %c0_13] : memref<1x1024xf32, #tpu.memory_space<vmem>>, vector<1x1024xf32>
      %14 = vector.broadcast %13 : vector<1x1024xf32> to vector<16x1024xf32>
      %15 = arith.addf %12, %14 : vector<16x1024xf32>
      %16 = arith.truncf %15 : vector<16x1024xf32> to vector<16x1024xbf16>
      %c0_14 = arith.constant 0 : index
      %c0_15 = arith.constant 0 : index
      %17 = vector.load %arg6[%c0_14, %c0_15] : memref<16x1024xbf16, #tpu.memory_space<vmem>>, vector<16x1024xbf16>
      tpu.vector_store %arg6[%c0_14, %c0_15], %16 {strides = array<i32>} : memref<16x1024xbf16, #tpu.memory_space<vmem>>, vector<16x1024xbf16>,
    } else {
    }
    return
  }
  func.func @transform_0(%arg0: i32, %arg1: i32, %arg2: i32) -> (i32, i32) {
    %c0_i32 = arith.constant 0 : i32
    return %arg0, %arg2 : i32, i32
  }
  func.func @transform_1(%arg0: i32, %arg1: i32, %arg2: i32) -> (i32, i32) {
    %c0_i32 = arith.constant 0 : i32
    return %arg2, %arg1 : i32, i32
  }
  func.func @transform_2(%arg0: i32, %arg1: i32, %arg2: i32) -> (i32, i32) {
    %c0_i32 = arith.constant 0 : i32
    %c0_i32_0 = arith.constant 0 : i32
    return %c0_i32, %arg1 : i32, i32
  }
  func.func @transform_3(%arg0: i32, %arg1: i32, %arg2: i32) -> (i32, i32) {
    %c0_i32 = arith.constant 0 : i32
    return %arg0, %arg1 : i32, i32
  }
}

module attributes {stable_mosaic.version = 11 : i64} {
  func.func @_ln_kernel(%arg0: i32, %arg1: memref<16x128xbf16, #tpu.memory_space<vmem>>, %arg2: memref<1x128xf32, #tpu.memory_space<vmem>>, %arg3: memref<1x128xf32, #tpu.memory_space<vmem>>, %arg4: memref<16x128xbf16, #tpu.memory_space<vmem>>) attributes {dimension_semantics = [#tpu.dimension_semantics<parallel>], iteration_bounds = array<i64: 1>, scalar_prefetch = 0 : i64, scratch_operands = 0 : i64, tpu.core_type = #tpu.core_type<tc>, window_params = [{transform_indices = @transform_0, window_bounds = array<i64: 16, 128>}, {pipeline_mode = #tpu.pipeline_mode<synchronous>, transform_indices = @transform_1, window_bounds = array<i64: 1, 128>}, {pipeline_mode = #tpu.pipeline_mode<synchronous>, transform_indices = @transform_2, window_bounds = array<i64: 1, 128>}, {transform_indices = @transform_3, window_bounds = array<i64: 16, 128>}]} {
    %c0 = arith.constant 0 : index
    %c0_0 = arith.constant 0 : index
    %0 = vector.load %arg1[%c0, %c0_0] : memref<16x128xbf16, #tpu.memory_space<vmem>>, vector<16x128xbf16>
    %1 = arith.extf %0 : vector<16x128xbf16> to vector<16x128xf32>
    %2 = tpu.iota {dimensions = array<i32: 1>} : vector<16x128xi32>
    %c32_i32 = arith.constant 32 : i32
    %3 = vector.broadcast %c32_i32 : i32 to vector<16x128xi32>
    %4 = arith.cmpi slt, %2, %3 : vector<16x128xi32>
    %cst = arith.constant 0.000000e+00 : f32
    %5 = vector.broadcast %cst : f32 to vector<16x128xf32>
    %6 = arith.select %4, %1, %5 : vector<16x128xi1>, vector<16x128xf32>
    %cst_1 = arith.constant dense<0.000000e+00> : vector<16xf32>
    %7 = vector.multi_reduction <add>, %6, %cst_1 [1] : vector<16x128xf32> to vector<16xf32>
    %8 = vector.shape_cast %7 : vector<16xf32> to vector<16x1xf32>
    %9 = arith.mulf %6, %6 : vector<16x128xf32>
    %cst_2 = arith.constant dense<0.000000e+00> : vector<16xf32>
    %10 = vector.multi_reduction <add>, %9, %cst_2 [1] : vector<16x128xf32> to vector<16xf32>
    %11 = vector.shape_cast %10 : vector<16xf32> to vector<16x1xf32>
    %cst_3 = arith.constant 3.125000e-02 : f32
    %12 = vector.broadcast %cst_3 : f32 to vector<16x1xf32>
    %13 = arith.mulf %8, %12 : vector<16x1xf32>
    %cst_4 = arith.constant 3.125000e-02 : f32
    %14 = vector.broadcast %cst_4 : f32 to vector<16x1xf32>
    %15 = arith.mulf %11, %14 : vector<16x1xf32>
    %16 = arith.mulf %13, %13 : vector<16x1xf32>
    %17 = arith.subf %15, %16 : vector<16x1xf32>
    %18 = vector.broadcast %13 : vector<16x1xf32> to vector<16x128xf32>
    %19 = arith.subf %1, %18 : vector<16x128xf32>
    %cst_5 = arith.constant 9.99999974E-6 : f32
    %20 = vector.broadcast %cst_5 : f32 to vector<16x1xf32>
    %21 = arith.addf %17, %20 : vector<16x1xf32>
    %22 = math.rsqrt %21 : vector<16x1xf32>
    %23 = vector.broadcast %22 : vector<16x1xf32> to vector<16x128xf32>
    %24 = arith.mulf %19, %23 : vector<16x128xf32>
    %c0_6 = arith.constant 0 : index
    %c0_7 = arith.constant 0 : index
    %25 = vector.load %arg2[%c0_6, %c0_7] : memref<1x128xf32, #tpu.memory_space<vmem>>, vector<1x128xf32>
    %26 = vector.broadcast %25 : vector<1x128xf32> to vector<16x128xf32>
    %27 = arith.mulf %24, %26 : vector<16x128xf32>
    %c0_8 = arith.constant 0 : index
    %c0_9 = arith.constant 0 : index
    %28 = vector.load %arg3[%c0_8, %c0_9] : memref<1x128xf32, #tpu.memory_space<vmem>>, vector<1x128xf32>
    %29 = vector.broadcast %28 : vector<1x128xf32> to vector<16x128xf32>
    %30 = arith.addf %27, %29 : vector<16x128xf32>
    %31 = arith.truncf %30 : vector<16x128xf32> to vector<16x128xbf16>
    %c0_10 = arith.constant 0 : index
    %c0_11 = arith.constant 0 : index
    %32 = vector.load %arg4[%c0_10, %c0_11] : memref<16x128xbf16, #tpu.memory_space<vmem>>, vector<16x128xbf16>
    tpu.vector_store %arg4[%c0_10, %c0_11], %31 {strides = array<i32>} : memref<16x128xbf16, #tpu.memory_space<vmem>>, vector<16x128xbf16>,
    return
  }
  func.func @transform_0(%arg0: i32) -> (i32, i32) {
    %c0_i32 = arith.constant 0 : i32
    %c0_i32_0 = arith.constant 0 : i32
    return %arg0, %c0_i32 : i32, i32
  }
  func.func @transform_1(%arg0: i32) -> (i32, i32) {
    %c0_i32 = arith.constant 0 : i32
    %c0_i32_0 = arith.constant 0 : i32
    %c0_i32_1 = arith.constant 0 : i32
    return %c0_i32, %c0_i32_0 : i32, i32
  }
  func.func @transform_2(%arg0: i32) -> (i32, i32) {
    %c0_i32 = arith.constant 0 : i32
    %c0_i32_0 = arith.constant 0 : i32
    %c0_i32_1 = arith.constant 0 : i32
    return %c0_i32, %c0_i32_0 : i32, i32
  }
  func.func @transform_3(%arg0: i32) -> (i32, i32) {
    %c0_i32 = arith.constant 0 : i32
    %c0_i32_0 = arith.constant 0 : i32
    return %arg0, %c0_i32 : i32, i32
  }
}

module attributes {stable_mosaic.version = 11 : i64} {
  func.func @_matmul_kernel(%arg0: i32, %arg1: i32, %arg2: i32, %arg3: memref<16x128xbf16, #tpu.memory_space<vmem>>, %arg4: memref<128x128xbf16, #tpu.memory_space<vmem>>, %arg5: memref<1x128xf32, #tpu.memory_space<vmem>>, %arg6: memref<16x128xbf16, #tpu.memory_space<vmem>>, %arg7: memref<16x128xf32, #tpu.memory_space<vmem>>) attributes {dimension_semantics = [#tpu.dimension_semantics<parallel>, #tpu.dimension_semantics<parallel>, #tpu.dimension_semantics<arbitrary>], iteration_bounds = array<i64: 1, 1, 1>, scalar_prefetch = 0 : i64, scratch_operands = 1 : i64, tpu.core_type = #tpu.core_type<tc>, window_params = [{transform_indices = @transform_0, window_bounds = array<i64: 16, 128>}, {transform_indices = @transform_1, window_bounds = array<i64: 128, 128>}, {transform_indices = @transform_2, window_bounds = array<i64: 1, 128>}, {transform_indices = @transform_3, window_bounds = array<i64: 16, 128>}]} {
    %c0_i32 = arith.constant 0 : i32
    %0 = arith.cmpi eq, %arg2, %c0_i32 : i32
    %1 = arith.extui %0 : i1 to i32
    %c0_i32_0 = arith.constant 0 : i32
    %2 = arith.cmpi ne, %1, %c0_i32_0 : i32
    scf.if %2 {
      %cst_10 = arith.constant 0.000000e+00 : f32
      %12 = vector.broadcast %cst_10 : f32 to vector<16x128xf32>
      %c0_11 = arith.constant 0 : index
      %c0_12 = arith.constant 0 : index
      %13 = vector.load %arg7[%c0_11, %c0_12] : memref<16x128xf32, #tpu.memory_space<vmem>>, vector<16x128xf32>
      tpu.vector_store %arg7[%c0_11, %c0_12], %12 {strides = array<i32>} : memref<16x128xf32, #tpu.memory_space<vmem>>, vector<16x128xf32>,
    } else {
    }
    %c0 = arith.constant 0 : index
    %c0_1 = arith.constant 0 : index
    %3 = vector.load %arg7[%c0, %c0_1] : memref<16x128xf32, #tpu.memory_space<vmem>>, vector<16x128xf32>
    %c0_2 = arith.constant 0 : index
    %c0_3 = arith.constant 0 : index
    %4 = vector.load %arg3[%c0_2, %c0_3] : memref<16x128xbf16, #tpu.memory_space<vmem>>, vector<16x128xbf16>
    %c0_4 = arith.constant 0 : index
    %c0_5 = arith.constant 0 : index
    %5 = vector.load %arg4[%c0_4, %c0_5] : memref<128x128xbf16, #tpu.memory_space<vmem>>, vector<128x128xbf16>
    %cst = arith.constant dense<0.000000e+00> : vector<16x128xf32>
    %6 = tpu.matmul %4, %5, %cst {dimension_numbers = #tpu.dot_dimension_numbers<[1], [0], [0], [1], [0, 0, 1, 1], [], []>} : vector<16x128xbf16>, vector<128x128xbf16>, vector<16x128xf32> -> vector<16x128xf32>
    %7 = arith.addf %3, %6 : vector<16x128xf32>
    %c0_6 = arith.constant 0 : index
    %c0_7 = arith.constant 0 : index
    %8 = vector.load %arg7[%c0_6, %c0_7] : memref<16x128xf32, #tpu.memory_space<vmem>>, vector<16x128xf32>
    tpu.vector_store %arg7[%c0_6, %c0_7], %7 {strides = array<i32>} : memref<16x128xf32, #tpu.memory_space<vmem>>, vector<16x128xf32>,
    %c0_i32_8 = arith.constant 0 : i32
    %9 = arith.cmpi eq, %arg2, %c0_i32_8 : i32
    %10 = arith.extui %9 : i1 to i32
    %c0_i32_9 = arith.constant 0 : i32
    %11 = arith.cmpi ne, %10, %c0_i32_9 : i32
    scf.if %11 {
      %c0_10 = arith.constant 0 : index
      %c0_11 = arith.constant 0 : index
      %12 = vector.load %arg7[%c0_10, %c0_11] : memref<16x128xf32, #tpu.memory_space<vmem>>, vector<16x128xf32>
      %c0_12 = arith.constant 0 : index
      %c0_13 = arith.constant 0 : index
      %13 = vector.load %arg5[%c0_12, %c0_13] : memref<1x128xf32, #tpu.memory_space<vmem>>, vector<1x128xf32>
      %14 = vector.broadcast %13 : vector<1x128xf32> to vector<16x128xf32>
      %15 = arith.addf %12, %14 : vector<16x128xf32>
      %16 = arith.truncf %15 : vector<16x128xf32> to vector<16x128xbf16>
      %c0_14 = arith.constant 0 : index
      %c0_15 = arith.constant 0 : index
      %17 = vector.load %arg6[%c0_14, %c0_15] : memref<16x128xbf16, #tpu.memory_space<vmem>>, vector<16x128xbf16>
      tpu.vector_store %arg6[%c0_14, %c0_15], %16 {strides = array<i32>} : memref<16x128xbf16, #tpu.memory_space<vmem>>, vector<16x128xbf16>,
    } else {
    }
    return
  }
  func.func @transform_0(%arg0: i32, %arg1: i32, %arg2: i32) -> (i32, i32) {
    %c0_i32 = arith.constant 0 : i32
    return %arg0, %arg2 : i32, i32
  }
  func.func @transform_1(%arg0: i32, %arg1: i32, %arg2: i32) -> (i32, i32) {
    %c0_i32 = arith.constant 0 : i32
    return %arg2, %arg1 : i32, i32
  }
  func.func @transform_2(%arg0: i32, %arg1: i32, %arg2: i32) -> (i32, i32) {
    %c0_i32 = arith.constant 0 : i32
    %c0_i32_0 = arith.constant 0 : i32
    return %c0_i32, %arg1 : i32, i32
  }
  func.func @transform_3(%arg0: i32, %arg1: i32, %arg2: i32) -> (i32, i32) {
    %c0_i32 = arith.constant 0 : i32
    return %arg0, %arg1 : i32, i32
  }
}

</mosaic_0001>

<bundles_post_ra>
// kernel: gpt_forward.43
= control target key start
LH: loop header
LB: loop body
LE: loop exit
PB: predicated region body
PF: predicated region fallthrough
CT: control target
= control target key end

     0   :  { %v501_v1 = vmov 0   ;;  %v350_v34 = vlaneseq  ;;  %s636_s1 = inlined_call_operand.vmem [shape: bf16[128,512], index: 1, kind: input, shape index: {}]   ;;  %s637_s0 = inlined_call_operand.vmem [shape: bf16[16,128], index: 0, kind: input, shape index: {}]   ;;  %s638_s2 = inlined_call_operand.vmem [shape: f32[1,512], index: 2, kind: input, shape index: {}]   ;;  %s639_s3 = inlined_call_operand.vmem [shape: bf16[16,512], index: 3, kind: output, shape index: {}]  }
   0x1   :  { %v452_v0 = vld [vmem:[%s636_s1 + $0xe4] ss:$16 sps:$4 sm:$0xff]   ;;  %267 = vmatprep.mubr.bf16.mxu0 %v501_v1  ;;  %310 = vmatprep.mubr.bf16.mxu1 %v501_v1  ;;  %v454_v2 = vld [vmem:[%s636_s1 + $0xec] ss:$16 sps:$4 sm:$0xff]   ;;  %v456_v3 = vld [vmem:[%s636_s1 + $0xe0] ss:$16 sps:$4 sm:$0xff]  }
   0x2   :  { %235 = vmatprep.subr.bf16.mxu0 %v452_v0  ;;  %v457_v4 = vld [vmem:[%s636_s1 + $0xe8] ss:$16 sps:$4 sm:$0xff]   ;;  %278 = vmatprep.subr.bf16.mxu1 %v454_v2  ;;  %v458_v5 = vld [vmem:[%s636_s1 + $0xc4] ss:$16 sps:$4 sm:$0xff]   ;;  %v460_v6 = vld [vmem:[%s636_s1 + $0xcc] ss:$16 sps:$4 sm:$0xff]  }
   0x3   :  { %236 = vmatpush1.bf16.msra.mxu0 %v456_v3  ;;  %279 = vmatpush1.bf16.msra.mxu1 %v457_v4  ;;  %v462_v7 = vld [vmem:[%s636_s1 + $0xc0] ss:$16 sps:$4 sm:$0xff]   ;;  %v463_v8 = vld [vmem:[%s636_s1 + $0xc8] ss:$16 sps:$4 sm:$0xff]   ;;  %v464_v9 = vld [vmem:[%s636_s1 + $0xa4] ss:$16 sps:$4 sm:$0xff]  }
   0x4   :  { %237 = vmatprep.subr.bf16.mxu0 %v458_v5  ;;  %280 = vmatprep.subr.bf16.mxu1 %v460_v6  ;;  %v466_v10 = vld [vmem:[%s636_s1 + $0xac] ss:$16 sps:$4 sm:$0xff]   ;;  %v468_v11 = vld [vmem:[%s636_s1 + $0xa0] ss:$16 sps:$4 sm:$0xff]   ;;  %v469_v12 = vld [vmem:[%s636_s1 + $0xa8] ss:$16 sps:$4 sm:$0xff]  }
   0x5   :  { %v470_v13 = vld [vmem:[%s636_s1 + $0x84] ss:$16 sps:$4 sm:$0xff]   ;;  %v472_v14 = vld [vmem:[%s636_s1 + $0x8c] ss:$16 sps:$4 sm:$0xff]   ;;  %v474_v15 = vld [vmem:[%s636_s1 + $0x80] ss:$16 sps:$4 sm:$0xff]  }
   0x6   :  { %v475_v16 = vld [vmem:[%s636_s1 + $0x88] ss:$16 sps:$4 sm:$0xff]   ;;  %v476_v17 = vld [vmem:[%s636_s1 + $0x64] ss:$16 sps:$4 sm:$0xff]   ;;  %v478_v18 = vld [vmem:[%s636_s1 + $0x6c] ss:$16 sps:$4 sm:$0xff]  }
   0x7   :  { %238 = vmatpush1.bf16.msra.mxu0 %v462_v7  ;;  %281 = vmatpush1.bf16.msra.mxu1 %v463_v8  ;;  %v480_v19 = vld [vmem:[%s636_s1 + $0x60] ss:$16 sps:$4 sm:$0xff]   ;;  %v481_v20 = vld [vmem:[%s636_s1 + $0x68] ss:$16 sps:$4 sm:$0xff]   ;;  %v482_v21 = vld [vmem:[%s636_s1 + $0x44] ss:$16 sps:$4 sm:$0xff]  }
   0x8   :  { %239 = vmatprep.subr.bf16.mxu0 %v464_v9  ;;  %282 = vmatprep.subr.bf16.mxu1 %v466_v10  ;;  %v484_v22 = vld [vmem:[%s636_s1 + $0x4c] ss:$16 sps:$4 sm:$0xff]   ;;  %v486_v23 = vld [vmem:[%s636_s1 + $0x40] ss:$16 sps:$4 sm:$0xff]   ;;  %v487_v24 = vld [vmem:[%s636_s1 + $0x48] ss:$16 sps:$4 sm:$0xff]  }
   0x9   :  { %v488_v25 = vld [vmem:[%s636_s1 + $0x24] ss:$16 sps:$4 sm:$0xff]   ;;  %v490_v26 = vld [vmem:[%s636_s1 + $0x2c] ss:$16 sps:$4 sm:$0xff]   ;;  %v492_v27 = vld [vmem:[%s636_s1 + $0x20] ss:$16 sps:$4 sm:$0xff]  }
   0xa   :  { %v493_v28 = vld [vmem:[%s636_s1 + $0x28] ss:$16 sps:$4 sm:$0xff]   ;;  %v494_v29 = vld [vmem:[%s636_s1 + $0x4] ss:$16 sps:$4 sm:$0xff]   ;;  %v496_v30 = vld [vmem:[%s636_s1 + $0xc] ss:$16 sps:$4 sm:$0xff]  }
   0xb   :  { %240 = vmatpush1.bf16.msra.mxu0 %v468_v11  ;;  %283 = vmatpush1.bf16.msra.mxu1 %v469_v12  ;;  %v498_v31 = vld [vmem:[%s636_s1] ss:$16 sps:$4 sm:$0xff]   ;;  %v499_v32 = vld [vmem:[%s636_s1 + $0x8] ss:$16 sps:$4 sm:$0xff]   ;;  %v351_v35 = vshrl.u32 %v350_v34, 7 }
   0xc   :  { %241 = vmatprep.subr.bf16.mxu0 %v470_v13  ;;  %284 = vmatprep.subr.bf16.mxu1 %v472_v14  ;;  %v500_v33 = vld [vmem:[%s637_s0] sm:$0xff]  }
   0xd   :  { %v352_v36 = vsub.s32 0, %v351_v35  ;;  %v360_v37 = vsub.s32 2, %v351_v35  ;;  %v356_v38 = vsub.s32 1, %v351_v35  ;;  %v364_v39 = vsub.s32 3, %v351_v35  ;;  %v348_v40 = vld [vmem:[%s638_s2] sm:$0xf] }
   0xf   :  { %242 = vmatpush1.bf16.msra.mxu0 %v474_v15  ;;  %285 = vmatpush1.bf16.msra.mxu1 %v475_v16  ;;  %v353_v41 = vrot.slane %v348_v40, %v352_v36  ;;  %v361_v42 = vrot.slane %v348_v40, %v360_v37  ;;  %v357_v43 = vrot.slane %v348_v40, %v356_v38 }
  0x10   :  { %243 = vmatprep.subr.bf16.mxu0 %v476_v17  ;;  %286 = vmatprep.subr.bf16.mxu1 %v478_v18  ;;  %v365_v44 = vrot.slane %v348_v40, %v364_v39 }
  0x13   :  { %244 = vmatpush1.bf16.msra.mxu0 %v480_v19  ;;  %287 = vmatpush1.bf16.msra.mxu1 %v481_v20 }
  0x14   :  { %245 = vmatprep.subr.bf16.mxu0 %v482_v21  ;;  %288 = vmatprep.subr.bf16.mxu1 %v484_v22 }
  0x17   :  { %246 = vmatpush1.bf16.msra.mxu0 %v486_v23  ;;  %289 = vmatpush1.bf16.msra.mxu1 %v487_v24 }
  0x18   :  { %247 = vmatprep.subr.bf16.mxu0 %v488_v25  ;;  %290 = vmatprep.subr.bf16.mxu1 %v490_v26 }
  0x1b   :  { %248 = vmatpush1.bf16.msra.mxu0 %v492_v27  ;;  %291 = vmatpush1.bf16.msra.mxu1 %v493_v28 }
  0x1c   :  { %249 = vmatprep.subr.bf16.mxu0 %v494_v29  ;;  %292 = vmatprep.subr.bf16.mxu1 %v496_v30 }
  0x1f   :  { %250 = vmatpush1.bf16.msra.mxu0 %v498_v31  ;;  %293 = vmatpush1.bf16.msra.mxu1 %v499_v32 }
  0x22   :  { %268 = vmatmul.mubr.bf16.vlgmr.msra.gmra.mxu0 %v500_v33  ;;  %311 = vmatmul.mubr.bf16.vlgmr.msra.gmra.mxu1 %v500_v33 }
  0xe2   :  { %v269_v45 = vpop.f32.mrf.mxu0  ;;  %v312_v46 = vpop.f32.mrf.mxu1 }
  0xe3   :  { %v370_v49 = vadd.f32 %v353_v41, %v269_v45  ;;  %v372_v50 = vadd.f32 %v361_v42, %v312_v46 }
  0xe4   :  { %v271_v47 = vpop.f32.mrf.mxu0  ;;  %v314_v48 = vpop.f32.mrf.mxu1 }
  0xe5   :  { %v371_v51 = vadd.f32 %v357_v43, %v271_v47  ;;  %v373_v52 = vadd.f32 %v365_v44, %v314_v48 }
  0xe6   :  { %v273_v53 = vpop.f32.mrf.mxu0  ;;  %v316_v54 = vpop.f32.mrf.mxu1 }
  0xe7   :  { %v447_v55 = vpack.c.bf16 %v371_v51, %v370_v49  ;;  %v448_v56 = vpack.c.bf16 %v373_v52, %v372_v50  ;;  %v374_v59 = vadd.f32 %v353_v41, %v273_v53  ;;  %v376_v60 = vadd.f32 %v361_v42, %v316_v54 }
  0xe8   :  { %v275_v57 = vpop.f32.mrf.mxu0  ;;  %v318_v58 = vpop.f32.mrf.mxu1 }
  0xe9   :  { %402 = vst [vmem:[%s639_s3] sm:$0xff] %v447_v55  ;;  %403 = vst [vmem:[%s639_s3 + $0x8] sm:$0xff] %v448_v56  ;;  %v375_v61 = vadd.f32 %v357_v43, %v275_v57  ;;  %v377_v62 = vadd.f32 %v365_v44, %v318_v58 }
  0xeb   :  { %v449_v63 = vpack.c.bf16 %v375_v61, %v374_v59  ;;  %v450_v0 = vpack.c.bf16 %v377_v62, %v376_v60 }
  0xed   :  { %404 = vst [vmem:[%s639_s3 + $0x10] sm:$0xff] %v449_v63  ;;  %405 = vst [vmem:[%s639_s3 + $0x18] sm:$0xff] %v450_v0 }

// kernel: gpt_forward.41
= control target key start
LH: loop header
LB: loop body
LE: loop exit
PB: predicated region body
PF: predicated region fallthrough
CT: control target
= control target key end

     0   :  { %s818_s12 = smov 0   ;;  %s820_s13 = smov 0   ;;  %s899_s0 = inlined_call_operand.vmem [shape: bf16[2,8,1536], index: 0, kind: input, shape index: {}, may-alias: {0,1,2}]   ;;  %s900_s1 = inlined_call_operand.vmem [shape: bf16[2,8,1536], index: 1, kind: input, shape index: {}, may-alias: {0,1,2}]   ;;  %s901_s2 = inlined_call_operand.vmem [shape: bf16[2,8,1536], index: 2, kind: input, shape index: {}, may-alias: {0,1,2}]   ;;  %s902_s3 = inlined_call_operand.vmem [shape: bf16[2,8,512], index: 3, kind: output, shape index: {}]  }
   0x1   :  { %s822_s14 = smov 0   ;;  %s824_s15 = smov 0  }
   0x2   :  { %s826_s16 = smov 0  }
   0x3 LB: > { %s35_s17 = sadd.s32 1, %s784_s14  ;;  %s39_s18 = sadd.s32 1, %s788_s15  ;;  %s792_s16 = sphi %s826_s16, %s13_s16   ;;  %s788_s15 = sphi %s824_s15, %s906_s15   ;;  %s784_s14 = sphi %s822_s14, %s905_s14   ;;  %s780_s13 = sphi %s820_s13, %s904_s13   ;;  %s776_s12 = sphi %s818_s12, %s903_s12  }
   0x4   : > { %p37_p0 = scmp.ge.s32.totalorder %s35_s17, 4  ;;  %p676_p1 = scmp.ge.s32.totalorder %s792_s16, 1 }
   0x5   : > { %p228_p2 = scmp.lt.s32.totalorder %s792_s16, 9 }
   0x6   : > { %s908_s17 = smov (%p37_p0, %s35_s17), 0  ;;  %s910_s18 = smov (!%p37_p0, %s39_s18), %s788_s15 }
   0x7   : > { %p229_p3 = pnand %p676_p1, %p228_p2  ;;  %p41_p4 = scmp.ge.s32.totalorder %s910_s18, 2 }
   0x8   : > { %p292_p5 = scmp.lt.s32.totalorder (!%p229_p3), %s780_s13, 1  ;;  %s304_s19 = sadd.s32 (!%p229_p3), 4, %s776_s12 }
   0x9   : > { %s912_s18 = smov (%p41_p4, %s910_s18), 0  ;;  %232 = sbr.rel (%p229_p3) target bundleno = 797 (0x31d), region = 32 }
   0xa   : > { %p309_p6 = scmp.lt.s32.totalorder (!%p229_p3), %s304_s19, 11  ;;  %p296_p7 = scmp.lt.s32.totalorder (!%p229_p3), %s776_s12, 11 }
   0xb   : > { %s318_s5 = sadd.s32 (!%p229_p3), 8, %s776_s12  ;;  %p336_p9 = scmp.lt.s32.totalorder (!%p229_p3), %s776_s12, 3 }
   0xc   : > { %p323_p8 = scmp.lt.s32.totalorder (!%p229_p3), %s318_s5, 11 }
   0xe   : > { %v794_v0 = vmov 0.0   ;;  %vm795_vm0 = vmmov 0   ;;  %s914_s13 = smov (!%p292_p5, %s780_s13), 1  ;;  %s916_s19 = smov (!%p309_p6, %s304_s19), 11  ;;  %vm349_vm1 = vcmask 7168   ;;  %v796_v3 = vmov -inf  }
   0xf   : > { %689 = vmatprep.subr.bf16.mxu0 %v794_v0  ;;  %691 = vmatprep.mubr.msk.bf16.mxu0 %vm795_vm0, %v794_v0  ;;  %s855_s20 = smul.u32 12, %s914_s13  ;;  %350 = vst.msk [vmem:[#allocation2] sm:$0xff] %vm349_vm1, %v796_v3  ;;  %351 = vst.msk [vmem:[#allocation3] sm:$0xff] %vm349_vm1, %v794_v0  ;;  %v402_v4 = vlaneseq  ;;  %vm413_vm3 = vcmask 64512   ;;  %v797_v13 = vmov 0   ;;  %s918_s5 = smov (!%p323_p8, %s318_s5), 11 }
  0x10   : > { %695 = vmatprep.subr.bf16.mxu1 %v794_v0  ;;  %697 = vmatprep.mubr.msk.bf16.mxu1 %vm795_vm0, %v794_v0  ;;  %s297_s21 = scalar_select %p296_p7, %s776_s12, 11  ;;  %vm449_vm4 = vcmask 1043456  }
  0x11   : > { %s314_s22 = sadd.s32 %s855_s20, %s916_s19  ;;  %v403_v5 = vshrl.u32 %v402_v4, 7  ;;  %v407_v6 = vand.u32 127, %v402_v4  ;;  %746 = vset.pattern.permute.xlu0 %v797_v13  ;;  %747 = vset.pattern.permute.xlu1 %v797_v13  ;;  %s328_s6 = sadd.s32 %s855_s20, %s918_s5 }
  0x12   : > { %s678_s23 = sshll.u32 %s314_s22, 2  ;;  %s301_s24 = sadd.s32 %s855_s20, %s297_s21 }
  0x13   : > { %s316_s27 = scalar_lea.vmem %s900_s1, %s678_s23  ;;  %s677_s28 = sshll.u32 %s301_s24, 2  ;;  %vm410_vm2 = vcmp.gt.s32.totalorder %v407_v6, %v403_v5 }
  0x14   : > { %v361_v1 = vld [vmem:[%s316_s27] sm:$0xf]  ;;  %s303_s4 = scalar_lea.vmem %s899_s0, %s677_s28  ;;  %s679_s7 = sshll.u32 %s328_s6, 2 }
  0x15   : > { %690 = vmatpush3.bf16.xpose.msra.mxu0 %v361_v1  ;;  %v360_v2 = vld [vmem:[%s303_s4] sm:$0xf]  ;;  %s330_s10 = scalar_lea.vmem %s901_s2, %s679_s7  ;;  %s920_s12 = smov (!%p336_p9, %s776_s12), 3 }
  0x16   : > { %v412_v14 = vld [vmem:[#allocation2] sm:$0xff]  ;;  %v429_v28 = vld [vmem:[#allocation3] sm:$0xff]  ;;  %s680_s11 = sshll.u32 %s914_s13, 2 }
  0x17   : > { %v445_v18 = vld [vmem:[%s330_s10] sm:$0xf]  ;;  %s341_s19 = sadd.s32 %s680_s11, %s920_s12 }
  0x18   : > { %v451_v19 = vsel %vm449_vm4, %v445_v18, 0  ;;  %s681_s20 = sshll.u32 %s341_s19, 2 }
  0x19   : > { %696 = vmatpush3.bf16.msra.mxu1 %v451_v19  ;;  %s343_s23 = scalar_lea.vmem %s902_s3, %s681_s20 }
  0x1c   : > { %692 = vmatmul.mubr.bf16.vlgmr.msra.gmra.mxu0 %v360_v2 }
  0xdc   : > { %v396_v7 = vpop.f32.mrf.mxu0 }
  0xdd   : > { %v411_v8 = vsel %vm410_vm2, -1e+09, %v396_v7 }
  0xde   : > { %v693_v9 = vpop.f32.mrf.mxu0  ;;  %v414_v10 = vsel %vm413_vm3, %v411_v8, -inf }
  0xdf   : > { %415 = vmax.xlane.f32.xlu0 %v414_v10 }
  0xe0   : > { %v399_v11 = vpop.f32.mrf.mxu0 }
  0xe2   : > { %v694_v12 = vpop.f32.mrf.mxu0 }
 0x168   : > { %v416_v15 = vpop.xlane.xlu0 %415 }
 0x169   : > { %v417_v16 = vmax.f32 %v412_v14, %v416_v15 }
 0x16b   : > { %v418_v17 = vsub.f32 %v412_v14, %v417_v16  ;;  %495 = vst.msk [vmem:[#allocation2] sm:$0xff] %vm349_vm1, %v417_v16  ;;  %423 = vperm.xlu0 %746, %v417_v16  }
 0x16d   : > { %v419_v24 = vmul.f32 1.442695, %v418_v17 }
 0x1e6   : > { %v424_v20 = vpop.permute.xlu0 %423 }
 0x1e7   : > { %v426_v21 = vsub.f32 %v411_v8, %v424_v20 }
 0x1e9   : > { %v427_v22 = vmul.f32 1.442695, %v426_v21 }
 0x1eb   : > { %748 = vpow2.f32 %v427_v22 }
 0x1ec   : > { %750 = vpow2.f32 %v419_v24 }
 0x1f8   : > { %v749_v23 = vpop.eup %748 }
 0x1f9   : > { %v431_v25 = vsel %vm413_vm3, %v749_v23, 0.0  ;;  %v444_v26 = vpack.c.bf16 %v749_v23, %v749_v23  ;;  %v751_v27 = vpop.eup %750 }
 0x1fa   : > { %432 = vadd.xlane.f32.xlu1 %v431_v25  ;;  %v430_v29 = vmul.f32 %v751_v27, %v429_v28 }
 0x1fb   : > { %698 = vmatmul.mubr.msk.bf16.vlgmr.msra.gmra.mxu1 %vm413_vm3, %v444_v26 }
 0x20b   : > { %440 = vperm.xlu1 %747, %v751_v27  }
 0x283   : > { %v433_v30 = vpop.xlane.xlu1 %432 }
 0x284   : > { %v434_v31 = vadd.f32 %v433_v30, %v430_v29 }
 0x286   : > { %436 = vst.msk [vmem:[#allocation3] sm:$0xff] %vm349_vm1, %v434_v31 }
 0x287   : > { %v441_v38 = vpop.permute.xlu1 %440 }
 0x288   : > { %v443_v39 = vmul.f32 0.0, %v441_v38 }
 0x28d   : > { %v499_v32 = vld [vmem:[#allocation3] sm:$0xff] }
 0x28e   : > { %752 = vrcp.f32 %v499_v32 }
 0x29b   : > { %v753_v33 = vpop.eup %752 }
 0x29c   : > { %504 = vperm.xlu1 %747, %v753_v33  }
 0x2bb   : > { %v487_v34 = vpop.f32.mrf.mxu1 }
 0x2bc   : > { %v493_v40 = vadd.f32 %v487_v34, %v443_v39 }
 0x2bd   : > { %v699_v35 = vpop.f32.mrf.mxu1 }
 0x2bf   : > { %v490_v36 = vpop.f32.mrf.mxu1 }
 0x2c1   : > { %v700_v37 = vpop.f32.mrf.mxu1 }
 0x317   : > { %v505_v41 = vpop.permute.xlu1 %504 }
 0x318   : > { %v507_v42 = vmul.f32 %v505_v41, %v493_v40 }
 0x31a   : > { %v508_v43 = vpack.c.bf16 %v507_v42, %v507_v42 }
 0x31c   : > { %509 = vst [vmem:[%s343_s23] sm:$0xf] %v508_v43 }
 0x31d PF: > { %s13_s16 = sadd.s32 1, %s792_s16   ;;  %s903_s12 = smov %s784_s14 }
 0x31e   : > { %p10_p10 = scmp.ge.s32.totalorder %s13_s16, 10   ;;  %s904_s13 = smov %s788_s15 }
 0x31f   : > { %s905_s14 = smov %s908_s17  ;;  %s906_s15 = smov %s912_s18 }
 0x320   :  { %12 = sbr.rel (!%p10_p10) target bundleno = 3 (0x3), region = 80 }

// kernel: gpt_forward.42
= control target key start
LH: loop header
LB: loop body
LE: loop exit
PB: predicated region body
PF: predicated region fallthrough
CT: control target
= control target key end

     0   :  { %v418_v38 = vlaneseq  ;;  %s777_s1 = inlined_call_operand.vmem [shape: bf16[512,128], index: 1, kind: input, shape index: {}]   ;;  %s778_s0 = inlined_call_operand.vmem [shape: bf16[16,512], index: 0, kind: input, shape index: {}]   ;;  %s779_s3 = inlined_call_operand.vmem [shape: bf16[16,128], index: 3, kind: input, shape index: {}]   ;;  %s780_s2 = inlined_call_operand.vmem [shape: f32[1,128], index: 2, kind: input, shape index: {}]   ;;  %s781_s4 = inlined_call_operand.vmem [shape: f32[1,128], index: 4, kind: input, shape index: {}]   ;;  %s782_s5 = inlined_call_operand.vmem [shape: f32[1,128], index: 5, kind: input, shape index: {}]   ;;  %s783_s6 = inlined_call_operand.vmem [shape: bf16[16,128], index: 6, kind: output, shape index: {}]  }
   0x1   :  { %v577_v0 = vld [vmem:[%s777_s1 + $0x78] sm:$0xff]   ;;  %v581_v4 = vld [vmem:[%s777_s1 + $0x70] sm:$0xff]   ;;  %v585_v8 = vld [vmem:[%s777_s1 + $0x68] sm:$0xff]  }
   0x2   :  { %v578_v1 = vld [vmem:[%s777_s1 + $0xf8] sm:$0xff]   ;;  %533 = vmatprep.subr.bf16.mxu0 %v577_v0  ;;  %v582_v5 = vld [vmem:[%s777_s1 + $0xf0] sm:$0xff]   ;;  %v586_v9 = vld [vmem:[%s777_s1 + $0xe8] sm:$0xff]   ;;  %v419_v47 = vand.u32 127, %v418_v38 }
   0x3   :  { %v579_v2 = vld [vmem:[%s777_s1 + $0x38] sm:$0xff]   ;;  %555 = vmatprep.subr.bf16.mxu1 %v578_v1  ;;  %v583_v6 = vld [vmem:[%s777_s1 + $0x30] sm:$0xff]   ;;  %v587_v10 = vld [vmem:[%s777_s1 + $0x28] sm:$0xff]  }
   0x4   :  { %v580_v3 = vld [vmem:[%s777_s1 + $0xb8] sm:$0xff]   ;;  %534 = vmatpush3.bf16.msra.mxu0 %v579_v2  ;;  %v584_v7 = vld [vmem:[%s777_s1 + $0xb0] sm:$0xff]   ;;  %v588_v11 = vld [vmem:[%s777_s1 + $0xa8] sm:$0xff]   ;;  %vm420_vm0 = vcmp.lt.s32.totalorder %v419_v47, 32 }
   0x5   :  { %556 = vmatpush3.bf16.msra.mxu1 %v580_v3  ;;  %535 = vmatprep.subr.bf16.mxu0 %v581_v4  ;;  %v589_v12 = vld [vmem:[%s777_s1 + $0x60] sm:$0xff]   ;;  %v593_v16 = vld [vmem:[%s777_s1 + $0x58] sm:$0xff]   ;;  %v597_v20 = vld [vmem:[%s777_s1 + $0x50] sm:$0xff]  }
   0x6   :  { %557 = vmatprep.subr.bf16.mxu1 %v582_v5  ;;  %v590_v13 = vld [vmem:[%s777_s1 + $0xe0] sm:$0xff]   ;;  %v594_v17 = vld [vmem:[%s777_s1 + $0xd8] sm:$0xff]   ;;  %v598_v21 = vld [vmem:[%s777_s1 + $0xd0] sm:$0xff]  }
   0x7   :  { %v591_v14 = vld [vmem:[%s777_s1 + $0x20] sm:$0xff]   ;;  %v595_v18 = vld [vmem:[%s777_s1 + $0x18] sm:$0xff]   ;;  %v599_v22 = vld [vmem:[%s777_s1 + $0x10] sm:$0xff]  }
   0x8   :  { %536 = vmatpush3.bf16.msra.mxu0 %v583_v6  ;;  %v592_v15 = vld [vmem:[%s777_s1 + $0xa0] sm:$0xff]   ;;  %v596_v19 = vld [vmem:[%s777_s1 + $0x98] sm:$0xff]   ;;  %v600_v23 = vld [vmem:[%s777_s1 + $0x90] sm:$0xff]  }
   0x9   :  { %558 = vmatpush3.bf16.msra.mxu1 %v584_v7  ;;  %537 = vmatprep.subr.bf16.mxu0 %v585_v8  ;;  %v601_v24 = vld [vmem:[%s777_s1 + $0x48] sm:$0xff]   ;;  %v605_v28 = vld [vmem:[%s777_s1 + $0x40] sm:$0xff]  }
   0xa   :  { %559 = vmatprep.subr.bf16.mxu1 %v586_v9  ;;  %v602_v25 = vld [vmem:[%s777_s1 + $0xc8] sm:$0xff]   ;;  %v606_v29 = vld [vmem:[%s777_s1 + $0xc0] sm:$0xff]  }
   0xb   :  { %v603_v26 = vld [vmem:[%s777_s1 + $0x8] sm:$0xff]   ;;  %v607_v30 = vld [vmem:[%s777_s1] sm:$0xff]  }
   0xc   :  { %538 = vmatpush3.bf16.msra.mxu0 %v587_v10  ;;  %v604_v27 = vld [vmem:[%s777_s1 + $0x88] sm:$0xff]   ;;  %v608_v31 = vld [vmem:[%s777_s1 + $0x80] sm:$0xff]  }
   0xd   :  { %560 = vmatpush3.bf16.msra.mxu1 %v588_v11  ;;  %539 = vmatprep.subr.bf16.mxu0 %v589_v12  ;;  %v609_v32 = vld [vmem:[%s778_s0] ss:$16 sps:$4 sm:$0xff]   ;;  %v611_v33 = vld [vmem:[%s778_s0 + $0x4] ss:$16 sps:$4 sm:$0xff]   ;;  %v612_v34 = vld [vmem:[%s778_s0 + $0x8] ss:$16 sps:$4 sm:$0xff]  }
   0xe   :  { %561 = vmatprep.subr.bf16.mxu1 %v590_v13  ;;  %v614_v35 = vld [vmem:[%s778_s0 + $0xc] ss:$16 sps:$4 sm:$0xff]   ;;  %344 = vmatprep.mubr.bf16.mxu0 %v611_v33  ;;  %v525_v42 = vld [vmem:[%s779_s3] sm:$0xff]  }
   0xf   :  { %385 = vmatprep.mubr.bf16.mxu1 %v614_v35  ;;  %v517_v46 = vld [vmem:[%s780_s2] ss:$0 sm:$0xff]  ;;  %v526_v50 = vunpack.c.l.bf16 %v525_v42  ;;  %v527_v57 = vunpack.c.h.bf16 %v525_v42 }
  0x10   :  { %540 = vmatpush3.bf16.msra.mxu0 %v591_v14 }
  0x11   :  { %562 = vmatpush3.bf16.msra.mxu1 %v592_v15  ;;  %541 = vmatprep.subr.bf16.mxu0 %v593_v16 }
  0x12   :  { %563 = vmatprep.subr.bf16.mxu1 %v594_v17  ;;  %v518_v17 = vld [vmem:[%s781_s4] ss:$0 sm:$0xff] }
  0x14   :  { %542 = vmatpush3.bf16.msra.mxu0 %v595_v18 }
  0x15   :  { %564 = vmatpush3.bf16.msra.mxu1 %v596_v19  ;;  %543 = vmatprep.subr.bf16.mxu0 %v597_v20 }
  0x16   :  { %565 = vmatprep.subr.bf16.mxu1 %v598_v21 }
  0x18   :  { %544 = vmatpush3.bf16.msra.mxu0 %v599_v22  ;;  %v519_v22 = vld [vmem:[%s782_s5] ss:$0 sm:$0xff] }
  0x19   :  { %566 = vmatpush3.bf16.msra.mxu1 %v600_v23  ;;  %545 = vmatprep.subr.bf16.mxu0 %v601_v24 }
  0x1a   :  { %567 = vmatprep.subr.bf16.mxu1 %v602_v25 }
  0x1c   :  { %546 = vmatpush3.bf16.msra.mxu0 %v603_v26 }
  0x1d   :  { %568 = vmatpush3.bf16.msra.mxu1 %v604_v27  ;;  %547 = vmatprep.subr.bf16.mxu0 %v605_v28 }
  0x1e   :  { %569 = vmatprep.subr.bf16.mxu1 %v606_v29 }
  0x20   :  { %548 = vmatpush3.bf16.msra.mxu0 %v607_v30 }
  0x21   :  { %570 = vmatpush3.bf16.msra.mxu1 %v608_v31 }
  0x23   :  { %345 = vmatmul.mubr.bf16.vlgmr.msra.gmra.mxu0 %v609_v32 }
  0x24   :  { %386 = vmatmul.mubr.bf16.vlgmr.msra.gmra.mxu1 %v612_v34 }
  0xe3   :  { %v549_v36 = vpop.f32.mrf.mxu0 }
  0xe4   :  { %v571_v37 = vpop.f32.mrf.mxu1 }
  0xe5   :  { %v550_v39 = vpop.f32.mrf.mxu0 }
  0xe6   :  { %v551_v40 = vadd.f32 %v550_v39, %v549_v36  ;;  %v572_v41 = vpop.f32.mrf.mxu1 }
  0xe7   :  { %v573_v43 = vadd.f32 %v572_v41, %v571_v37  ;;  %v552_v44 = vpop.f32.mrf.mxu0 }
  0xe8   :  { %v574_v45 = vpop.f32.mrf.mxu1 }
  0xe9   :  { %v388_v48 = vadd.f32 %v573_v43, %v551_v40  ;;  %v553_v49 = vpop.f32.mrf.mxu0 }
  0xea   :  { %v554_v51 = vadd.f32 %v553_v49, %v552_v44  ;;  %v575_v52 = vpop.f32.mrf.mxu1 }
  0xeb   :  { %v576_v53 = vadd.f32 %v575_v52, %v574_v45  ;;  %v410_v54 = vadd.f32 %v517_v46, %v388_v48 }
  0xed   :  { %v391_v55 = vadd.f32 %v576_v53, %v554_v51  ;;  %v416_v56 = vadd.f32 %v526_v50, %v410_v54 }
  0xef   :  { %v421_v58 = vsel %vm420_vm0, %v416_v56, 0.0  ;;  %v411_v59 = vadd.f32 %v517_v46, %v391_v55 }
  0xf0   :  { %423 = vadd.xlane.f32.xlu0 %v421_v58  ;;  %v427_v60 = vmul.f32 %v421_v58, %v421_v58 }
  0xf1   :  { %v417_v61 = vadd.f32 %v527_v57, %v411_v59 }
  0xf2   :  { %429 = vadd.xlane.f32.xlu1 %v427_v60 }
  0xf3   :  { %v422_v62 = vsel %vm420_vm0, %v417_v61, 0.0 }
  0xf4   :  { %425 = vadd.xlane.f32.xlu0 %v422_v62  ;;  %v428_v63 = vmul.f32 %v422_v62, %v422_v62 }
  0xf6   :  { %431 = vadd.xlane.f32.xlu1 %v428_v63 }
 0x179   :  { %v424_v0 = vpop.xlane.xlu0 %423 }
 0x17a   :  { %v433_v1 = vmul.f32 0.03125, %v424_v0 }
 0x17b   :  { %v430_v2 = vpop.xlane.xlu1 %429 }
 0x17c   :  { %v437_v3 = vmul.f32 %v433_v1, %v433_v1  ;;  %v435_v4 = vmul.f32 0.03125, %v430_v2  ;;  %v441_v14 = vsub.f32 %v416_v56, %v433_v1 }
 0x17d   :  { %v426_v5 = vpop.xlane.xlu0 %425 }
 0x17e   :  { %v439_v6 = vsub.f32 %v435_v4, %v437_v3  ;;  %v434_v7 = vmul.f32 0.03125, %v426_v5 }
 0x17f   :  { %v432_v8 = vpop.xlane.xlu1 %431 }
 0x180   :  { %v443_v9 = vadd.f32 1e-05, %v439_v6  ;;  %v438_v10 = vmul.f32 %v434_v7, %v434_v7  ;;  %v436_v11 = vmul.f32 0.03125, %v432_v8  ;;  %v442_v18 = vsub.f32 %v417_v61, %v434_v7 }
 0x182   :  { %615 = vrsqrt.f32 %v443_v9  ;;  %v440_v12 = vsub.f32 %v436_v11, %v438_v10 }
 0x184   :  { %v444_v13 = vadd.f32 1e-05, %v440_v12 }
 0x186   :  { %617 = vrsqrt.f32 %v444_v13 }
 0x18f   :  { %v616_v15 = vpop.eup %615 }
 0x190   :  { %v447_v16 = vmul.f32 %v616_v15, %v441_v14 }
 0x192   :  { %v456_v20 = vmul.f32 %v518_v17, %v447_v16 }
 0x193   :  { %v618_v19 = vpop.eup %617 }
 0x194   :  { %v448_v21 = vmul.f32 %v618_v19, %v442_v18  ;;  %v465_v24 = vadd.f32 %v519_v22, %v456_v20 }
 0x196   :  { %v457_v23 = vmul.f32 %v518_v17, %v448_v21 }
 0x198   :  { %v466_v25 = vadd.f32 %v519_v22, %v457_v23 }
 0x19a   :  { %v531_v26 = vpack.c.bf16 %v466_v25, %v465_v24 }
 0x19c   :  { %532 = vst [vmem:[%s783_s6] sm:$0xff] %v531_v26  }

// kernel: gpt_forward.40
= control target key start
LH: loop header
LB: loop body
LE: loop exit
PB: predicated region body
PF: predicated region fallthrough
CT: control target
= control target key end

     0   :  { %8 = vsyncpa [#allocation4], 0  ;;  %s1487_s0 = inlined_call_operand.vmem [shape: bf16[16,128], index: 0, kind: input, shape index: {}]   ;;  %s1488_s1 = inlined_call_operand.hbm [shape: bf16[128,1536], index: 1, kind: input, shape index: {}]   ;;  %s1489_s2 = inlined_call_operand.vmem [shape: f32[1,1536], index: 2, kind: input, shape index: {}]   ;;  %s1490_s3 = inlined_call_operand.vmem [shape: bf16[16,1536], index: 3, kind: output, shape index: {}]  }
   0x1   :  { %10 = vsyncpa [#allocation4 + $0x1], 0  ;;  %s1305_s12 = smov 0   ;;  %s1307_s13 = smov 0  }
   0x2   :  { %s1309_s14 = smov 0   ;;  %s1311_s15 = smov 0  }
   0x3   :  { %s1313_s16 = smov 0   ;;  %s1315_s17 = smov 0  }
   0x4 LB: > { %s992_s18 = sadd.s32 4294967295, %s1278_s17   ;;  %s31_s19 = sadd.s32 1, %s1274_s16  ;;  %s1278_s17 = sphi %s1315_s17, %s16_s17   ;;  %s1274_s16 = sphi %s1313_s16, %s1499_s16   ;;  %s1270_s15 = sphi %s1311_s15, %s1498_s15   ;;  %s1266_s14 = sphi %s1309_s14, %s1497_s14   ;;  %s1262_s13 = sphi %s1307_s13, %s1496_s13   ;;  %s1258_s12 = sphi %s1305_s12, %s1495_s12  }
   0x5   : > { %p33_p0 = scmp.ge.s32.totalorder %s31_s19, 2  ;;  %s72_s20 = sadd.s32 1, %s1266_s14 }
   0x6   : > { %p79_p1 = scmp.ne.s32.totalorder %s1266_s14, %s1262_s13  ;;  %p80_p2 = scmp.eq.s32.totalorder %s1278_s17, 0 }
   0x7   : > { %s1501_s19 = smov (%p33_p0, %s31_s19), 0  ;;  %p85_p4 = scmp.ne.s32.totalorder %s1262_s13, %s1258_s12 }
   0x8   : > { %p1341_p3 = por %p80_p2, %p79_p1  ;;  %s68_s22 = ssub.s32 %s1274_s16, %s1501_s19 }
   0x9   : > { %p86_p5 = scmp.eq.s32.totalorder %s992_s18, 0  ;;  %p70_p6 = scmp.eq.s32.totalorder %s68_s22, 0 }
   0xa   : > { %p137_p7 = scmp.eq.s32.totalorder %s992_s18, 1  ;;  %p1074_p10 = scmp.lt.s32.totalorder %s1278_s17, 2 }
   0xb   : > { %p1348_p8 = por %p86_p5, %p85_p4  ;;  %s175_s26 = sand.u32 1, %s1266_s14  }
   0xc   : > { %s1353_s24 = scalar_select %p70_p6, %s1266_s14, %s72_s20  }
   0xd   : > { %p1355_p9 = por %p137_p7, %p79_p1  ;;  %s1057_s27 = smul.u32 384, %s1274_s16 }
   0xe   : > { %s1065_s28 = smul.u32 384, %s175_s26  ;;  %p1367_p11 = pnand %p1074_p10, %p1341_p3 }
   0xf   : > { %s188_s4 = scalar_lea.hbm %s1488_s1, %s1057_s27  ;;  %p998_p12 = scmp.ge.s32.totalorder %s1278_s17, 1 }
  0x10   : > { %s179_s6 = scalar_lea.vmem [#allocation3], %s1065_s28  ;;  %s176_s8 = scalar_lea.sflag [#allocation4], %s175_s26 }
  0x11   : > { %s189_s7 = sshll.u32 %s179_s6, 4  ;;  %p1202_p13 = pneg %p1367_p11  ;;  %s190_s7 = int_to_ptr.vmem [resolvable:$true] %s189_s7 }
  0x12   : > { %s1213_s9 = scalar_lea.vmem %s190_s7, 6144  ;;  %s1280_s10 = smov [#allocation3]  }
  0x13   : > { %p1214_p0 = scmp.ne.s32.totalorder %s190_s7, %s1213_s9  ;;  %s1218_s11 = sshll.u32 %s1280_s10, 4  ;;  %s1219_s11 = int_to_ptr.vmem [resolvable:$false] %s1218_s11 }
  0x14   : > { %s1220_s12 = scalar_lea.vmem %s1219_s11, 12288  ;;  %p1221_p3 = scmp.lt.s32.totalorder %s190_s7, %s1219_s11 }
  0x15   : > { %p1216_p1 = pnand %p1214_p0, %p1202_p13  ;;  %p1222_p4 = scmp.lt.s32.totalorder %s1220_s12, %s1213_s9 }
  0x17   : > { %p1217_p2 = pneg %p1216_p1  ;;  %p1223_p5 = por %p1222_p4, %p1221_p3 }
  0x19   : > { %p1224_p6 = pnand %p1223_p5, %p1217_p2 }
  0x1b   : > { %1227 = shalt.err (!%p1224_p6)
}
  0x1c   : > { %s1281_s18 = smov 768   ;;  %s1282_s20 = smov 384  }
  0x1d   : > { %s1283_s21 = smov 24   ;;  %p205_p7 = scmp.lt.s32.totalorder %s1278_s17, 3 }
  0x1e   : > { %1073 = dma.hbm_to_vmem [thread:$0]  (!%p1367_p11), %s188_s4, 6144, %s190_s7, %s176_s8, %s1281_s18, %s1282_s20, %s1283_s21  }
  0x1f   : > { %p206_p10 = pnand %p998_p12, %p205_p7 }
  0x20   : > { %s1380_s22 = sand.u32 (!%p206_p10), 1, %s1262_s13  }
  0x21   : > { %209 = sbr.rel (%p206_p10) target bundleno = 317 (0x13d), region = 32  ;;  %s212_s27 = scalar_lea.sflag (!%p206_p10), [#allocation4], %s1380_s22 }
  0x22   : > { %s1066_s26 = smul.u32 (!%p206_p10), 384, %s1380_s22 }
  0x24   : > { %s1384_s28 = scalar_lea.vmem (!%p206_p10), [#allocation3], %s1066_s26 }
  0x26   : > { %1253 = dma.done.wait (%p1348_p8), %s212_s27, 6144  }
  0x27   : > { %1255 = vsyncadd (%p1348_p8), %s212_s27, 4294961152  ;;  %v1284_v0 = vmov 0   ;;  %v1127_v1 = vld [vmem:[%s1384_s28 + $0x154] ss:$24 sps:$4 sm:$0xff]   ;;  %v1129_v2 = vld [vmem:[%s1384_s28 + $0x150] ss:$24 sps:$4 sm:$0xff]   ;;  %v762_v50 = vlaneseq }
  0x28   : > { %624 = vmatprep.mubr.bf16.mxu0 %v1284_v0  ;;  %667 = vmatprep.mubr.bf16.mxu1 %v1284_v0  ;;  %v1130_v3 = vld [vmem:[%s1384_s28 + $0x124] ss:$24 sps:$4 sm:$0xff]   ;;  %v1132_v4 = vld [vmem:[%s1384_s28 + $0x120] ss:$24 sps:$4 sm:$0xff]   ;;  %v1133_v5 = vld [vmem:[%s1384_s28 + $0xf4] ss:$24 sps:$4 sm:$0xff]  }
  0x29   : > { %592 = vmatprep.subr.bf16.mxu0 %v1127_v1  ;;  %v1135_v6 = vld [vmem:[%s1384_s28 + $0xf0] ss:$24 sps:$4 sm:$0xff]   ;;  %v1136_v7 = vld [vmem:[%s1384_s28 + $0xc4] ss:$24 sps:$4 sm:$0xff]   ;;  %v1138_v10 = vld [vmem:[%s1384_s28 + $0xc0] ss:$24 sps:$4 sm:$0xff]  }
  0x2a   : > { %593 = vmatpush1.bf16.msra.mxu0 %v1129_v2  ;;  %v1148_v8 = vld [vmem:[%s1384_s28 + $0x15c] ss:$24 sps:$4 sm:$0xff]   ;;  %v1150_v9 = vld [vmem:[%s1384_s28 + $0x158] ss:$24 sps:$4 sm:$0xff]   ;;  %v1154_v12 = vld [vmem:[%s1384_s28 + $0x12c] ss:$24 sps:$4 sm:$0xff]  }
  0x2b   : > { %594 = vmatprep.subr.bf16.mxu0 %v1130_v3  ;;  %v1139_v11 = vld [vmem:[%s1384_s28 + $0x94] ss:$24 sps:$4 sm:$0xff]   ;;  %635 = vmatprep.subr.bf16.mxu1 %v1148_v8  ;;  %v1156_v13 = vld [vmem:[%s1384_s28 + $0x128] ss:$24 sps:$4 sm:$0xff]   ;;  %v1142_v15 = vld [vmem:[%s1384_s28 + $0x64] ss:$24 sps:$4 sm:$0xff]  }
  0x2c   : > { %636 = vmatpush1.bf16.msra.mxu1 %v1150_v9  ;;  %v1141_v14 = vld [vmem:[%s1384_s28 + $0x90] ss:$24 sps:$4 sm:$0xff]   ;;  %v1161_v16 = vld [vmem:[%s1384_s28 + $0xfc] ss:$24 sps:$4 sm:$0xff]   ;;  %v1144_v18 = vld [vmem:[%s1384_s28 + $0x60] ss:$24 sps:$4 sm:$0xff]  }
  0x2d   : > { %637 = vmatprep.subr.bf16.mxu1 %v1154_v12  ;;  %v1163_v17 = vld [vmem:[%s1384_s28 + $0xf8] ss:$24 sps:$4 sm:$0xff]   ;;  %v1167_v19 = vld [vmem:[%s1384_s28 + $0xcc] ss:$24 sps:$4 sm:$0xff]   ;;  %v1169_v21 = vld [vmem:[%s1384_s28 + $0xc8] ss:$24 sps:$4 sm:$0xff]  }
  0x2e   : > { %595 = vmatpush1.bf16.msra.mxu0 %v1132_v4  ;;  %v1145_v20 = vld [vmem:[%s1384_s28 + $0x34] ss:$24 sps:$4 sm:$0xff]   ;;  %v1147_v23 = vld [vmem:[%s1384_s28 + $0x30] ss:$24 sps:$4 sm:$0xff]   ;;  %v1151_v24 = vld [vmem:[%s1384_s28 + $0x4] ss:$24 sps:$4 sm:$0xff]  }
  0x2f   : > { %596 = vmatprep.subr.bf16.mxu0 %v1133_v5  ;;  %v1173_v22 = vld [vmem:[%s1384_s28 + $0x9c] ss:$24 sps:$4 sm:$0xff]   ;;  %v1175_v25 = vld [vmem:[%s1384_s28 + $0x98] ss:$24 sps:$4 sm:$0xff]   ;;  %v1179_v26 = vld [vmem:[%s1384_s28 + $0x6c] ss:$24 sps:$4 sm:$0xff]  }
  0x30   : > { %638 = vmatpush1.bf16.msra.mxu1 %v1156_v13  ;;  %v1153_v27 = vld [vmem:[%s1384_s28] ss:$24 sps:$4 sm:$0xff]   ;;  %v1160_v29 = vld [vmem:[%s1384_s28 + $0x164] ss:$24 sps:$4 sm:$0xff]   ;;  %v1166_v33 = vld [vmem:[%s1384_s28 + $0x134] ss:$24 sps:$4 sm:$0xff]  }
  0x31   : > { %639 = vmatprep.subr.bf16.mxu1 %v1161_v16  ;;  %v1157_v28 = vld [vmem:[%s1487_s0] sm:$0xff]   ;;  %v1185_v31 = vld [vmem:[%s1384_s28 + $0x3c] ss:$24 sps:$4 sm:$0xff]   ;;  %v1187_v34 = vld [vmem:[%s1384_s28 + $0x38] ss:$24 sps:$4 sm:$0xff]   ;;  %s260_s30 = smul.u32 6, %s1270_s15 }
  0x32   : > { %597 = vmatpush1.bf16.msra.mxu0 %v1135_v6  ;;  %v1181_v30 = vld [vmem:[%s1384_s28 + $0x68] ss:$24 sps:$4 sm:$0xff]   ;;  %v1191_v35 = vld [vmem:[%s1384_s28 + $0xc] ss:$24 sps:$4 sm:$0xff]   ;;  %v763_v51 = vshrl.u32 %v762_v50, 7  ;;  %s1067_s7 = smul.u32 48, %s1380_s22 }
  0x33   : > { %598 = vmatprep.subr.bf16.mxu0 %v1136_v7  ;;  %v1158_v32 = vld [vmem:[%s1384_s28 + $0x160] ss:$24 sps:$4 sm:$0xff]   ;;  %v1164_v36 = vld [vmem:[%s1384_s28 + $0x130] ss:$24 sps:$4 sm:$0xff]   ;;  %v1172_v37 = vld [vmem:[%s1384_s28 + $0x104] ss:$24 sps:$4 sm:$0xff]  }
  0x34   : > { %640 = vmatpush1.bf16.msra.mxu1 %v1163_v17  ;;  %v1193_v38 = vld [vmem:[%s1384_s28 + $0x8] ss:$24 sps:$4 sm:$0xff]   ;;  %v1178_v40 = vld [vmem:[%s1384_s28 + $0xd4] ss:$24 sps:$4 sm:$0xff]   ;;  %v1184_v42 = vld [vmem:[%s1384_s28 + $0xa4] ss:$24 sps:$4 sm:$0xff]  }
  0x35   : > { %641 = vmatprep.subr.bf16.mxu1 %v1167_v19  ;;  %v1170_v39 = vld [vmem:[%s1384_s28 + $0x100] ss:$24 sps:$4 sm:$0xff]   ;;  %v1176_v41 = vld [vmem:[%s1384_s28 + $0xd0] ss:$24 sps:$4 sm:$0xff]   ;;  %v1190_v44 = vld [vmem:[%s1384_s28 + $0x74] ss:$24 sps:$4 sm:$0xff]  }
  0x36   : > { %599 = vmatpush1.bf16.msra.mxu0 %v1138_v10  ;;  %v1182_v43 = vld [vmem:[%s1384_s28 + $0xa0] ss:$24 sps:$4 sm:$0xff]   ;;  %v1188_v45 = vld [vmem:[%s1384_s28 + $0x70] ss:$24 sps:$4 sm:$0xff]   ;;  %v1196_v46 = vld [vmem:[%s1384_s28 + $0x44] ss:$24 sps:$4 sm:$0xff]  }
  0x37   : > { %600 = vmatprep.subr.bf16.mxu0 %v1139_v11  ;;  %v1194_v47 = vld [vmem:[%s1384_s28 + $0x40] ss:$24 sps:$4 sm:$0xff]   ;;  %v1199_v48 = vld [vmem:[%s1384_s28 + $0x14] ss:$24 sps:$4 sm:$0xff]   ;;  %v1197_v49 = vld [vmem:[%s1384_s28 + $0x10] ss:$24 sps:$4 sm:$0xff]  }
  0x38   : > { %642 = vmatpush1.bf16.msra.mxu1 %v1169_v21  ;;  %p261_p8 = scmp.lt.s32.totalorder %s260_s30, 11  ;;  %v764_v52 = vsub.s32 0, %v763_v51  ;;  %v768_v54 = vsub.s32 1, %v763_v51  ;;  %v772_v61 = vsub.s32 2, %v763_v51  ;;  %s1449_s8 = scalar_lea.vmem [#allocation5], %s1067_s7  ;;  %v780_v17 = vsub.s32 4, %v763_v51 }
  0x39   : > { %643 = vmatprep.subr.bf16.mxu1 %v1173_v22  ;;  %s1064_s9 = smul.u32 (%p1355_p9), 24, %s1270_s15 }
  0x3a   : > { %601 = vmatpush1.bf16.msra.mxu0 %v1141_v14  ;;  %s1503_s30 = smov (!%p261_p8, %s260_s30), 11 }
  0x3b   : > { %602 = vmatprep.subr.bf16.mxu0 %v1142_v15  ;;  %s263_s6 = scalar_lea.vmem %s1489_s2, %s1503_s30  ;;  %s858_s12 = scalar_lea.vmem (%p1355_p9), %s1490_s3, %s1064_s9 }
  0x3c   : > { %644 = vmatpush1.bf16.msra.mxu1 %v1175_v25  ;;  %v760_v53 = vld [vmem:[%s263_s6] sm:$0x3f] }
  0x3d   : > { %645 = vmatprep.subr.bf16.mxu1 %v1179_v26  ;;  %v765_v55 = vrot.slane %v760_v53, %v764_v52  ;;  %v769_v56 = vrot.slane %v760_v53, %v768_v54  ;;  %v773_v4 = vrot.slane %v760_v53, %v772_v61  ;;  %v781_v19 = vrot.slane %v760_v53, %v780_v17 }
  0x3e   : > { %603 = vmatpush1.bf16.msra.mxu0 %v1144_v18  ;;  %v784_v18 = vsub.s32 5, %v763_v51 }
  0x3f   : > { %604 = vmatprep.subr.bf16.mxu0 %v1145_v20 }
  0x40   : > { %646 = vmatpush1.bf16.msra.mxu1 %v1181_v30  ;;  %v785_v20 = vrot.slane %v760_v53, %v784_v18 }
  0x41   : > { %647 = vmatprep.subr.bf16.mxu1 %v1185_v31 }
  0x42   : > { %605 = vmatpush1.bf16.msra.mxu0 %v1147_v23 }
  0x43   : > { %606 = vmatprep.subr.bf16.mxu0 %v1151_v24 }
  0x44   : > { %648 = vmatpush1.bf16.msra.mxu1 %v1187_v34 }
  0x45   : > { %649 = vmatprep.subr.bf16.mxu1 %v1191_v35 }
  0x46   : > { %607 = vmatpush1.bf16.msra.mxu0 %v1153_v27 }
  0x47   : > { %678 = vmatprep.subr.bf16.mxu0 %v1160_v29 }
  0x48   : > { %650 = vmatpush1.bf16.msra.mxu1 %v1193_v38 }
  0x49   : > { %625 = vmatmul.mubr.bf16.vlgmr.msra.gmra.mxu0 %v1157_v28 }
  0x4a   : > { %679 = vmatpush1.bf16.msra.mxu0 %v1158_v32  ;;  %710 = vmatprep.mubr.bf16.mxu0 %v1284_v0  ;;  %v776_v0 = vsub.s32 3, %v763_v51 }
  0x4b   : > { %680 = vmatprep.subr.bf16.mxu0 %v1166_v33  ;;  %668 = vmatmul.mubr.bf16.vlgmr.msra.gmra.mxu1 %v1157_v28 }
  0x4c   : > { %v777_v6 = vrot.slane %v760_v53, %v776_v0 }
  0x4e   : > { %681 = vmatpush1.bf16.msra.mxu0 %v1164_v36 }
  0x4f   : > { %682 = vmatprep.subr.bf16.mxu0 %v1172_v37 }
  0x52   : > { %683 = vmatpush1.bf16.msra.mxu0 %v1170_v39 }
  0x53   : > { %684 = vmatprep.subr.bf16.mxu0 %v1178_v40 }
  0x56   : > { %685 = vmatpush1.bf16.msra.mxu0 %v1176_v41 }
  0x57   : > { %686 = vmatprep.subr.bf16.mxu0 %v1184_v42 }
  0x5a   : > { %687 = vmatpush1.bf16.msra.mxu0 %v1182_v43 }
  0x5b   : > { %688 = vmatprep.subr.bf16.mxu0 %v1190_v44 }
  0x5e   : > { %689 = vmatpush1.bf16.msra.mxu0 %v1188_v45 }
  0x5f   : > { %690 = vmatprep.subr.bf16.mxu0 %v1196_v46 }
  0x62   : > { %691 = vmatpush1.bf16.msra.mxu0 %v1194_v47 }
  0x63   : > { %692 = vmatprep.subr.bf16.mxu0 %v1199_v48 }
  0x66   : > { %693 = vmatpush1.bf16.msra.mxu0 %v1197_v49 }
  0x69   : > { %711 = vmatmul.mubr.bf16.vlgmr.msra.gmra.mxu0 %v1157_v28 }
 0x109   : > { %v626_v57 = vpop.f32.mrf.mxu0 }
 0x10a   : > { %v792_v58 = vadd.f32 %v765_v55, %v626_v57 }
 0x10b   : > { %v628_v59 = vpop.f32.mrf.mxu0  ;;  %v669_v7 = vpop.f32.mrf.mxu1 }
 0x10c   : > { %v793_v60 = vadd.f32 %v769_v56, %v628_v59  ;;  %v794_v8 = vadd.f32 %v773_v4, %v669_v7 }
 0x10d   : > { %v630_v62 = vpop.f32.mrf.mxu0  ;;  %v671_v9 = vpop.f32.mrf.mxu1 }
 0x10e   : > { %v1058_v63 = vpack.c.bf16 %v793_v60, %v792_v58  ;;  %v798_v2 = vadd.f32 %v765_v55, %v630_v62  ;;  %v795_v10 = vadd.f32 %v777_v6, %v671_v9 }
 0x10f   : > { %v632_v1 = vpop.f32.mrf.mxu0  ;;  %v673_v11 = vpop.f32.mrf.mxu1 }
 0x110   : > { %840 = vst [vmem:[%s1449_s8] sm:$0xff] %v1058_v63  ;;  %v799_v3 = vadd.f32 %v769_v56, %v632_v1  ;;  %v1059_v12 = vpack.c.bf16 %v795_v10, %v794_v8  ;;  %v800_v13 = vadd.f32 %v773_v4, %v673_v11 }
 0x111   : > { %v675_v14 = vpop.f32.mrf.mxu1 }
 0x112   : > { %v1061_v5 = vpack.c.bf16 %v799_v3, %v798_v2  ;;  %841 = vst [vmem:[%s1449_s8 + $0x8] sm:$0xff] %v1059_v12  ;;  %v801_v15 = vadd.f32 %v777_v6, %v675_v14 }
 0x114   : > { %843 = vst [vmem:[%s1449_s8 + $0x18] sm:$0xff] %v1061_v5  ;;  %v1062_v16 = vpack.c.bf16 %v801_v15, %v800_v13 }
 0x116   : > { %844 = vst [vmem:[%s1449_s8 + $0x20] sm:$0xff] %v1062_v16 }
 0x117   : > { %v871_v31 = vld [vmem:[%s1449_s8] sm:$0xff] (%p1355_p9) }
 0x118   : > { %872 = vst [vmem:[%s858_s12] sm:$0xff] (%p1355_p9), %v871_v31 }
 0x119   : > { %v873_v32 = vld [vmem:[%s1449_s8 + $0x8] sm:$0xff] (%p1355_p9) }
 0x11a   : > { %874 = vst [vmem:[%s858_s12 + $0x8] sm:$0xff] (%p1355_p9), %v873_v32 }
 0x11b   : > { %v877_v34 = vld [vmem:[%s1449_s8 + $0x18] sm:$0xff] (%p1355_p9) }
 0x11c   : > { %878 = vst [vmem:[%s858_s12 + $0x30] sm:$0xff] (%p1355_p9), %v877_v34 }
 0x11d   : > { %v879_v35 = vld [vmem:[%s1449_s8 + $0x20] sm:$0xff] (%p1355_p9) }
 0x11e   : > { %880 = vst [vmem:[%s858_s12 + $0x38] sm:$0xff] (%p1355_p9), %v879_v35 }
 0x129   : > { %v712_v21 = vpop.f32.mrf.mxu0 }
 0x12a   : > { %v796_v23 = vadd.f32 %v781_v19, %v712_v21 }
 0x12b   : > { %v714_v22 = vpop.f32.mrf.mxu0 }
 0x12c   : > { %v797_v24 = vadd.f32 %v785_v20, %v714_v22 }
 0x12d   : > { %v716_v25 = vpop.f32.mrf.mxu0 }
 0x12e   : > { %v1060_v26 = vpack.c.bf16 %v797_v24, %v796_v23  ;;  %v802_v28 = vadd.f32 %v781_v19, %v716_v25 }
 0x12f   : > { %v718_v27 = vpop.f32.mrf.mxu0 }
 0x130   : > { %842 = vst [vmem:[%s1449_s8 + $0x10] sm:$0xff] %v1060_v26  ;;  %v803_v29 = vadd.f32 %v785_v20, %v718_v27  ;;  %852 = sbr.rel (!%p1355_p9) target bundleno = 317 (0x13d), region = 48 }
 0x132   : > { %v1063_v30 = vpack.c.bf16 %v803_v29, %v802_v28 }
 0x134   : > { %845 = vst [vmem:[%s1449_s8 + $0x28] sm:$0xff] %v1063_v30 }
 0x137   : > { %v875_v33 = vld [vmem:[%s1449_s8 + $0x10] sm:$0xff] }
 0x138   : > { %876 = vst [vmem:[%s858_s12 + $0x10] sm:$0xff] %v875_v33 }
 0x13b   : > { %v881_v36 = vld [vmem:[%s1449_s8 + $0x28] sm:$0xff] }
 0x13c   : > { %882 = vst [vmem:[%s858_s12 + $0x40] sm:$0xff] %v881_v36 }
 0x13d PF: > { %s16_s17 = sadd.s32 1, %s1278_s17   ;;  %s1495_s12 = smov %s1262_s13 }
 0x13e   : > { %p13_p9 = scmp.ge.s32.totalorder %s16_s17, 4   ;;  %s1496_s13 = smov %s1266_s14 }
 0x13f   : > { %s1497_s14 = smov %s1353_s24  ;;  %s1498_s15 = smov %s1274_s16 }
 0x140   : > { %s1499_s16 = smov %s1501_s19  ;;  %15 = sbr.rel (!%p13_p9) target bundleno = 4 (0x4), region = 109 }
 0x145   :  { %898 = vsyncpa [#allocation4], 1 }
 0x146   :  { %900 = vsyncpa [#allocation4 + $0x1], 1 }

// kernel: gpt_forward.30
= control target key start
LH: loop header
LB: loop body
LE: loop exit
PB: predicated region body
PF: predicated region fallthrough
CT: control target
= control target key end

     0   :  { %s1332_s12 = smov 0   ;;  %s1334_s13 = smov 0   ;;  %s1582_s0 = inlined_call_operand.vmem [shape: bf16[16,128], index: 0, kind: input, shape index: {}]   ;;  %s1583_s1 = inlined_call_operand.vmem [shape: bf16[128,1536], index: 1, kind: input, shape index: {}]   ;;  %s1584_s2 = inlined_call_operand.vmem [shape: f32[1,1536], index: 2, kind: input, shape index: {}]   ;;  %s1585_s3 = inlined_call_operand.vmem [shape: bf16[16,1536], index: 3, kind: output, shape index: {}]  }
   0x1   :  { %s1336_s14 = smov 0   ;;  %s1338_s15 = smov 0  }
   0x2   :  { %s1340_s16 = smov 0  }
   0x3 LB: > { %s28_s17 = sadd.s32 1, %s1305_s15  ;;  %s1081_s18 = sadd.s32 4294967295, %s1309_s16   ;;  %s1309_s16 = sphi %s1340_s16, %s13_s16   ;;  %s1305_s15 = sphi %s1338_s15, %s1590_s15   ;;  %s1301_s14 = sphi %s1336_s14, %s1589_s14   ;;  %s1297_s13 = sphi %s1334_s13, %s1588_s13   ;;  %s1293_s12 = sphi %s1332_s12, %s1587_s12  }
   0x4   : > { %p30_p0 = scmp.ge.s32.totalorder %s28_s17, 2  ;;  %p76_p1 = scmp.ne.s32.totalorder %s1297_s13, %s1293_s12 }
   0x5   : > { %p77_p2 = scmp.eq.s32.totalorder %s1309_s16, 0  ;;  %p134_p4 = scmp.eq.s32.totalorder %s1081_s18, 1 }
   0x6   : > { %s1592_s17 = smov (%p30_p0, %s28_s17), 0  ;;  %s69_s20 = sadd.s32 1, %s1297_s13 }
   0x7   : > { %p78_p3 = por %p77_p2, %p76_p1  ;;  %s65_s19 = ssub.s32 %s1305_s15, %s1592_s17 }
   0x8   : > { %p67_p5 = scmp.eq.s32.totalorder %s65_s19, 0  ;;  %p1367_p6 = por %p134_p4, %p76_p1 }
   0x9   : > { %p1085_p7 = scmp.ge.s32.totalorder %s1309_s16, 2 }
   0xa   : > { %s1372_s22 = scalar_select %p67_p5, %s1297_s13, %s69_s20  }
   0xb   : > { %168 = sbr.rel (%p1085_p7) target bundleno = 45 (0x2d), region = 20 }
  0x10   : > { %171 = sbr.rel (!%p78_p3) target bundleno = 45 (0x2d), region = 24  ;;  %s173_s23 = sand.u32 (%p78_p3), 1, %s1297_s13  }
  0x11   : > { %s1146_s24 = smul.u32 (%p78_p3), 24, %s1305_s15 }
  0x12   : > { %s1154_s25 = smul.u32 (%p78_p3), 384, %s173_s23 }
  0x13   : > { %s1380_s28 = scalar_lea.vmem (%p78_p3), %s1583_s1, %s1146_s24 }
  0x14   : > { %v194_v0 = vld [vmem:[%s1380_s28] sm:$0xff] (%p78_p3)  ;;  %v196_v1 = vld [vmem:[%s1380_s28 + $0x8] sm:$0xff] (%p78_p3)  ;;  %v198_v2 = vld [vmem:[%s1380_s28 + $0x10] sm:$0xff] (%p78_p3)  ;;  %s1385_s29 = scalar_lea.vmem (%p78_p3), [#allocation3], %s1154_s25 }
  0x15   : > { %195 = vst [vmem:[%s1385_s29] sm:$0xff] %v194_v0  ;;  %197 = vst [vmem:[%s1385_s29 + $0x8] sm:$0xff] %v196_v1  ;;  %v200_v3 = vld [vmem:[%s1380_s28 + $0x30] sm:$0xff]  ;;  %v202_v4 = vld [vmem:[%s1380_s28 + $0x38] sm:$0xff] }
  0x16   : > { %199 = vst [vmem:[%s1385_s29 + $0x10] sm:$0xff] %v198_v2  ;;  %v204_v5 = vld [vmem:[%s1380_s28 + $0x40] sm:$0xff]  ;;  %201 = vst [vmem:[%s1385_s29 + $0x18] sm:$0xff] %v200_v3  ;;  %v208_v7 = vld [vmem:[%s1380_s28 + $0x68] sm:$0xff] }
  0x17   : > { %203 = vst [vmem:[%s1385_s29 + $0x20] sm:$0xff] %v202_v4  ;;  %205 = vst [vmem:[%s1385_s29 + $0x28] sm:$0xff] %v204_v5  ;;  %v206_v6 = vld [vmem:[%s1380_s28 + $0x60] sm:$0xff]  ;;  %v210_v8 = vld [vmem:[%s1380_s28 + $0x70] sm:$0xff] }
  0x18   : > { %207 = vst [vmem:[%s1385_s29 + $0x30] sm:$0xff] %v206_v6  ;;  %209 = vst [vmem:[%s1385_s29 + $0x38] sm:$0xff] %v208_v7  ;;  %v212_v9 = vld [vmem:[%s1380_s28 + $0x90] sm:$0xff]  ;;  %v214_v10 = vld [vmem:[%s1380_s28 + $0x98] sm:$0xff] }
  0x19   : > { %211 = vst [vmem:[%s1385_s29 + $0x40] sm:$0xff] %v210_v8  ;;  %v216_v11 = vld [vmem:[%s1380_s28 + $0xa0] sm:$0xff]  ;;  %213 = vst [vmem:[%s1385_s29 + $0x48] sm:$0xff] %v212_v9  ;;  %v220_v13 = vld [vmem:[%s1380_s28 + $0xc8] sm:$0xff] }
  0x1a   : > { %215 = vst [vmem:[%s1385_s29 + $0x50] sm:$0xff] %v214_v10  ;;  %217 = vst [vmem:[%s1385_s29 + $0x58] sm:$0xff] %v216_v11  ;;  %v218_v12 = vld [vmem:[%s1380_s28 + $0xc0] sm:$0xff]  ;;  %v222_v14 = vld [vmem:[%s1380_s28 + $0xd0] sm:$0xff] }
  0x1b   : > { %219 = vst [vmem:[%s1385_s29 + $0x60] sm:$0xff] %v218_v12  ;;  %221 = vst [vmem:[%s1385_s29 + $0x68] sm:$0xff] %v220_v13  ;;  %v224_v15 = vld [vmem:[%s1380_s28 + $0xf0] sm:$0xff]  ;;  %v226_v16 = vld [vmem:[%s1380_s28 + $0xf8] sm:$0xff] }
  0x1c   : > { %223 = vst [vmem:[%s1385_s29 + $0x70] sm:$0xff] %v222_v14  ;;  %v228_v17 = vld [vmem:[%s1380_s28 + $0x100] sm:$0xff]  ;;  %225 = vst [vmem:[%s1385_s29 + $0x78] sm:$0xff] %v224_v15  ;;  %v232_v19 = vld [vmem:[%s1380_s28 + $0x128] sm:$0xff] }
  0x1d   : > { %227 = vst [vmem:[%s1385_s29 + $0x80] sm:$0xff] %v226_v16  ;;  %229 = vst [vmem:[%s1385_s29 + $0x88] sm:$0xff] %v228_v17  ;;  %v230_v18 = vld [vmem:[%s1380_s28 + $0x120] sm:$0xff]  ;;  %v234_v20 = vld [vmem:[%s1380_s28 + $0x130] sm:$0xff] }
  0x1e   : > { %231 = vst [vmem:[%s1385_s29 + $0x90] sm:$0xff] %v230_v18  ;;  %233 = vst [vmem:[%s1385_s29 + $0x98] sm:$0xff] %v232_v19  ;;  %v236_v21 = vld [vmem:[%s1380_s28 + $0x150] sm:$0xff]  ;;  %v238_v22 = vld [vmem:[%s1380_s28 + $0x158] sm:$0xff] }
  0x1f   : > { %235 = vst [vmem:[%s1385_s29 + $0xa0] sm:$0xff] %v234_v20  ;;  %v240_v23 = vld [vmem:[%s1380_s28 + $0x160] sm:$0xff]  ;;  %237 = vst [vmem:[%s1385_s29 + $0xa8] sm:$0xff] %v236_v21  ;;  %v244_v25 = vld [vmem:[%s1380_s28 + $0x188] sm:$0xff] }
  0x20   : > { %239 = vst [vmem:[%s1385_s29 + $0xb0] sm:$0xff] %v238_v22  ;;  %241 = vst [vmem:[%s1385_s29 + $0xb8] sm:$0xff] %v240_v23  ;;  %v242_v24 = vld [vmem:[%s1380_s28 + $0x180] sm:$0xff]  ;;  %v246_v26 = vld [vmem:[%s1380_s28 + $0x190] sm:$0xff] }
  0x21   : > { %243 = vst [vmem:[%s1385_s29 + $0xc0] sm:$0xff] %v242_v24  ;;  %245 = vst [vmem:[%s1385_s29 + $0xc8] sm:$0xff] %v244_v25  ;;  %v248_v27 = vld [vmem:[%s1380_s28 + $0x1b0] sm:$0xff]  ;;  %v250_v28 = vld [vmem:[%s1380_s28 + $0x1b8] sm:$0xff] }
  0x22   : > { %247 = vst [vmem:[%s1385_s29 + $0xd0] sm:$0xff] %v246_v26  ;;  %v252_v29 = vld [vmem:[%s1380_s28 + $0x1c0] sm:$0xff]  ;;  %249 = vst [vmem:[%s1385_s29 + $0xd8] sm:$0xff] %v248_v27  ;;  %v256_v31 = vld [vmem:[%s1380_s28 + $0x1e8] sm:$0xff] }
  0x23   : > { %251 = vst [vmem:[%s1385_s29 + $0xe0] sm:$0xff] %v250_v28  ;;  %253 = vst [vmem:[%s1385_s29 + $0xe8] sm:$0xff] %v252_v29  ;;  %v254_v30 = vld [vmem:[%s1380_s28 + $0x1e0] sm:$0xff]  ;;  %v258_v32 = vld [vmem:[%s1380_s28 + $0x1f0] sm:$0xff] }
  0x24   : > { %255 = vst [vmem:[%s1385_s29 + $0xf0] sm:$0xff] %v254_v30  ;;  %257 = vst [vmem:[%s1385_s29 + $0xf8] sm:$0xff] %v256_v31  ;;  %v260_v33 = vld [vmem:[%s1380_s28 + $0x210] sm:$0xff]  ;;  %v262_v34 = vld [vmem:[%s1380_s28 + $0x218] sm:$0xff] }
  0x25   : > { %259 = vst [vmem:[%s1385_s29 + $0x100] sm:$0xff] %v258_v32  ;;  %v264_v35 = vld [vmem:[%s1380_s28 + $0x220] sm:$0xff]  ;;  %261 = vst [vmem:[%s1385_s29 + $0x108] sm:$0xff] %v260_v33  ;;  %v268_v37 = vld [vmem:[%s1380_s28 + $0x248] sm:$0xff] }
  0x26   : > { %263 = vst [vmem:[%s1385_s29 + $0x110] sm:$0xff] %v262_v34  ;;  %265 = vst [vmem:[%s1385_s29 + $0x118] sm:$0xff] %v264_v35  ;;  %v266_v36 = vld [vmem:[%s1380_s28 + $0x240] sm:$0xff]  ;;  %v270_v38 = vld [vmem:[%s1380_s28 + $0x250] sm:$0xff] }
  0x27   : > { %267 = vst [vmem:[%s1385_s29 + $0x120] sm:$0xff] %v266_v36  ;;  %269 = vst [vmem:[%s1385_s29 + $0x128] sm:$0xff] %v268_v37  ;;  %v272_v39 = vld [vmem:[%s1380_s28 + $0x270] sm:$0xff]  ;;  %v274_v40 = vld [vmem:[%s1380_s28 + $0x278] sm:$0xff] }
  0x28   : > { %271 = vst [vmem:[%s1385_s29 + $0x130] sm:$0xff] %v270_v38  ;;  %v276_v41 = vld [vmem:[%s1380_s28 + $0x280] sm:$0xff]  ;;  %273 = vst [vmem:[%s1385_s29 + $0x138] sm:$0xff] %v272_v39  ;;  %v280_v43 = vld [vmem:[%s1380_s28 + $0x2a8] sm:$0xff] }
  0x29   : > { %275 = vst [vmem:[%s1385_s29 + $0x140] sm:$0xff] %v274_v40  ;;  %277 = vst [vmem:[%s1385_s29 + $0x148] sm:$0xff] %v276_v41  ;;  %v278_v42 = vld [vmem:[%s1380_s28 + $0x2a0] sm:$0xff]  ;;  %v282_v44 = vld [vmem:[%s1380_s28 + $0x2b0] sm:$0xff] }
  0x2a   : > { %279 = vst [vmem:[%s1385_s29 + $0x150] sm:$0xff] %v278_v42  ;;  %281 = vst [vmem:[%s1385_s29 + $0x158] sm:$0xff] %v280_v43  ;;  %v284_v45 = vld [vmem:[%s1380_s28 + $0x2d0] sm:$0xff]  ;;  %v286_v46 = vld [vmem:[%s1380_s28 + $0x2d8] sm:$0xff] }
  0x2b   : > { %283 = vst [vmem:[%s1385_s29 + $0x160] sm:$0xff] %v282_v44  ;;  %v288_v47 = vld [vmem:[%s1380_s28 + $0x2e0] sm:$0xff]  ;;  %285 = vst [vmem:[%s1385_s29 + $0x168] sm:$0xff] %v284_v45 }
  0x2c   : > { %287 = vst [vmem:[%s1385_s29 + $0x170] sm:$0xff] %v286_v46  ;;  %289 = vst [vmem:[%s1385_s29 + $0x178] sm:$0xff] %v288_v47 }
  0x2d PF: > { %p1087_p8 = scmp.ge.s32.totalorder %s1309_s16, 1  ;;  %p302_p9 = scmp.lt.s32.totalorder %s1309_s16, 3 }
  0x2f   : > { %p303_p10 = pnand %p1087_p8, %p302_p9 }
  0x30   : > { %s309_s30 = sand.u32 (!%p303_p10), 1, %s1293_s12   ;;  %s354_s8 = smul.u32 (!%p303_p10), 6, %s1301_s14 }
  0x31   : > { %306 = sbr.rel (%p303_p10) target bundleno = 332 (0x14c), region = 51 }
  0x32   : > { %s1155_s4 = smul.u32 (!%p303_p10), 384, %s309_s30  ;;  %p355_p11 = scmp.lt.s32.totalorder (!%p303_p10), %s354_s8, 11 }
  0x33   : > { %s1156_s18 = smul.u32 (!%p303_p10), 48, %s309_s30 }
  0x34   : > { %s1487_s5 = scalar_lea.vmem (!%p303_p10), [#allocation3], %s1155_s4 }
  0x35   : > { %s1547_s19 = scalar_lea.vmem (!%p303_p10), [#allocation4], %s1156_s18 }
  0x36   : > { %v1311_v48 = vmov 0   ;;  %v1198_v49 = vld [vmem:[%s1487_s5 + $0x154] ss:$24 sps:$4 sm:$0xff]   ;;  %v1200_v50 = vld [vmem:[%s1487_s5 + $0x150] ss:$24 sps:$4 sm:$0xff]   ;;  %v1228_v14 = vld [vmem:[%s1582_s0] sm:$0xff]   ;;  %v856_v34 = vlaneseq }
  0x37   : > { %718 = vmatprep.mubr.bf16.mxu0 %v1311_v48  ;;  %761 = vmatprep.mubr.bf16.mxu1 %v1311_v48  ;;  %v1201_v51 = vld [vmem:[%s1487_s5 + $0x124] ss:$24 sps:$4 sm:$0xff]   ;;  %v1203_v52 = vld [vmem:[%s1487_s5 + $0x120] ss:$24 sps:$4 sm:$0xff]   ;;  %v1204_v53 = vld [vmem:[%s1487_s5 + $0xf4] ss:$24 sps:$4 sm:$0xff]  }
  0x38   : > { %686 = vmatprep.subr.bf16.mxu0 %v1198_v49  ;;  %v1206_v54 = vld [vmem:[%s1487_s5 + $0xf0] ss:$24 sps:$4 sm:$0xff]   ;;  %v1207_v55 = vld [vmem:[%s1487_s5 + $0xc4] ss:$24 sps:$4 sm:$0xff]   ;;  %v1209_v58 = vld [vmem:[%s1487_s5 + $0xc0] ss:$24 sps:$4 sm:$0xff]  }
  0x39   : > { %687 = vmatpush1.bf16.msra.mxu0 %v1200_v50  ;;  %v1219_v56 = vld [vmem:[%s1487_s5 + $0x15c] ss:$24 sps:$4 sm:$0xff]   ;;  %v1221_v57 = vld [vmem:[%s1487_s5 + $0x158] ss:$24 sps:$4 sm:$0xff]   ;;  %v1225_v60 = vld [vmem:[%s1487_s5 + $0x12c] ss:$24 sps:$4 sm:$0xff]  }
  0x3a   : > { %688 = vmatprep.subr.bf16.mxu0 %v1201_v51  ;;  %v1210_v59 = vld [vmem:[%s1487_s5 + $0x94] ss:$24 sps:$4 sm:$0xff]   ;;  %729 = vmatprep.subr.bf16.mxu1 %v1219_v56  ;;  %v1227_v61 = vld [vmem:[%s1487_s5 + $0x128] ss:$24 sps:$4 sm:$0xff]   ;;  %v1213_v0 = vld [vmem:[%s1487_s5 + $0x64] ss:$24 sps:$4 sm:$0xff]  }
  0x3b   : > { %730 = vmatpush1.bf16.msra.mxu1 %v1221_v57  ;;  %v1212_v62 = vld [vmem:[%s1487_s5 + $0x90] ss:$24 sps:$4 sm:$0xff]   ;;  %v1232_v63 = vld [vmem:[%s1487_s5 + $0xfc] ss:$24 sps:$4 sm:$0xff]   ;;  %v1238_v2 = vld [vmem:[%s1487_s5 + $0xcc] ss:$24 sps:$4 sm:$0xff]  }
  0x3c   : > { %731 = vmatprep.subr.bf16.mxu1 %v1225_v60  ;;  %v1234_v1 = vld [vmem:[%s1487_s5 + $0xf8] ss:$24 sps:$4 sm:$0xff]   ;;  %v1216_v4 = vld [vmem:[%s1487_s5 + $0x34] ss:$24 sps:$4 sm:$0xff]   ;;  %v1240_v5 = vld [vmem:[%s1487_s5 + $0xc8] ss:$24 sps:$4 sm:$0xff]  }
  0x3d   : > { %689 = vmatpush1.bf16.msra.mxu0 %v1203_v52  ;;  %v1215_v3 = vld [vmem:[%s1487_s5 + $0x60] ss:$24 sps:$4 sm:$0xff]   ;;  %v1244_v6 = vld [vmem:[%s1487_s5 + $0x9c] ss:$24 sps:$4 sm:$0xff]   ;;  %v1218_v7 = vld [vmem:[%s1487_s5 + $0x30] ss:$24 sps:$4 sm:$0xff]  }
  0x3e   : > { %690 = vmatprep.subr.bf16.mxu0 %v1204_v53  ;;  %v1222_v8 = vld [vmem:[%s1487_s5 + $0x4] ss:$24 sps:$4 sm:$0xff]   ;;  %v1246_v9 = vld [vmem:[%s1487_s5 + $0x98] ss:$24 sps:$4 sm:$0xff]   ;;  %v1252_v13 = vld [vmem:[%s1487_s5 + $0x68] ss:$24 sps:$4 sm:$0xff]  }
  0x3f   : > { %732 = vmatpush1.bf16.msra.mxu1 %v1227_v61  ;;  %v1250_v10 = vld [vmem:[%s1487_s5 + $0x6c] ss:$24 sps:$4 sm:$0xff]   ;;  %v1224_v11 = vld [vmem:[%s1487_s5] ss:$24 sps:$4 sm:$0xff]   ;;  %v1256_v15 = vld [vmem:[%s1487_s5 + $0x3c] ss:$24 sps:$4 sm:$0xff]  }
  0x40   : > { %733 = vmatprep.subr.bf16.mxu1 %v1232_v63  ;;  %v1231_v12 = vld [vmem:[%s1487_s5 + $0x164] ss:$24 sps:$4 sm:$0xff]   ;;  %v1229_v16 = vld [vmem:[%s1487_s5 + $0x160] ss:$24 sps:$4 sm:$0xff]   ;;  %v1237_v17 = vld [vmem:[%s1487_s5 + $0x134] ss:$24 sps:$4 sm:$0xff]  }
  0x41   : > { %691 = vmatpush1.bf16.msra.mxu0 %v1206_v54  ;;  %v1258_v18 = vld [vmem:[%s1487_s5 + $0x38] ss:$24 sps:$4 sm:$0xff]   ;;  %v1262_v19 = vld [vmem:[%s1487_s5 + $0xc] ss:$24 sps:$4 sm:$0xff]   ;;  %v1264_v22 = vld [vmem:[%s1487_s5 + $0x8] ss:$24 sps:$4 sm:$0xff]  }
  0x42   : > { %692 = vmatprep.subr.bf16.mxu0 %v1207_v55  ;;  %v1235_v20 = vld [vmem:[%s1487_s5 + $0x130] ss:$24 sps:$4 sm:$0xff]   ;;  %v1243_v21 = vld [vmem:[%s1487_s5 + $0x104] ss:$24 sps:$4 sm:$0xff]   ;;  %v1241_v23 = vld [vmem:[%s1487_s5 + $0x100] ss:$24 sps:$4 sm:$0xff]  }
  0x43   : > { %734 = vmatpush1.bf16.msra.mxu1 %v1234_v1  ;;  %v1249_v24 = vld [vmem:[%s1487_s5 + $0xd4] ss:$24 sps:$4 sm:$0xff]   ;;  %v1247_v25 = vld [vmem:[%s1487_s5 + $0xd0] ss:$24 sps:$4 sm:$0xff]   ;;  %v1255_v26 = vld [vmem:[%s1487_s5 + $0xa4] ss:$24 sps:$4 sm:$0xff]  }
  0x44   : > { %735 = vmatprep.subr.bf16.mxu1 %v1238_v2  ;;  %v1253_v27 = vld [vmem:[%s1487_s5 + $0xa0] ss:$24 sps:$4 sm:$0xff]   ;;  %v1261_v28 = vld [vmem:[%s1487_s5 + $0x74] ss:$24 sps:$4 sm:$0xff]   ;;  %v1259_v29 = vld [vmem:[%s1487_s5 + $0x70] ss:$24 sps:$4 sm:$0xff]  }
  0x45   : > { %693 = vmatpush1.bf16.msra.mxu0 %v1209_v58  ;;  %v1267_v30 = vld [vmem:[%s1487_s5 + $0x44] ss:$24 sps:$4 sm:$0xff]   ;;  %v1265_v31 = vld [vmem:[%s1487_s5 + $0x40] ss:$24 sps:$4 sm:$0xff]   ;;  %v1270_v32 = vld [vmem:[%s1487_s5 + $0x14] ss:$24 sps:$4 sm:$0xff]  }
  0x46   : > { %694 = vmatprep.subr.bf16.mxu0 %v1210_v59  ;;  %v1268_v33 = vld [vmem:[%s1487_s5 + $0x10] ss:$24 sps:$4 sm:$0xff]   ;;  %s1594_s8 = smov (!%p355_p11, %s354_s8), 11  ;;  %v857_v35 = vshrl.u32 %v856_v34, 7  ;;  %s1153_s12 = smul.u32 (%p1367_p6), 24, %s1301_s14 }
  0x47   : > { %736 = vmatpush1.bf16.msra.mxu1 %v1240_v5  ;;  %s357_s11 = scalar_lea.vmem %s1584_s2, %s1594_s8 }
  0x48   : > { %737 = vmatprep.subr.bf16.mxu1 %v1244_v6  ;;  %v858_v36 = vsub.s32 0, %v857_v35  ;;  %v854_v37 = vld [vmem:[%s357_s11] sm:$0x3f]  ;;  %v862_v38 = vsub.s32 1, %v857_v35  ;;  %v866_v45 = vsub.s32 2, %v857_v35  ;;  %v874_v1 = vsub.s32 4, %v857_v35  ;;  %s952_s24 = scalar_lea.vmem (%p1367_p6), %s1585_s3, %s1153_s12 }
  0x49   : > { %695 = vmatpush1.bf16.msra.mxu0 %v1212_v62  ;;  %v878_v2 = vsub.s32 5, %v857_v35 }
  0x4a   : > { %696 = vmatprep.subr.bf16.mxu0 %v1213_v0  ;;  %v859_v39 = vrot.slane %v854_v37, %v858_v36  ;;  %v863_v40 = vrot.slane %v854_v37, %v862_v38  ;;  %v867_v52 = vrot.slane %v854_v37, %v866_v45 }
  0x4b   : > { %738 = vmatpush1.bf16.msra.mxu1 %v1246_v9 }
  0x4c   : > { %739 = vmatprep.subr.bf16.mxu1 %v1250_v10 }
  0x4d   : > { %697 = vmatpush1.bf16.msra.mxu0 %v1215_v3  ;;  %v875_v3 = vrot.slane %v854_v37, %v874_v1 }
  0x4e   : > { %698 = vmatprep.subr.bf16.mxu0 %v1216_v4  ;;  %v879_v4 = vrot.slane %v854_v37, %v878_v2 }
  0x4f   : > { %740 = vmatpush1.bf16.msra.mxu1 %v1252_v13 }
  0x50   : > { %741 = vmatprep.subr.bf16.mxu1 %v1256_v15 }
  0x51   : > { %699 = vmatpush1.bf16.msra.mxu0 %v1218_v7 }
  0x52   : > { %700 = vmatprep.subr.bf16.mxu0 %v1222_v8 }
  0x53   : > { %742 = vmatpush1.bf16.msra.mxu1 %v1258_v18 }
  0x54   : > { %743 = vmatprep.subr.bf16.mxu1 %v1262_v19 }
  0x55   : > { %701 = vmatpush1.bf16.msra.mxu0 %v1224_v11 }
  0x56   : > { %772 = vmatprep.subr.bf16.mxu0 %v1231_v12 }
  0x57   : > { %744 = vmatpush1.bf16.msra.mxu1 %v1264_v22 }
  0x58   : > { %719 = vmatmul.mubr.bf16.vlgmr.msra.gmra.mxu0 %v1228_v14 }
  0x59   : > { %773 = vmatpush1.bf16.msra.mxu0 %v1229_v16  ;;  %804 = vmatprep.mubr.bf16.mxu0 %v1311_v48  ;;  %v870_v48 = vsub.s32 3, %v857_v35 }
  0x5a   : > { %774 = vmatprep.subr.bf16.mxu0 %v1237_v17  ;;  %762 = vmatmul.mubr.bf16.vlgmr.msra.gmra.mxu1 %v1228_v14 }
  0x5b   : > { %v871_v54 = vrot.slane %v854_v37, %v870_v48 }
  0x5d   : > { %775 = vmatpush1.bf16.msra.mxu0 %v1235_v20 }
  0x5e   : > { %776 = vmatprep.subr.bf16.mxu0 %v1243_v21 }
  0x61   : > { %777 = vmatpush1.bf16.msra.mxu0 %v1241_v23 }
  0x62   : > { %778 = vmatprep.subr.bf16.mxu0 %v1249_v24 }
  0x65   : > { %779 = vmatpush1.bf16.msra.mxu0 %v1247_v25 }
  0x66   : > { %780 = vmatprep.subr.bf16.mxu0 %v1255_v26 }
  0x69   : > { %781 = vmatpush1.bf16.msra.mxu0 %v1253_v27 }
  0x6a   : > { %782 = vmatprep.subr.bf16.mxu0 %v1261_v28 }
  0x6d   : > { %783 = vmatpush1.bf16.msra.mxu0 %v1259_v29 }
  0x6e   : > { %784 = vmatprep.subr.bf16.mxu0 %v1267_v30 }
  0x71   : > { %785 = vmatpush1.bf16.msra.mxu0 %v1265_v31 }
  0x72   : > { %786 = vmatprep.subr.bf16.mxu0 %v1270_v32 }
  0x75   : > { %787 = vmatpush1.bf16.msra.mxu0 %v1268_v33 }
  0x78   : > { %805 = vmatmul.mubr.bf16.vlgmr.msra.gmra.mxu0 %v1228_v14 }
 0x118   : > { %v720_v41 = vpop.f32.mrf.mxu0 }
 0x119   : > { %v886_v42 = vadd.f32 %v859_v39, %v720_v41 }
 0x11a   : > { %v722_v43 = vpop.f32.mrf.mxu0  ;;  %v763_v55 = vpop.f32.mrf.mxu1 }
 0x11b   : > { %v887_v44 = vadd.f32 %v863_v40, %v722_v43  ;;  %v888_v56 = vadd.f32 %v867_v52, %v763_v55 }
 0x11c   : > { %v724_v46 = vpop.f32.mrf.mxu0  ;;  %v765_v57 = vpop.f32.mrf.mxu1 }
 0x11d   : > { %v1147_v47 = vpack.c.bf16 %v887_v44, %v886_v42  ;;  %v892_v50 = vadd.f32 %v859_v39, %v724_v46  ;;  %v889_v58 = vadd.f32 %v871_v54, %v765_v57 }
 0x11e   : > { %v726_v49 = vpop.f32.mrf.mxu0  ;;  %v767_v59 = vpop.f32.mrf.mxu1 }
 0x11f   : > { %934 = vst [vmem:[%s1547_s19] sm:$0xff] %v1147_v47  ;;  %v893_v51 = vadd.f32 %v863_v40, %v726_v49  ;;  %v1148_v60 = vpack.c.bf16 %v889_v58, %v888_v56  ;;  %v894_v61 = vadd.f32 %v867_v52, %v767_v59 }
 0x120   : > { %v769_v62 = vpop.f32.mrf.mxu1 }
 0x121   : > { %v1150_v53 = vpack.c.bf16 %v893_v51, %v892_v50  ;;  %935 = vst [vmem:[%s1547_s19 + $0x8] sm:$0xff] %v1148_v60  ;;  %v895_v63 = vadd.f32 %v871_v54, %v769_v62 }
 0x123   : > { %937 = vst [vmem:[%s1547_s19 + $0x18] sm:$0xff] %v1150_v53  ;;  %v1151_v0 = vpack.c.bf16 %v895_v63, %v894_v61 }
 0x125   : > { %938 = vst [vmem:[%s1547_s19 + $0x20] sm:$0xff] %v1151_v0 }
 0x126   : > { %v965_v15 = vld [vmem:[%s1547_s19] sm:$0xff] (%p1367_p6) }
 0x127   : > { %966 = vst [vmem:[%s952_s24] sm:$0xff] (%p1367_p6), %v965_v15 }
 0x128   : > { %v967_v16 = vld [vmem:[%s1547_s19 + $0x8] sm:$0xff] (%p1367_p6) }
 0x129   : > { %968 = vst [vmem:[%s952_s24 + $0x8] sm:$0xff] (%p1367_p6), %v967_v16 }
 0x12a   : > { %v971_v18 = vld [vmem:[%s1547_s19 + $0x18] sm:$0xff] (%p1367_p6) }
 0x12b   : > { %972 = vst [vmem:[%s952_s24 + $0x30] sm:$0xff] (%p1367_p6), %v971_v18 }
 0x12c   : > { %v973_v19 = vld [vmem:[%s1547_s19 + $0x20] sm:$0xff] (%p1367_p6) }
 0x12d   : > { %974 = vst [vmem:[%s952_s24 + $0x38] sm:$0xff] (%p1367_p6), %v973_v19 }
 0x138   : > { %v806_v5 = vpop.f32.mrf.mxu0 }
 0x139   : > { %v890_v7 = vadd.f32 %v875_v3, %v806_v5 }
 0x13a   : > { %v808_v6 = vpop.f32.mrf.mxu0 }
 0x13b   : > { %v891_v8 = vadd.f32 %v879_v4, %v808_v6 }
 0x13c   : > { %v810_v9 = vpop.f32.mrf.mxu0 }
 0x13d   : > { %v1149_v10 = vpack.c.bf16 %v891_v8, %v890_v7  ;;  %v896_v12 = vadd.f32 %v875_v3, %v810_v9 }
 0x13e   : > { %v812_v11 = vpop.f32.mrf.mxu0 }
 0x13f   : > { %936 = vst [vmem:[%s1547_s19 + $0x10] sm:$0xff] %v1149_v10  ;;  %v897_v13 = vadd.f32 %v879_v4, %v812_v11  ;;  %946 = sbr.rel (!%p1367_p6) target bundleno = 332 (0x14c), region = 67 }
 0x141   : > { %v1152_v14 = vpack.c.bf16 %v897_v13, %v896_v12 }
 0x143   : > { %939 = vst [vmem:[%s1547_s19 + $0x28] sm:$0xff] %v1152_v14 }
 0x146   : > { %v969_v17 = vld [vmem:[%s1547_s19 + $0x10] sm:$0xff] }
 0x147   : > { %970 = vst [vmem:[%s952_s24 + $0x10] sm:$0xff] %v969_v17 }
 0x14a   : > { %v975_v20 = vld [vmem:[%s1547_s19 + $0x28] sm:$0xff] }
 0x14b   : > { %976 = vst [vmem:[%s952_s24 + $0x40] sm:$0xff] %v975_v20 }
 0x14c PF: > { %s13_s16 = sadd.s32 1, %s1309_s16   ;;  %s1587_s12 = smov %s1297_s13 }
 0x14d   : > { %p10_p12 = scmp.ge.s32.totalorder %s13_s16, 4   ;;  %s1588_s13 = smov %s1372_s22 }
 0x14e   : > { %s1589_s14 = smov %s1305_s15  ;;  %s1590_s15 = smov %s1592_s17 }
 0x14f   :  { %12 = sbr.rel (!%p10_p12) target bundleno = 3 (0x3), region = 127 }

// kernel: gpt_forward.33
= control target key start
LH: loop header
LB: loop body
LE: loop exit
PB: predicated region body
PF: predicated region fallthrough
CT: control target
= control target key end

     0   :  { %v229_v0 = vmov 0.0   ;;  %vm230_vm0 = vmmov 0   ;;  %s284_s1 = inlined_call_operand.vmem [shape: bf16[128,128], index: 1, kind: input, shape index: {}]   ;;  %s285_s0 = inlined_call_operand.vmem [shape: bf16[16,128], index: 0, kind: input, shape index: {}]   ;;  %s286_s2 = inlined_call_operand.vmem [shape: f32[1,128], index: 2, kind: input, shape index: {}]   ;;  %s287_s3 = inlined_call_operand.vmem [shape: bf16[16,128], index: 3, kind: output, shape index: {}]  }
   0x1   :  { %198 = vmatprep.subr.bf16.mxu0 %v229_v0  ;;  %v220_v1 = vld [vmem:[%s284_s1 + $0x38] sm:$0xff]   ;;  %214 = vmatprep.mubr.msk.bf16.mxu0 %vm230_vm0, %v229_v0  ;;  %v221_v2 = vld [vmem:[%s284_s1 + $0x30] sm:$0xff]   ;;  %v222_v3 = vld [vmem:[%s284_s1 + $0x28] sm:$0xff]  }
   0x2   :  { %199 = vmatpush3.bf16.msra.mxu0 %v220_v1  ;;  %v223_v4 = vld [vmem:[%s284_s1 + $0x20] sm:$0xff]   ;;  %v224_v5 = vld [vmem:[%s284_s1 + $0x18] sm:$0xff]   ;;  %v225_v6 = vld [vmem:[%s284_s1 + $0x10] sm:$0xff]  }
   0x3   :  { %200 = vmatprep.subr.bf16.mxu0 %v229_v0  ;;  %v226_v7 = vld [vmem:[%s284_s1 + $0x8] sm:$0xff]   ;;  %v227_v8 = vld [vmem:[%s284_s1] sm:$0xff]  }
   0x4   :  { %v228_v9 = vld [vmem:[%s285_s0] sm:$0xff]  }
   0x5   :  { %v179_v11 = vld [vmem:[%s286_s2] ss:$0 sm:$0xff] }
   0x6   :  { %201 = vmatpush3.bf16.msra.mxu0 %v221_v2 }
   0x7   :  { %202 = vmatprep.subr.bf16.mxu0 %v229_v0 }
   0xa   :  { %203 = vmatpush3.bf16.msra.mxu0 %v222_v3 }
   0xb   :  { %204 = vmatprep.subr.bf16.mxu0 %v229_v0 }
   0xe   :  { %205 = vmatpush3.bf16.msra.mxu0 %v223_v4 }
   0xf   :  { %206 = vmatprep.subr.bf16.mxu0 %v229_v0 }
  0x12   :  { %207 = vmatpush3.bf16.msra.mxu0 %v224_v5 }
  0x13   :  { %208 = vmatprep.subr.bf16.mxu0 %v229_v0 }
  0x16   :  { %209 = vmatpush3.bf16.msra.mxu0 %v225_v6 }
  0x17   :  { %210 = vmatprep.subr.bf16.mxu0 %v229_v0 }
  0x1a   :  { %211 = vmatpush3.bf16.msra.mxu0 %v226_v7 }
  0x1b   :  { %212 = vmatprep.subr.bf16.mxu0 %v229_v0 }
  0x1e   :  { %213 = vmatpush3.bf16.msra.mxu0 %v227_v8 }
  0x21   :  { %215 = vmatmul.mubr.bf16.vlgmr.msra.gmra.mxu0 %v228_v9 }
  0xe1   :  { %v129_v10 = vpop.f32.mrf.mxu0 }
  0xe2   :  { %v152_v13 = vadd.f32 %v179_v11, %v129_v10 }
  0xe3   :  { %v216_v12 = vpop.f32.mrf.mxu0 }
  0xe4   :  { %v154_v17 = vmax.f32 %v152_v13, 0.0 }
  0xe5   :  { %v132_v14 = vpop.f32.mrf.mxu0 }
  0xe6   :  { %v153_v15 = vadd.f32 %v179_v11, %v132_v14 }
  0xe7   :  { %v217_v16 = vpop.f32.mrf.mxu0 }
  0xe8   :  { %v155_v18 = vmax.f32 %v153_v15, 0.0 }
  0xea   :  { %v187_v19 = vpack.c.bf16 %v155_v18, %v154_v17 }
  0xec   :  { %188 = vst [vmem:[%s287_s3] sm:$0xff] %v187_v19  }

// kernel: gpt_forward.31
= control target key start
LH: loop header
LB: loop body
LE: loop exit
PB: predicated region body
PF: predicated region fallthrough
CT: control target
= control target key end

     0   :  { %s801_s12 = smov 0   ;;  %s803_s13 = smov 0   ;;  %s882_s0 = inlined_call_operand.vmem [shape: bf16[2,8,1536], index: 0, kind: input, shape index: {}, may-alias: {0,1,2}]   ;;  %s883_s1 = inlined_call_operand.vmem [shape: bf16[2,8,1536], index: 1, kind: input, shape index: {}, may-alias: {0,1,2}]   ;;  %s884_s2 = inlined_call_operand.vmem [shape: bf16[2,8,1536], index: 2, kind: input, shape index: {}, may-alias: {0,1,2}]   ;;  %s885_s3 = inlined_call_operand.vmem [shape: bf16[2,8,512], index: 3, kind: output, shape index: {}]  }
   0x1   :  { %s805_s14 = smov 0   ;;  %s807_s15 = smov 0  }
   0x2   :  { %s809_s16 = smov 0  }
   0x3 LB: > { %s35_s17 = sadd.s32 1, %s767_s14  ;;  %s39_s18 = sadd.s32 1, %s771_s15  ;;  %s775_s16 = sphi %s809_s16, %s13_s16   ;;  %s771_s15 = sphi %s807_s15, %s889_s15   ;;  %s767_s14 = sphi %s805_s14, %s888_s14   ;;  %s763_s13 = sphi %s803_s13, %s887_s13   ;;  %s759_s12 = sphi %s801_s12, %s886_s12  }
   0x4   : > { %p37_p0 = scmp.ge.s32.totalorder %s35_s17, 4  ;;  %p659_p1 = scmp.ge.s32.totalorder %s775_s16, 1 }
   0x5   : > { %p228_p2 = scmp.lt.s32.totalorder %s775_s16, 9 }
   0x6   : > { %s891_s17 = smov (%p37_p0, %s35_s17), 0  ;;  %s893_s18 = smov (!%p37_p0, %s39_s18), %s771_s15 }
   0x7   : > { %p229_p3 = pnand %p659_p1, %p228_p2  ;;  %p41_p4 = scmp.ge.s32.totalorder %s893_s18, 2 }
   0x8   : > { %p292_p5 = scmp.lt.s32.totalorder (!%p229_p3), %s763_s13, 1  ;;  %s304_s19 = sadd.s32 (!%p229_p3), 4, %s759_s12 }
   0x9   : > { %s895_s18 = smov (%p41_p4, %s893_s18), 0  ;;  %232 = sbr.rel (%p229_p3) target bundleno = 796 (0x31c), region = 32 }
   0xa   : > { %p309_p6 = scmp.lt.s32.totalorder (!%p229_p3), %s304_s19, 11  ;;  %p296_p7 = scmp.lt.s32.totalorder (!%p229_p3), %s759_s12, 11 }
   0xb   : > { %s318_s5 = sadd.s32 (!%p229_p3), 8, %s759_s12  ;;  %p336_p9 = scmp.lt.s32.totalorder (!%p229_p3), %s759_s12, 3 }
   0xc   : > { %p323_p8 = scmp.lt.s32.totalorder (!%p229_p3), %s318_s5, 11 }
   0xe   : > { %v777_v0 = vmov 0.0   ;;  %vm778_vm0 = vmmov 0   ;;  %s897_s13 = smov (!%p292_p5, %s763_s13), 1  ;;  %s899_s19 = smov (!%p309_p6, %s304_s19), 11  ;;  %vm349_vm1 = vcmask 7168   ;;  %v779_v3 = vmov -inf  }
   0xf   : > { %672 = vmatprep.subr.bf16.mxu0 %v777_v0  ;;  %674 = vmatprep.mubr.msk.bf16.mxu0 %vm778_vm0, %v777_v0  ;;  %s838_s20 = smul.u32 12, %s897_s13  ;;  %350 = vst.msk [vmem:[#allocation2] sm:$0xff] %vm349_vm1, %v779_v3  ;;  %351 = vst.msk [vmem:[#allocation3] sm:$0xff] %vm349_vm1, %v777_v0  ;;  %vm396_vm2 = vcmask 64512   ;;  %v780_v9 = vmov 0   ;;  %s901_s5 = smov (!%p323_p8, %s318_s5), 11 }
  0x10   : > { %678 = vmatprep.subr.bf16.mxu1 %v777_v0  ;;  %680 = vmatprep.mubr.msk.bf16.mxu1 %vm778_vm0, %v777_v0  ;;  %s297_s21 = scalar_select %p296_p7, %s759_s12, 11  ;;  %vm432_vm3 = vcmask 1043456  }
  0x11   : > { %s314_s22 = sadd.s32 %s838_s20, %s899_s19  ;;  %729 = vset.pattern.permute.xlu0 %v780_v9  ;;  %730 = vset.pattern.permute.xlu1 %v780_v9  ;;  %s328_s6 = sadd.s32 %s838_s20, %s901_s5 }
  0x12   : > { %s661_s23 = sshll.u32 %s314_s22, 2  ;;  %s301_s24 = sadd.s32 %s838_s20, %s297_s21 }
  0x13   : > { %s316_s27 = scalar_lea.vmem %s883_s1, %s661_s23  ;;  %s660_s28 = sshll.u32 %s301_s24, 2 }
  0x14   : > { %v354_v1 = vld [vmem:[%s316_s27] sm:$0xf]  ;;  %s303_s4 = scalar_lea.vmem %s882_s0, %s660_s28  ;;  %s662_s7 = sshll.u32 %s328_s6, 2 }
  0x15   : > { %673 = vmatpush3.bf16.xpose.msra.mxu0 %v354_v1  ;;  %v353_v2 = vld [vmem:[%s303_s4] sm:$0xf]  ;;  %s330_s10 = scalar_lea.vmem %s884_s2, %s662_s7  ;;  %s903_s12 = smov (!%p336_p9, %s759_s12), 3 }
  0x16   : > { %v395_v10 = vld [vmem:[#allocation2] sm:$0xff]  ;;  %v412_v24 = vld [vmem:[#allocation3] sm:$0xff]  ;;  %s663_s11 = sshll.u32 %s897_s13, 2 }
  0x17   : > { %v428_v14 = vld [vmem:[%s330_s10] sm:$0xf]  ;;  %s341_s19 = sadd.s32 %s663_s11, %s903_s12 }
  0x18   : > { %v434_v15 = vsel %vm432_vm3, %v428_v14, 0  ;;  %s664_s20 = sshll.u32 %s341_s19, 2 }
  0x19   : > { %679 = vmatpush3.bf16.msra.mxu1 %v434_v15  ;;  %s343_s23 = scalar_lea.vmem %s885_s3, %s664_s20 }
  0x1c   : > { %675 = vmatmul.mubr.bf16.vlgmr.msra.gmra.mxu0 %v353_v2 }
  0xdc   : > { %v389_v4 = vpop.f32.mrf.mxu0 }
  0xdd   : > { %v397_v5 = vsel %vm396_vm2, %v389_v4, -inf }
  0xde   : > { %398 = vmax.xlane.f32.xlu0 %v397_v5  ;;  %v676_v6 = vpop.f32.mrf.mxu0 }
  0xe0   : > { %v392_v7 = vpop.f32.mrf.mxu0 }
  0xe2   : > { %v677_v8 = vpop.f32.mrf.mxu0 }
 0x167   : > { %v399_v11 = vpop.xlane.xlu0 %398 }
 0x168   : > { %v400_v12 = vmax.f32 %v395_v10, %v399_v11 }
 0x16a   : > { %v401_v13 = vsub.f32 %v395_v10, %v400_v12  ;;  %478 = vst.msk [vmem:[#allocation2] sm:$0xff] %vm349_vm1, %v400_v12  ;;  %406 = vperm.xlu0 %729, %v400_v12  }
 0x16c   : > { %v402_v20 = vmul.f32 1.442695, %v401_v13 }
 0x1e5   : > { %v407_v16 = vpop.permute.xlu0 %406 }
 0x1e6   : > { %v409_v17 = vsub.f32 %v389_v4, %v407_v16 }
 0x1e8   : > { %v410_v18 = vmul.f32 1.442695, %v409_v17 }
 0x1ea   : > { %731 = vpow2.f32 %v410_v18 }
 0x1eb   : > { %733 = vpow2.f32 %v402_v20 }
 0x1f7   : > { %v732_v19 = vpop.eup %731 }
 0x1f8   : > { %v414_v21 = vsel %vm396_vm2, %v732_v19, 0.0  ;;  %v427_v22 = vpack.c.bf16 %v732_v19, %v732_v19  ;;  %v734_v23 = vpop.eup %733 }
 0x1f9   : > { %415 = vadd.xlane.f32.xlu1 %v414_v21  ;;  %v413_v25 = vmul.f32 %v734_v23, %v412_v24 }
 0x1fa   : > { %681 = vmatmul.mubr.msk.bf16.vlgmr.msra.gmra.mxu1 %vm396_vm2, %v427_v22 }
 0x20a   : > { %423 = vperm.xlu1 %730, %v734_v23  }
 0x282   : > { %v416_v26 = vpop.xlane.xlu1 %415 }
 0x283   : > { %v417_v27 = vadd.f32 %v416_v26, %v413_v25 }
 0x285   : > { %419 = vst.msk [vmem:[#allocation3] sm:$0xff] %vm349_vm1, %v417_v27 }
 0x286   : > { %v424_v34 = vpop.permute.xlu1 %423 }
 0x287   : > { %v426_v35 = vmul.f32 0.0, %v424_v34 }
 0x28c   : > { %v482_v28 = vld [vmem:[#allocation3] sm:$0xff] }
 0x28d   : > { %735 = vrcp.f32 %v482_v28 }
 0x29a   : > { %v736_v29 = vpop.eup %735 }
 0x29b   : > { %487 = vperm.xlu1 %730, %v736_v29  }
 0x2ba   : > { %v470_v30 = vpop.f32.mrf.mxu1 }
 0x2bb   : > { %v476_v36 = vadd.f32 %v470_v30, %v426_v35 }
 0x2bc   : > { %v682_v31 = vpop.f32.mrf.mxu1 }
 0x2be   : > { %v473_v32 = vpop.f32.mrf.mxu1 }
 0x2c0   : > { %v683_v33 = vpop.f32.mrf.mxu1 }
 0x316   : > { %v488_v37 = vpop.permute.xlu1 %487 }
 0x317   : > { %v490_v38 = vmul.f32 %v488_v37, %v476_v36 }
 0x319   : > { %v491_v39 = vpack.c.bf16 %v490_v38, %v490_v38 }
 0x31b   : > { %492 = vst [vmem:[%s343_s23] sm:$0xf] %v491_v39 }
 0x31c PF: > { %s13_s16 = sadd.s32 1, %s775_s16   ;;  %s886_s12 = smov %s767_s14 }
 0x31d   : > { %p10_p10 = scmp.ge.s32.totalorder %s13_s16, 10   ;;  %s887_s13 = smov %s771_s15 }
 0x31e   : > { %s888_s14 = smov %s891_s17  ;;  %s889_s15 = smov %s895_s18 }
 0x31f   :  { %12 = sbr.rel (!%p10_p10) target bundleno = 3 (0x3), region = 76 }

// kernel: gpt_forward.45
= control target key start
LH: loop header
LB: loop body
LE: loop exit
PB: predicated region body
PF: predicated region fallthrough
CT: control target
= control target key end

     0   :  { %s796_s12 = smov 0   ;;  %s798_s13 = smov 0   ;;  %s882_s0 = inlined_call_operand.vmem [shape: bf16[2,8,512], index: 0, kind: input, shape index: {}]   ;;  %s883_s1 = inlined_call_operand.vmem [shape: bf16[2,8,1024], index: 1, kind: input, shape index: {}, may-alias: {1,2}]   ;;  %s884_s2 = inlined_call_operand.vmem [shape: bf16[2,8,1024], index: 2, kind: input, shape index: {}, may-alias: {1,2}]   ;;  %s885_s3 = inlined_call_operand.vmem [shape: bf16[2,8,512], index: 3, kind: output, shape index: {}]  }
   0x1   :  { %s800_s14 = smov 0   ;;  %s802_s15 = smov 0  }
   0x2   :  { %s804_s16 = smov 0  }
   0x3 LB: > { %s35_s17 = sadd.s32 1, %s762_s14  ;;  %s39_s18 = sadd.s32 1, %s766_s15  ;;  %s770_s16 = sphi %s804_s16, %s13_s16   ;;  %s766_s15 = sphi %s802_s15, %s889_s15   ;;  %s762_s14 = sphi %s800_s14, %s888_s14   ;;  %s758_s13 = sphi %s798_s13, %s887_s13   ;;  %s754_s12 = sphi %s796_s12, %s886_s12  }
   0x4   : > { %p37_p0 = scmp.ge.s32.totalorder %s35_s17, 4  ;;  %p652_p1 = scmp.ge.s32.totalorder %s770_s16, 1 }
   0x5   : > { %p224_p2 = scmp.lt.s32.totalorder %s770_s16, 9 }
   0x6   : > { %s891_s17 = smov (%p37_p0, %s35_s17), 0  ;;  %s893_s18 = smov (!%p37_p0, %s39_s18), %s766_s15 }
   0x7   : > { %p225_p3 = pnand %p652_p1, %p224_p2  ;;  %p41_p4 = scmp.ge.s32.totalorder %s893_s18, 2 }
   0x8   : > { %p287_p5 = scmp.lt.s32.totalorder (!%p225_p3), %s758_s13, 1  ;;  %p303_p6 = scmp.lt.s32.totalorder (!%p225_p3), %s754_s12, 7 }
   0x9   : > { %s895_s18 = smov (%p41_p4, %s893_s18), 0  ;;  %228 = sbr.rel (%p225_p3) target bundleno = 796 (0x31c), region = 32 }
   0xa   : > { %p291_p7 = scmp.lt.s32.totalorder (!%p225_p3), %s754_s12, 3  ;;  %s311_s6 = sadd.s32 (!%p225_p3), 4, %s754_s12 }
   0xb   : > { %p316_p8 = scmp.lt.s32.totalorder (!%p225_p3), %s311_s6, 7 }
   0xe   : > { %v772_v0 = vmov 0.0   ;;  %vm773_vm0 = vmmov 0   ;;  %s897_s13 = smov (!%p287_p5, %s758_s13), 1  ;;  %vm342_vm1 = vcmask 7168   ;;  %v774_v3 = vmov -inf   ;;  %s899_s6 = smov (!%p316_p8, %s311_s6), 7 }
   0xf   : > { %668 = vmatprep.subr.bf16.mxu0 %v772_v0  ;;  %670 = vmatprep.mubr.msk.bf16.mxu0 %vm773_vm0, %v772_v0  ;;  %s304_s19 = scalar_select %p303_p6, %s754_s12, 7  ;;  %343 = vst.msk [vmem:[#allocation2] sm:$0xff] %vm342_vm1, %v774_v3  ;;  %344 = vst.msk [vmem:[#allocation3] sm:$0xff] %vm342_vm1, %v772_v0  ;;  %vm389_vm2 = vcmask 64512   ;;  %v775_v9 = vmov 0   ;;  %vm425_vm3 = vcmask 1043456  }
  0x10   : > { %674 = vmatprep.subr.bf16.mxu1 %v772_v0  ;;  %676 = vmatprep.mubr.msk.bf16.mxu1 %vm773_vm0, %v772_v0  ;;  %s655_s20 = sshll.u32 %s897_s13, 3  ;;  %s653_s26 = sshll.u32 %s897_s13, 2 }
  0x11   : > { %s308_s21 = sadd.s32 %s655_s20, %s304_s19  ;;  %724 = vset.pattern.permute.xlu0 %v775_v9  ;;  %725 = vset.pattern.permute.xlu1 %v775_v9  ;;  %s321_s7 = sadd.s32 %s655_s20, %s899_s6 }
  0x12   : > { %s656_s22 = sshll.u32 %s308_s21, 2  ;;  %s658_s8 = sshll.u32 %s321_s7, 2 }
  0x13   : > { %s310_s25 = scalar_lea.vmem %s883_s1, %s656_s22  ;;  %s323_s11 = scalar_lea.vmem %s884_s2, %s658_s8 }
  0x14   : > { %v347_v1 = vld [vmem:[%s310_s25] sm:$0xf]  ;;  %s292_s27 = scalar_select %p291_p7, %s754_s12, 3 }
  0x15   : > { %669 = vmatpush3.bf16.xpose.msra.mxu0 %v347_v1  ;;  %v421_v14 = vld [vmem:[%s323_s11] sm:$0xf] }
  0x16   : > { %s841_s28 = sadd.s32 %s653_s26, %s292_s27  ;;  %v388_v10 = vld [vmem:[#allocation2] sm:$0xff]  ;;  %v427_v15 = vsel %vm425_vm3, %v421_v14, 0  ;;  %v405_v24 = vld [vmem:[#allocation3] sm:$0xff] }
  0x17   : > { %s654_s29 = sshll.u32 %s841_s28, 2  ;;  %675 = vmatpush3.bf16.msra.mxu1 %v427_v15 }
  0x18   : > { %s298_s5 = scalar_lea.vmem %s882_s0, %s654_s29  ;;  %s336_s19 = scalar_lea.vmem %s885_s3, %s654_s29 }
  0x19   : > { %v346_v2 = vld [vmem:[%s298_s5] sm:$0xf] }
  0x1c   : > { %671 = vmatmul.mubr.bf16.vlgmr.msra.gmra.mxu0 %v346_v2 }
  0xdc   : > { %v382_v4 = vpop.f32.mrf.mxu0 }
  0xdd   : > { %v390_v5 = vsel %vm389_vm2, %v382_v4, -inf }
  0xde   : > { %391 = vmax.xlane.f32.xlu0 %v390_v5  ;;  %v672_v6 = vpop.f32.mrf.mxu0 }
  0xe0   : > { %v385_v7 = vpop.f32.mrf.mxu0 }
  0xe2   : > { %v673_v8 = vpop.f32.mrf.mxu0 }
 0x167   : > { %v392_v11 = vpop.xlane.xlu0 %391 }
 0x168   : > { %v393_v12 = vmax.f32 %v388_v10, %v392_v11 }
 0x16a   : > { %v394_v13 = vsub.f32 %v388_v10, %v393_v12  ;;  %471 = vst.msk [vmem:[#allocation2] sm:$0xff] %vm342_vm1, %v393_v12  ;;  %399 = vperm.xlu0 %724, %v393_v12  }
 0x16c   : > { %v395_v20 = vmul.f32 1.442695, %v394_v13 }
 0x1e5   : > { %v400_v16 = vpop.permute.xlu0 %399 }
 0x1e6   : > { %v402_v17 = vsub.f32 %v382_v4, %v400_v16 }
 0x1e8   : > { %v403_v18 = vmul.f32 1.442695, %v402_v17 }
 0x1ea   : > { %726 = vpow2.f32 %v403_v18 }
 0x1eb   : > { %728 = vpow2.f32 %v395_v20 }
 0x1f7   : > { %v727_v19 = vpop.eup %726 }
 0x1f8   : > { %v407_v21 = vsel %vm389_vm2, %v727_v19, 0.0  ;;  %v420_v22 = vpack.c.bf16 %v727_v19, %v727_v19  ;;  %v729_v23 = vpop.eup %728 }
 0x1f9   : > { %408 = vadd.xlane.f32.xlu1 %v407_v21  ;;  %v406_v25 = vmul.f32 %v729_v23, %v405_v24 }
 0x1fa   : > { %677 = vmatmul.mubr.msk.bf16.vlgmr.msra.gmra.mxu1 %vm389_vm2, %v420_v22 }
 0x20a   : > { %416 = vperm.xlu1 %725, %v729_v23  }
 0x282   : > { %v409_v26 = vpop.xlane.xlu1 %408 }
 0x283   : > { %v410_v27 = vadd.f32 %v409_v26, %v406_v25 }
 0x285   : > { %412 = vst.msk [vmem:[#allocation3] sm:$0xff] %vm342_vm1, %v410_v27 }
 0x286   : > { %v417_v34 = vpop.permute.xlu1 %416 }
 0x287   : > { %v419_v35 = vmul.f32 0.0, %v417_v34 }
 0x28c   : > { %v475_v28 = vld [vmem:[#allocation3] sm:$0xff] }
 0x28d   : > { %730 = vrcp.f32 %v475_v28 }
 0x29a   : > { %v731_v29 = vpop.eup %730 }
 0x29b   : > { %480 = vperm.xlu1 %725, %v731_v29  }
 0x2ba   : > { %v463_v30 = vpop.f32.mrf.mxu1 }
 0x2bb   : > { %v469_v36 = vadd.f32 %v463_v30, %v419_v35 }
 0x2bc   : > { %v678_v31 = vpop.f32.mrf.mxu1 }
 0x2be   : > { %v466_v32 = vpop.f32.mrf.mxu1 }
 0x2c0   : > { %v679_v33 = vpop.f32.mrf.mxu1 }
 0x316   : > { %v481_v37 = vpop.permute.xlu1 %480 }
 0x317   : > { %v483_v38 = vmul.f32 %v481_v37, %v469_v36 }
 0x319   : > { %v484_v39 = vpack.c.bf16 %v483_v38, %v483_v38 }
 0x31b   : > { %485 = vst [vmem:[%s336_s19] sm:$0xf] %v484_v39 }
 0x31c PF: > { %s13_s16 = sadd.s32 1, %s770_s16   ;;  %s886_s12 = smov %s762_s14 }
 0x31d   : > { %p10_p9 = scmp.ge.s32.totalorder %s13_s16, 10   ;;  %s887_s13 = smov %s766_s15 }
 0x31e   : > { %s888_s14 = smov %s891_s17  ;;  %s889_s15 = smov %s895_s18 }
 0x31f   :  { %12 = sbr.rel (!%p10_p9) target bundleno = 3 (0x3), region = 76 }

// kernel: gpt_forward.34
= control target key start
LH: loop header
LB: loop body
LE: loop exit
PB: predicated region body
PF: predicated region fallthrough
CT: control target
= control target key end

     0   :  { %v301_v0 = vmov 0.0   ;;  %vm302_vm0 = vmmov 0   ;;  %v169_v10 = vlaneseq  ;;  %s380_s1 = inlined_call_operand.vmem [shape: bf16[128,128], index: 1, kind: input, shape index: {}]   ;;  %s381_s0 = inlined_call_operand.vmem [shape: bf16[16,128], index: 0, kind: input, shape index: {}]   ;;  %s382_s3 = inlined_call_operand.vmem [shape: bf16[16,128], index: 3, kind: input, shape index: {}]   ;;  %s383_s2 = inlined_call_operand.vmem [shape: f32[1,128], index: 2, kind: input, shape index: {}]   ;;  %s384_s4 = inlined_call_operand.vmem [shape: f32[1,128], index: 4, kind: input, shape index: {}]   ;;  %s385_s5 = inlined_call_operand.vmem [shape: f32[1,128], index: 5, kind: input, shape index: {}]   ;;  %s386_s6 = inlined_call_operand.vmem [shape: bf16[16,128], index: 6, kind: output, shape index: {}]  }
   0x1   :  { %266 = vmatprep.subr.bf16.mxu0 %v301_v0  ;;  %v288_v1 = vld [vmem:[%s380_s1 + $0x38] sm:$0xff]   ;;  %282 = vmatprep.mubr.msk.bf16.mxu0 %vm302_vm0, %v301_v0  ;;  %v289_v2 = vld [vmem:[%s380_s1 + $0x30] sm:$0xff]   ;;  %v290_v3 = vld [vmem:[%s380_s1 + $0x28] sm:$0xff]  }
   0x2   :  { %267 = vmatpush3.bf16.msra.mxu0 %v288_v1  ;;  %v291_v4 = vld [vmem:[%s380_s1 + $0x20] sm:$0xff]   ;;  %v292_v5 = vld [vmem:[%s380_s1 + $0x18] sm:$0xff]   ;;  %v293_v6 = vld [vmem:[%s380_s1 + $0x10] sm:$0xff]   ;;  %v170_v13 = vand.u32 127, %v169_v10 }
   0x3   :  { %268 = vmatprep.subr.bf16.mxu0 %v301_v0  ;;  %v294_v7 = vld [vmem:[%s380_s1 + $0x8] sm:$0xff]   ;;  %v295_v8 = vld [vmem:[%s380_s1] sm:$0xff]  }
   0x4   :  { %v296_v9 = vld [vmem:[%s381_s0] sm:$0xff]   ;;  %vm171_vm1 = vcmp.lt.s32.totalorder %v170_v13, 32 }
   0x5   :  { %v249_v11 = vld [vmem:[%s382_s3] sm:$0xff]  }
   0x6   :  { %269 = vmatpush3.bf16.msra.mxu0 %v289_v2  ;;  %v241_v12 = vld [vmem:[%s383_s2] ss:$0 sm:$0xff]  ;;  %v250_v14 = vunpack.c.l.bf16 %v249_v11  ;;  %v251_v19 = vunpack.c.h.bf16 %v249_v11 }
   0x7   :  { %270 = vmatprep.subr.bf16.mxu0 %v301_v0  ;;  %v242_v45 = vld [vmem:[%s384_s4] ss:$0 sm:$0xff] }
   0x8   :  { %v243_v50 = vld [vmem:[%s385_s5] ss:$0 sm:$0xff] }
   0xa   :  { %271 = vmatpush3.bf16.msra.mxu0 %v290_v3 }
   0xb   :  { %272 = vmatprep.subr.bf16.mxu0 %v301_v0 }
   0xe   :  { %273 = vmatpush3.bf16.msra.mxu0 %v291_v4 }
   0xf   :  { %274 = vmatprep.subr.bf16.mxu0 %v301_v0 }
  0x12   :  { %275 = vmatpush3.bf16.msra.mxu0 %v292_v5 }
  0x13   :  { %276 = vmatprep.subr.bf16.mxu0 %v301_v0 }
  0x16   :  { %277 = vmatpush3.bf16.msra.mxu0 %v293_v6 }
  0x17   :  { %278 = vmatprep.subr.bf16.mxu0 %v301_v0 }
  0x1a   :  { %279 = vmatpush3.bf16.msra.mxu0 %v294_v7 }
  0x1b   :  { %280 = vmatprep.subr.bf16.mxu0 %v301_v0 }
  0x1e   :  { %281 = vmatpush3.bf16.msra.mxu0 %v295_v8 }
  0x21   :  { %283 = vmatmul.mubr.bf16.vlgmr.msra.gmra.mxu0 %v296_v9 }
  0xe1   :  { %v138_v15 = vpop.f32.mrf.mxu0 }
  0xe2   :  { %v161_v16 = vadd.f32 %v241_v12, %v138_v15 }
  0xe3   :  { %v284_v17 = vpop.f32.mrf.mxu0 }
  0xe4   :  { %v167_v18 = vadd.f32 %v250_v14, %v161_v16 }
  0xe5   :  { %v141_v20 = vpop.f32.mrf.mxu0 }
  0xe6   :  { %v162_v21 = vadd.f32 %v241_v12, %v141_v20  ;;  %v172_v22 = vsel %vm171_vm1, %v167_v18, 0.0 }
  0xe7   :  { %174 = vadd.xlane.f32.xlu0 %v172_v22  ;;  %v285_v23 = vpop.f32.mrf.mxu0  ;;  %v178_v24 = vmul.f32 %v172_v22, %v172_v22 }
  0xe8   :  { %v168_v25 = vadd.f32 %v251_v19, %v162_v21 }
  0xe9   :  { %180 = vadd.xlane.f32.xlu1 %v178_v24 }
  0xea   :  { %v173_v26 = vsel %vm171_vm1, %v168_v25, 0.0 }
  0xeb   :  { %176 = vadd.xlane.f32.xlu0 %v173_v26  ;;  %v179_v27 = vmul.f32 %v173_v26, %v173_v26 }
  0xed   :  { %182 = vadd.xlane.f32.xlu1 %v179_v27 }
 0x170   :  { %v175_v28 = vpop.xlane.xlu0 %174 }
 0x171   :  { %v184_v29 = vmul.f32 0.03125, %v175_v28 }
 0x172   :  { %v181_v30 = vpop.xlane.xlu1 %180 }
 0x173   :  { %v188_v31 = vmul.f32 %v184_v29, %v184_v29  ;;  %v186_v32 = vmul.f32 0.03125, %v181_v30  ;;  %v192_v42 = vsub.f32 %v167_v18, %v184_v29 }
 0x174   :  { %v177_v33 = vpop.xlane.xlu0 %176 }
 0x175   :  { %v190_v34 = vsub.f32 %v186_v32, %v188_v31  ;;  %v185_v35 = vmul.f32 0.03125, %v177_v33 }
 0x176   :  { %v183_v36 = vpop.xlane.xlu1 %182 }
 0x177   :  { %v194_v37 = vadd.f32 1e-05, %v190_v34  ;;  %v189_v38 = vmul.f32 %v185_v35, %v185_v35  ;;  %v187_v39 = vmul.f32 0.03125, %v183_v36  ;;  %v193_v46 = vsub.f32 %v168_v25, %v185_v35 }
 0x179   :  { %297 = vrsqrt.f32 %v194_v37  ;;  %v191_v40 = vsub.f32 %v187_v39, %v189_v38 }
 0x17b   :  { %v195_v41 = vadd.f32 1e-05, %v191_v40 }
 0x17d   :  { %299 = vrsqrt.f32 %v195_v41 }
 0x186   :  { %v298_v43 = vpop.eup %297 }
 0x187   :  { %v198_v44 = vmul.f32 %v298_v43, %v192_v42 }
 0x189   :  { %v207_v48 = vmul.f32 %v242_v45, %v198_v44 }
 0x18a   :  { %v300_v47 = vpop.eup %299 }
 0x18b   :  { %v199_v49 = vmul.f32 %v300_v47, %v193_v46  ;;  %v216_v52 = vadd.f32 %v243_v50, %v207_v48 }
 0x18d   :  { %v208_v51 = vmul.f32 %v242_v45, %v199_v49 }
 0x18f   :  { %v217_v53 = vadd.f32 %v243_v50, %v208_v51 }
 0x191   :  { %v255_v54 = vpack.c.bf16 %v217_v53, %v216_v52 }
 0x193   :  { %256 = vst [vmem:[%s386_s6] sm:$0xff] %v255_v54  }

// kernel: gpt_forward.58
= control target key start
LH: loop header
LB: loop body
LE: loop exit
PB: predicated region body
PF: predicated region fallthrough
CT: control target
= control target key end

     0   :  { %v18_v0 = vlaneseq  ;;  %s132_s0 = inlined_call_operand.vmem [shape: bf16[16,128], index: 0, kind: input, shape index: {}]   ;;  %s133_s1 = inlined_call_operand.vmem [shape: f32[1,128], index: 1, kind: input, shape index: {}]   ;;  %s134_s2 = inlined_call_operand.vmem [shape: f32[1,128], index: 2, kind: input, shape index: {}]   ;;  %s135_s3 = inlined_call_operand.vmem [shape: bf16[16,128], index: 3, kind: output, shape index: {}]  }
   0x1   :  { %v88_v1 = vld [vmem:[%s132_s0] sm:$0xff]  }
   0x2   :  { %v89_v2 = vunpack.c.l.bf16 %v88_v1  ;;  %v19_v3 = vand.u32 127, %v18_v0  ;;  %v90_v4 = vunpack.c.h.bf16 %v88_v1  ;;  %v81_v26 = vld [vmem:[%s133_s1] ss:$0 sm:$0xff] }
   0x3   :  { %v82_v31 = vld [vmem:[%s134_s2] ss:$0 sm:$0xff] }
   0x4   :  { %vm20_vm0 = vcmp.lt.s32.totalorder %v19_v3, 32 }
   0x5   :  { %v21_v5 = vsel %vm20_vm0, %v89_v2, 0.0  ;;  %v22_v6 = vsel %vm20_vm0, %v90_v4, 0.0 }
   0x6   :  { %23 = vadd.xlane.f32.xlu0 %v21_v5  ;;  %v27_v7 = vmul.f32 %v21_v5, %v21_v5  ;;  %v28_v8 = vmul.f32 %v22_v6, %v22_v6 }
   0x8   :  { %29 = vadd.xlane.f32.xlu1 %v27_v7 }
   0xa   :  { %25 = vadd.xlane.f32.xlu0 %v22_v6 }
   0xc   :  { %31 = vadd.xlane.f32.xlu1 %v28_v8 }
  0x8f   :  { %v24_v9 = vpop.xlane.xlu0 %23 }
  0x90   :  { %v33_v10 = vmul.f32 0.03125, %v24_v9 }
  0x91   :  { %v30_v11 = vpop.xlane.xlu1 %29 }
  0x92   :  { %v37_v12 = vmul.f32 %v33_v10, %v33_v10  ;;  %v35_v13 = vmul.f32 0.03125, %v30_v11  ;;  %v41_v23 = vsub.f32 %v89_v2, %v33_v10 }
  0x93   :  { %v26_v14 = vpop.xlane.xlu0 %25 }
  0x94   :  { %v39_v15 = vsub.f32 %v35_v13, %v37_v12  ;;  %v34_v16 = vmul.f32 0.03125, %v26_v14 }
  0x95   :  { %v32_v17 = vpop.xlane.xlu1 %31 }
  0x96   :  { %v43_v18 = vadd.f32 1e-05, %v39_v15  ;;  %v38_v19 = vmul.f32 %v34_v16, %v34_v16  ;;  %v36_v20 = vmul.f32 0.03125, %v32_v17  ;;  %v42_v27 = vsub.f32 %v90_v4, %v34_v16 }
  0x98   :  { %96 = vrsqrt.f32 %v43_v18  ;;  %v40_v21 = vsub.f32 %v36_v20, %v38_v19 }
  0x9a   :  { %v44_v22 = vadd.f32 1e-05, %v40_v21 }
  0x9c   :  { %98 = vrsqrt.f32 %v44_v22 }
  0xa5   :  { %v97_v24 = vpop.eup %96 }
  0xa6   :  { %v47_v25 = vmul.f32 %v97_v24, %v41_v23 }
  0xa8   :  { %v56_v29 = vmul.f32 %v81_v26, %v47_v25 }
  0xa9   :  { %v99_v28 = vpop.eup %98 }
  0xaa   :  { %v48_v30 = vmul.f32 %v99_v28, %v42_v27  ;;  %v65_v33 = vadd.f32 %v82_v31, %v56_v29 }
  0xac   :  { %v57_v32 = vmul.f32 %v81_v26, %v48_v30 }
  0xae   :  { %v66_v34 = vadd.f32 %v82_v31, %v57_v32 }
  0xb0   :  { %v94_v35 = vpack.c.bf16 %v66_v34, %v65_v33 }
  0xb2   :  { %95 = vst [vmem:[%s135_s3] sm:$0xff] %v94_v35  }

// kernel: gpt_forward.44
= control target key start
LH: loop header
LB: loop body
LE: loop exit
PB: predicated region body
PF: predicated region fallthrough
CT: control target
= control target key end

     0   :  { %v867_v3 = vmov 0   ;;  %s1120_s1 = inlined_call_operand.vmem [shape: bf16[128,1024], index: 1, kind: input, shape index: {}]   ;;  %s1121_s0 = inlined_call_operand.vmem [shape: bf16[16,128], index: 0, kind: input, shape index: {}]   ;;  %s1122_s2 = inlined_call_operand.vmem [shape: f32[1,1024], index: 2, kind: input, shape index: {}]   ;;  %s1123_s3 = inlined_call_operand.vmem [shape: bf16[16,1024], index: 3, kind: output, shape index: {}]  }
   0x1   :  { %v109_v0 = vld [vmem:[%s1120_s1 + $0x1c0] sm:$0xff]  ;;  %v110_v2 = vld [vmem:[%s1120_s1 + $0x1c8] sm:$0xff]  ;;  %475 = vmatprep.mubr.bf16.mxu0 %v867_v3  ;;  %518 = vmatprep.mubr.bf16.mxu1 %v867_v3  ;;  %v111_v63 = vld [vmem:[%s1120_s1 + $0x1d0] sm:$0xff] }
   0x2   :  { %v113_v1 = vld [vmem:[%s1120_s1 + $0x1e0] sm:$0xff]  ;;  %v114_v5 = vld [vmem:[%s1120_s1 + $0x1e8] sm:$0xff] }
   0x3   :  { %v842_v4 = vcombine.high %v109_v0, %v113_v1  ;;  %v841_v6 = vcombine.low %v109_v0, %v113_v1  ;;  %v101_v7 = vld [vmem:[%s1120_s1 + $0x180] sm:$0xff]  ;;  %v844_v9 = vcombine.high %v110_v2, %v114_v5  ;;  %v843_v10 = vcombine.low %v110_v2, %v114_v5  ;;  %v102_v12 = vld [vmem:[%s1120_s1 + $0x188] sm:$0xff]  ;;  %v115_v0 = vld [vmem:[%s1120_s1 + $0x1f0] sm:$0xff] }
   0x4   :  { %v105_v8 = vld [vmem:[%s1120_s1 + $0x1a0] sm:$0xff]  ;;  %v106_v13 = vld [vmem:[%s1120_s1 + $0x1a8] sm:$0xff]  ;;  %v112_v1 = vld [vmem:[%s1120_s1 + $0x1d8] sm:$0xff] }
   0x5   :  { %v834_v11 = vcombine.high %v101_v7, %v105_v8  ;;  %v93_v14 = vld [vmem:[%s1120_s1 + $0x140] sm:$0xff]  ;;  %443 = vmatprep.subr.bf16.mxu0 %v842_v4  ;;  %v836_v15 = vcombine.high %v102_v12, %v106_v13  ;;  %v94_v17 = vld [vmem:[%s1120_s1 + $0x148] sm:$0xff]  ;;  %486 = vmatprep.subr.bf16.mxu1 %v844_v9  ;;  %v833_v19 = vcombine.low %v101_v7, %v105_v8  ;;  %v116_v2 = vld [vmem:[%s1120_s1 + $0x1f8] sm:$0xff] }
   0x6   :  { %v97_v16 = vld [vmem:[%s1120_s1 + $0x160] sm:$0xff]  ;;  %v98_v18 = vld [vmem:[%s1120_s1 + $0x168] sm:$0xff]  ;;  %444 = vmatpush1.bf16.msra.mxu0 %v841_v6  ;;  %487 = vmatpush1.bf16.msra.mxu1 %v843_v10  ;;  %v835_v20 = vcombine.low %v102_v12, %v106_v13  ;;  %v846_v6 = vcombine.high %v111_v63, %v115_v0  ;;  %v848_v7 = vcombine.high %v112_v1, %v116_v2  ;;  %v103_v8 = vld [vmem:[%s1120_s1 + $0x190] sm:$0xff] }
   0x7   :  { %445 = vmatprep.subr.bf16.mxu0 %v834_v11  ;;  %v826_v21 = vcombine.high %v93_v14, %v97_v16  ;;  %488 = vmatprep.subr.bf16.mxu1 %v836_v15  ;;  %v828_v22 = vcombine.high %v94_v17, %v98_v18  ;;  %v85_v23 = vld [vmem:[%s1120_s1 + $0x100] sm:$0xff]  ;;  %v86_v25 = vld [vmem:[%s1120_s1 + $0x108] sm:$0xff]  ;;  %v825_v27 = vcombine.low %v93_v14, %v97_v16  ;;  %v107_v9 = vld [vmem:[%s1120_s1 + $0x1b0] sm:$0xff] }
   0x8   :  { %v89_v24 = vld [vmem:[%s1120_s1 + $0x120] sm:$0xff]  ;;  %v90_v26 = vld [vmem:[%s1120_s1 + $0x128] sm:$0xff]  ;;  %v827_v28 = vcombine.low %v94_v17, %v98_v18  ;;  %v104_v11 = vld [vmem:[%s1120_s1 + $0x198] sm:$0xff]  ;;  %v845_v13 = vcombine.low %v111_v63, %v115_v0  ;;  %v847_v14 = vcombine.low %v112_v1, %v116_v2  ;;  %v838_v15 = vcombine.high %v103_v8, %v107_v9 }
   0x9   :  { %v818_v29 = vcombine.high %v85_v23, %v89_v24  ;;  %v820_v30 = vcombine.high %v86_v25, %v90_v26  ;;  %v77_v31 = vld [vmem:[%s1120_s1 + $0xc0] sm:$0xff]  ;;  %v78_v33 = vld [vmem:[%s1120_s1 + $0xc8] sm:$0xff]  ;;  %v817_v35 = vcombine.low %v85_v23, %v89_v24  ;;  %v819_v36 = vcombine.low %v86_v25, %v90_v26  ;;  %v108_v12 = vld [vmem:[%s1120_s1 + $0x1b8] sm:$0xff] }
   0xa   :  { %446 = vmatpush1.bf16.msra.mxu0 %v833_v19  ;;  %489 = vmatpush1.bf16.msra.mxu1 %v835_v20  ;;  %v81_v32 = vld [vmem:[%s1120_s1 + $0xe0] sm:$0xff]  ;;  %v82_v34 = vld [vmem:[%s1120_s1 + $0xe8] sm:$0xff]  ;;  %v840_v16 = vcombine.high %v104_v11, %v108_v12  ;;  %v95_v17 = vld [vmem:[%s1120_s1 + $0x150] sm:$0xff]  ;;  %v668_v2 = vlaneseq }
   0xb   :  { %447 = vmatprep.subr.bf16.mxu0 %v826_v21  ;;  %490 = vmatprep.subr.bf16.mxu1 %v828_v22  ;;  %v810_v37 = vcombine.high %v77_v31, %v81_v32  ;;  %v812_v38 = vcombine.high %v78_v33, %v82_v34  ;;  %v69_v39 = vld [vmem:[%s1120_s1 + $0x80] sm:$0xff]  ;;  %v70_v41 = vld [vmem:[%s1120_s1 + $0x88] sm:$0xff]  ;;  %v809_v43 = vcombine.low %v77_v31, %v81_v32  ;;  %v99_v18 = vld [vmem:[%s1120_s1 + $0x170] sm:$0xff] }
   0xc   :  { %v73_v40 = vld [vmem:[%s1120_s1 + $0xa0] sm:$0xff]  ;;  %v74_v42 = vld [vmem:[%s1120_s1 + $0xa8] sm:$0xff]  ;;  %v811_v44 = vcombine.low %v78_v33, %v82_v34  ;;  %v96_v19 = vld [vmem:[%s1120_s1 + $0x158] sm:$0xff]  ;;  %v837_v21 = vcombine.low %v103_v8, %v107_v9  ;;  %v839_v22 = vcombine.low %v104_v11, %v108_v12  ;;  %v830_v23 = vcombine.high %v95_v17, %v99_v18 }
   0xd   :  { %v802_v45 = vcombine.high %v69_v39, %v73_v40  ;;  %v804_v46 = vcombine.high %v70_v41, %v74_v42  ;;  %v61_v47 = vld [vmem:[%s1120_s1 + $0x40] sm:$0xff]  ;;  %v62_v49 = vld [vmem:[%s1120_s1 + $0x48] sm:$0xff]  ;;  %v801_v51 = vcombine.low %v69_v39, %v73_v40  ;;  %v803_v52 = vcombine.low %v70_v41, %v74_v42  ;;  %v100_v20 = vld [vmem:[%s1120_s1 + $0x178] sm:$0xff] }
   0xe   :  { %448 = vmatpush1.bf16.msra.mxu0 %v825_v27  ;;  %491 = vmatpush1.bf16.msra.mxu1 %v827_v28  ;;  %v65_v48 = vld [vmem:[%s1120_s1 + $0x60] sm:$0xff]  ;;  %v66_v50 = vld [vmem:[%s1120_s1 + $0x68] sm:$0xff]  ;;  %v832_v24 = vcombine.high %v96_v19, %v100_v20  ;;  %v87_v25 = vld [vmem:[%s1120_s1 + $0x110] sm:$0xff] }
   0xf   :  { %449 = vmatprep.subr.bf16.mxu0 %v818_v29  ;;  %492 = vmatprep.subr.bf16.mxu1 %v820_v30  ;;  %v794_v53 = vcombine.high %v61_v47, %v65_v48  ;;  %v796_v54 = vcombine.high %v62_v49, %v66_v50  ;;  %v53_v55 = vld [vmem:[%s1120_s1] sm:$0xff]  ;;  %v54_v57 = vld [vmem:[%s1120_s1 + $0x8] sm:$0xff]  ;;  %v793_v59 = vcombine.low %v61_v47, %v65_v48  ;;  %v91_v26 = vld [vmem:[%s1120_s1 + $0x130] sm:$0xff] }
  0x10   :  { %v57_v56 = vld [vmem:[%s1120_s1 + $0x20] sm:$0xff]  ;;  %v58_v58 = vld [vmem:[%s1120_s1 + $0x28] sm:$0xff]  ;;  %v795_v60 = vcombine.low %v62_v49, %v66_v50  ;;  %v88_v27 = vld [vmem:[%s1120_s1 + $0x118] sm:$0xff]  ;;  %v829_v29 = vcombine.low %v95_v17, %v99_v18  ;;  %v831_v30 = vcombine.low %v96_v19, %v100_v20  ;;  %v822_v31 = vcombine.high %v87_v25, %v91_v26 }
  0x11   :  { %v786_v61 = vcombine.high %v53_v55, %v57_v56  ;;  %v788_v62 = vcombine.high %v54_v57, %v58_v58  ;;  %v785_v4 = vcombine.low %v53_v55, %v57_v56  ;;  %v787_v5 = vcombine.low %v54_v57, %v58_v58  ;;  %v1007_v10 = vld [vmem:[%s1121_s0] sm:$0xff]   ;;  %v92_v28 = vld [vmem:[%s1120_s1 + $0x138] sm:$0xff]  ;;  %v79_v33 = vld [vmem:[%s1120_s1 + $0xd0] sm:$0xff] }
  0x12   :  { %450 = vmatpush1.bf16.msra.mxu0 %v817_v35  ;;  %493 = vmatpush1.bf16.msra.mxu1 %v819_v36  ;;  %v824_v32 = vcombine.high %v88_v27, %v92_v28  ;;  %v83_v34 = vld [vmem:[%s1120_s1 + $0xf0] sm:$0xff]  ;;  %v84_v35 = vld [vmem:[%s1120_s1 + $0xf8] sm:$0xff]  ;;  %v821_v36 = vcombine.low %v87_v25, %v91_v26 }
  0x13   :  { %451 = vmatprep.subr.bf16.mxu0 %v810_v37  ;;  %494 = vmatprep.subr.bf16.mxu1 %v812_v38  ;;  %v823_v37 = vcombine.low %v88_v27, %v92_v28  ;;  %v814_v38 = vcombine.high %v79_v33, %v83_v34  ;;  %v71_v40 = vld [vmem:[%s1120_s1 + $0x90] sm:$0xff]  ;;  %v72_v42 = vld [vmem:[%s1120_s1 + $0x98] sm:$0xff] }
  0x14   :  { %v75_v41 = vld [vmem:[%s1120_s1 + $0xb0] sm:$0xff]  ;;  %v64_v50 = vld [vmem:[%s1120_s1 + $0x58] sm:$0xff] }
  0x15   :  { %v63_v48 = vld [vmem:[%s1120_s1 + $0x50] sm:$0xff]  ;;  %v56_v58 = vld [vmem:[%s1120_s1 + $0x18] sm:$0xff] }
  0x16   :  { %452 = vmatpush1.bf16.msra.mxu0 %v809_v43  ;;  %495 = vmatpush1.bf16.msra.mxu1 %v811_v44  ;;  %v76_v43 = vld [vmem:[%s1120_s1 + $0xb8] sm:$0xff]  ;;  %v813_v44 = vcombine.low %v79_v33, %v83_v34  ;;  %v67_v49 = vld [vmem:[%s1120_s1 + $0x70] sm:$0xff] }
  0x17   :  { %453 = vmatprep.subr.bf16.mxu0 %v802_v45  ;;  %496 = vmatprep.subr.bf16.mxu1 %v804_v46  ;;  %v806_v46 = vcombine.high %v71_v40, %v75_v41  ;;  %v808_v47 = vcombine.high %v72_v42, %v76_v43  ;;  %v55_v56 = vld [vmem:[%s1120_s1 + $0x10] sm:$0xff] }
  0x18   :  { %v59_v57 = vld [vmem:[%s1120_s1 + $0x30] sm:$0xff] }
  0x19   :  { %v789_v0 = vcombine.low %v55_v56, %v59_v57 }
  0x1a   :  { %454 = vmatpush1.bf16.msra.mxu0 %v801_v51  ;;  %497 = vmatpush1.bf16.msra.mxu1 %v803_v52  ;;  %v68_v51 = vld [vmem:[%s1120_s1 + $0x78] sm:$0xff]  ;;  %v805_v52 = vcombine.low %v71_v40, %v75_v41 }
  0x1b   :  { %455 = vmatprep.subr.bf16.mxu0 %v794_v53  ;;  %498 = vmatprep.subr.bf16.mxu1 %v796_v54  ;;  %v807_v53 = vcombine.low %v72_v42, %v76_v43  ;;  %v798_v54 = vcombine.high %v63_v48, %v67_v49  ;;  %v800_v55 = vcombine.high %v64_v50, %v68_v51 }
  0x1e   :  { %456 = vmatpush1.bf16.msra.mxu0 %v793_v59  ;;  %499 = vmatpush1.bf16.msra.mxu1 %v795_v60  ;;  %v60_v59 = vld [vmem:[%s1120_s1 + $0x38] sm:$0xff]  ;;  %v797_v60 = vcombine.low %v63_v48, %v67_v49 }
  0x1f   :  { %457 = vmatprep.subr.bf16.mxu0 %v786_v61  ;;  %500 = vmatprep.subr.bf16.mxu1 %v788_v62  ;;  %v799_v61 = vcombine.low %v64_v50, %v68_v51  ;;  %v790_v62 = vcombine.high %v55_v56, %v59_v57  ;;  %v792_v63 = vcombine.high %v56_v58, %v60_v59 }
  0x20   :  { %v791_v1 = vcombine.low %v56_v58, %v60_v59 }
  0x22   :  { %458 = vmatpush1.bf16.msra.mxu0 %v785_v4  ;;  %501 = vmatpush1.bf16.msra.mxu1 %v787_v5  ;;  %v669_v4 = vshrl.u32 %v668_v2, 7 }
  0x23   :  { %529 = vmatprep.subr.bf16.mxu0 %v846_v6  ;;  %572 = vmatprep.subr.bf16.mxu1 %v848_v7  ;;  %v666_v6 = vld [vmem:[%s1122_s2] sm:$0xff] }
  0x24   :  { %v670_v5 = vsub.s32 0, %v669_v4  ;;  %v678_v7 = vsub.s32 2, %v669_v4  ;;  %v674_v8 = vsub.s32 1, %v669_v4  ;;  %v682_v9 = vsub.s32 3, %v669_v4 }
  0x25   :  { %476 = vmatmul.mubr.bf16.vlgmr.msra.gmra.mxu0 %v1007_v10  ;;  %519 = vmatmul.mubr.bf16.vlgmr.msra.gmra.mxu1 %v1007_v10  ;;  %v686_v34 = vsub.s32 4, %v669_v4 }
  0x26   :  { %530 = vmatpush1.bf16.msra.mxu0 %v845_v13  ;;  %573 = vmatpush1.bf16.msra.mxu1 %v847_v14  ;;  %v671_v11 = vrot.slane %v666_v6, %v670_v5  ;;  %v679_v12 = vrot.slane %v666_v6, %v678_v7  ;;  %v675_v13 = vrot.slane %v666_v6, %v674_v8 }
  0x27   :  { %531 = vmatprep.subr.bf16.mxu0 %v838_v15  ;;  %574 = vmatprep.subr.bf16.mxu1 %v840_v16  ;;  %v683_v15 = vrot.slane %v666_v6, %v682_v9 }
  0x28   :  { %561 = vmatprep.mubr.bf16.mxu0 %v867_v3  ;;  %604 = vmatprep.mubr.bf16.mxu1 %v867_v3  ;;  %v80_v3 = vld [vmem:[%s1120_s1 + $0xd8] sm:$0xff] }
  0x29   :  { %v816_v39 = vcombine.high %v80_v3, %v84_v35  ;;  %v815_v45 = vcombine.low %v80_v3, %v84_v35  ;;  %v690_v3 = vsub.s32 5, %v669_v4  ;;  %v694_v35 = vsub.s32 6, %v669_v4 }
  0x2a   :  { %532 = vmatpush1.bf16.msra.mxu0 %v837_v21  ;;  %575 = vmatpush1.bf16.msra.mxu1 %v839_v22 }
  0x2b   :  { %533 = vmatprep.subr.bf16.mxu0 %v830_v23  ;;  %576 = vmatprep.subr.bf16.mxu1 %v832_v24  ;;  %v695_v40 = vrot.slane %v666_v6, %v694_v35 }
  0x2e   :  { %534 = vmatpush1.bf16.msra.mxu0 %v829_v29  ;;  %577 = vmatpush1.bf16.msra.mxu1 %v831_v30 }
  0x2f   :  { %535 = vmatprep.subr.bf16.mxu0 %v822_v31  ;;  %578 = vmatprep.subr.bf16.mxu1 %v824_v32 }
  0x32   :  { %536 = vmatpush1.bf16.msra.mxu0 %v821_v36  ;;  %579 = vmatpush1.bf16.msra.mxu1 %v823_v37  ;;  %v698_v36 = vsub.s32 7, %v669_v4  ;;  %v687_v37 = vrot.slane %v666_v6, %v686_v34 }
  0x33   :  { %537 = vmatprep.subr.bf16.mxu0 %v814_v38  ;;  %580 = vmatprep.subr.bf16.mxu1 %v816_v39  ;;  %v691_v38 = vrot.slane %v666_v6, %v690_v3 }
  0x34   :  { %v699_v41 = vrot.slane %v666_v6, %v698_v36 }
  0x36   :  { %538 = vmatpush1.bf16.msra.mxu0 %v813_v44  ;;  %581 = vmatpush1.bf16.msra.mxu1 %v815_v45 }
  0x37   :  { %539 = vmatprep.subr.bf16.mxu0 %v806_v46  ;;  %582 = vmatprep.subr.bf16.mxu1 %v808_v47 }
  0x3a   :  { %540 = vmatpush1.bf16.msra.mxu0 %v805_v52  ;;  %583 = vmatpush1.bf16.msra.mxu1 %v807_v53 }
  0x3b   :  { %541 = vmatprep.subr.bf16.mxu0 %v798_v54  ;;  %584 = vmatprep.subr.bf16.mxu1 %v800_v55 }
  0x3e   :  { %542 = vmatpush1.bf16.msra.mxu0 %v797_v60  ;;  %585 = vmatpush1.bf16.msra.mxu1 %v799_v61 }
  0x3f   :  { %543 = vmatprep.subr.bf16.mxu0 %v790_v62  ;;  %586 = vmatprep.subr.bf16.mxu1 %v792_v63 }
  0x42   :  { %544 = vmatpush1.bf16.msra.mxu0 %v789_v0  ;;  %587 = vmatpush1.bf16.msra.mxu1 %v791_v1 }
  0x45   :  { %562 = vmatmul.mubr.bf16.vlgmr.msra.gmra.mxu0 %v1007_v10  ;;  %605 = vmatmul.mubr.bf16.vlgmr.msra.gmra.mxu1 %v1007_v10 }
  0xe5   :  { %v477_v14 = vpop.f32.mrf.mxu0  ;;  %v520_v17 = vpop.f32.mrf.mxu1 }
  0xe6   :  { %v708_v16 = vadd.f32 %v671_v11, %v477_v14  ;;  %v710_v18 = vadd.f32 %v679_v12, %v520_v17 }
  0xe7   :  { %v479_v19 = vpop.f32.mrf.mxu0  ;;  %v522_v20 = vpop.f32.mrf.mxu1 }
  0xe8   :  { %v709_v10 = vadd.f32 %v675_v13, %v479_v19  ;;  %v711_v21 = vadd.f32 %v683_v15, %v522_v20 }
  0xe9   :  { %v481_v22 = vpop.f32.mrf.mxu0  ;;  %v524_v24 = vpop.f32.mrf.mxu1 }
  0xea   :  { %v857_v23 = vpack.c.bf16 %v709_v10, %v708_v16  ;;  %v858_v25 = vpack.c.bf16 %v711_v21, %v710_v18  ;;  %v716_v27 = vadd.f32 %v671_v11, %v481_v22  ;;  %v718_v30 = vadd.f32 %v679_v12, %v524_v24 }
  0xeb   :  { %v483_v26 = vpop.f32.mrf.mxu0  ;;  %v526_v29 = vpop.f32.mrf.mxu1 }
  0xec   :  { %772 = vst [vmem:[%s1123_s3] sm:$0xff] %v857_v23  ;;  %v717_v28 = vadd.f32 %v675_v13, %v483_v26  ;;  %773 = vst [vmem:[%s1123_s3 + $0x8] sm:$0xff] %v858_v25  ;;  %v719_v31 = vadd.f32 %v683_v15, %v526_v29 }
  0xee   :  { %v861_v32 = vpack.c.bf16 %v717_v28, %v716_v27  ;;  %v862_v33 = vpack.c.bf16 %v719_v31, %v718_v30 }
  0xf0   :  { %776 = vst [vmem:[%s1123_s3 + $0x20] sm:$0xff] %v861_v32  ;;  %777 = vst [vmem:[%s1123_s3 + $0x28] sm:$0xff] %v862_v33 }
 0x105   :  { %v563_v39 = vpop.f32.mrf.mxu0  ;;  %v606_v42 = vpop.f32.mrf.mxu1 }
 0x106   :  { %v712_v44 = vadd.f32 %v687_v37, %v563_v39  ;;  %v714_v47 = vadd.f32 %v695_v40, %v606_v42 }
 0x107   :  { %v565_v43 = vpop.f32.mrf.mxu0  ;;  %v608_v46 = vpop.f32.mrf.mxu1 }
 0x108   :  { %v713_v45 = vadd.f32 %v691_v38, %v565_v43  ;;  %v715_v48 = vadd.f32 %v699_v41, %v608_v46 }
 0x109   :  { %v567_v49 = vpop.f32.mrf.mxu0  ;;  %v610_v51 = vpop.f32.mrf.mxu1 }
 0x10a   :  { %v859_v50 = vpack.c.bf16 %v713_v45, %v712_v44  ;;  %v860_v52 = vpack.c.bf16 %v715_v48, %v714_v47  ;;  %v720_v54 = vadd.f32 %v687_v37, %v567_v49  ;;  %v722_v57 = vadd.f32 %v695_v40, %v610_v51 }
 0x10b   :  { %v569_v53 = vpop.f32.mrf.mxu0  ;;  %v612_v56 = vpop.f32.mrf.mxu1 }
 0x10c   :  { %774 = vst [vmem:[%s1123_s3 + $0x10] sm:$0xff] %v859_v50  ;;  %v721_v55 = vadd.f32 %v691_v38, %v569_v53  ;;  %775 = vst [vmem:[%s1123_s3 + $0x18] sm:$0xff] %v860_v52  ;;  %v723_v58 = vadd.f32 %v699_v41, %v612_v56 }
 0x10e   :  { %v863_v59 = vpack.c.bf16 %v721_v55, %v720_v54  ;;  %v864_v60 = vpack.c.bf16 %v723_v58, %v722_v57 }
 0x110   :  { %778 = vst [vmem:[%s1123_s3 + $0x30] sm:$0xff] %v863_v59  ;;  %779 = vst [vmem:[%s1123_s3 + $0x38] sm:$0xff] %v864_v60 }

// kernel: gpt_forward.59
= control target key start
LH: loop header
LB: loop body
LE: loop exit
PB: predicated region body
PF: predicated region fallthrough
CT: control target
= control target key end

     0   :  { %v227_v0 = vmov 0.0   ;;  %vm228_vm0 = vmmov 0   ;;  %s282_s1 = inlined_call_operand.vmem [shape: bf16[128,128], index: 1, kind: input, shape index: {}]   ;;  %s283_s0 = inlined_call_operand.vmem [shape: bf16[16,128], index: 0, kind: input, shape index: {}]   ;;  %s284_s2 = inlined_call_operand.vmem [shape: f32[1,128], index: 2, kind: input, shape index: {}]   ;;  %s285_s3 = inlined_call_operand.vmem [shape: bf16[16,128], index: 3, kind: output, shape index: {}]  }
   0x1   :  { %196 = vmatprep.subr.bf16.mxu0 %v227_v0  ;;  %v218_v1 = vld [vmem:[%s282_s1 + $0x38] sm:$0xff]   ;;  %212 = vmatprep.mubr.msk.bf16.mxu0 %vm228_vm0, %v227_v0  ;;  %v219_v2 = vld [vmem:[%s282_s1 + $0x30] sm:$0xff]   ;;  %v220_v3 = vld [vmem:[%s282_s1 + $0x28] sm:$0xff]  }
   0x2   :  { %197 = vmatpush3.bf16.msra.mxu0 %v218_v1  ;;  %v221_v4 = vld [vmem:[%s282_s1 + $0x20] sm:$0xff]   ;;  %v222_v5 = vld [vmem:[%s282_s1 + $0x18] sm:$0xff]   ;;  %v223_v6 = vld [vmem:[%s282_s1 + $0x10] sm:$0xff]  }
   0x3   :  { %198 = vmatprep.subr.bf16.mxu0 %v227_v0  ;;  %v224_v7 = vld [vmem:[%s282_s1 + $0x8] sm:$0xff]   ;;  %v225_v8 = vld [vmem:[%s282_s1] sm:$0xff]  }
   0x4   :  { %v226_v9 = vld [vmem:[%s283_s0] sm:$0xff]  }
   0x5   :  { %v177_v11 = vld [vmem:[%s284_s2] ss:$0 sm:$0xff] }
   0x6   :  { %199 = vmatpush3.bf16.msra.mxu0 %v219_v2 }
   0x7   :  { %200 = vmatprep.subr.bf16.mxu0 %v227_v0 }
   0xa   :  { %201 = vmatpush3.bf16.msra.mxu0 %v220_v3 }
   0xb   :  { %202 = vmatprep.subr.bf16.mxu0 %v227_v0 }
   0xe   :  { %203 = vmatpush3.bf16.msra.mxu0 %v221_v4 }
   0xf   :  { %204 = vmatprep.subr.bf16.mxu0 %v227_v0 }
  0x12   :  { %205 = vmatpush3.bf16.msra.mxu0 %v222_v5 }
  0x13   :  { %206 = vmatprep.subr.bf16.mxu0 %v227_v0 }
  0x16   :  { %207 = vmatpush3.bf16.msra.mxu0 %v223_v6 }
  0x17   :  { %208 = vmatprep.subr.bf16.mxu0 %v227_v0 }
  0x1a   :  { %209 = vmatpush3.bf16.msra.mxu0 %v224_v7 }
  0x1b   :  { %210 = vmatprep.subr.bf16.mxu0 %v227_v0 }
  0x1e   :  { %211 = vmatpush3.bf16.msra.mxu0 %v225_v8 }
  0x21   :  { %213 = vmatmul.mubr.bf16.vlgmr.msra.gmra.mxu0 %v226_v9 }
  0xe1   :  { %v129_v10 = vpop.f32.mrf.mxu0 }
  0xe2   :  { %v152_v14 = vadd.f32 %v177_v11, %v129_v10 }
  0xe3   :  { %v214_v12 = vpop.f32.mrf.mxu0 }
  0xe5   :  { %v132_v13 = vpop.f32.mrf.mxu0 }
  0xe6   :  { %v153_v15 = vadd.f32 %v177_v11, %v132_v13 }
  0xe7   :  { %v215_v16 = vpop.f32.mrf.mxu0 }
  0xe8   :  { %v185_v17 = vpack.c.bf16 %v153_v15, %v152_v14 }
  0xea   :  { %186 = vst [vmem:[%s285_s3] sm:$0xff] %v185_v17  }

</bundles_post_ra>
